<compile_context>
chip_gen: v6e
topology: v6e:2x2x1
jax: 0.10.0
libtpu: 0.0.40
codegen_flags: <defaults>
</compile_context>

<pallas_src>
import functools

import jax
import jax.numpy as jnp
from jax import lax
from jax.experimental import pallas as pl
from jax.experimental.pallas import tpu as pltpu

# ----------------------------- config (small, consistent with the module) ----
VOCAB_SIZE = 65      # tokenizer.vocab_size (e.g. tiny-shakespeare charset)
BLOCK_SIZE = 16      # block_size
N_EMBED    = 64      # n_embed  (downscaled from 384)
N_HEAD     = 4       # n_head   (downscaled from 6)
N_LAYER    = 2       # n_layer  (downscaled from 6)
HEAD_SIZE  = N_EMBED // N_HEAD
FFN_DIM    = 4 * N_EMBED
LN_EPS     = 1e-5

C_PAD   = 128        # lane-dense padded channel dim
V_PAD   = 128        # lane-dense padded vocab dim
NEG_INF = -1e30      # large finite negative for the causal mask


# ----------------------------- in-kernel helpers -----------------------------
def _mm(a, b):
    # (m, k) @ (k, n) -> (m, n), f32 accumulation on the MXU
    return lax.dot_general(a, b, (((1,), (0,)), ((), ())),
                           preferred_element_type=jnp.float32)


def _mm_nt(a, b):
    # (m, k) @ (n, k)^T -> (m, n) without an explicit transpose
    return lax.dot_general(a, b, (((1,), (1,)), ((), ())),
                           preferred_element_type=jnp.float32)


def _layer_norm(x, g, b):
    # x: (T, C_PAD) with padded channels == 0; statistics over the real C only.
    mean = jnp.sum(x, axis=-1, keepdims=True) * (1.0 / N_EMBED)
    var = jnp.sum(x * x, axis=-1, keepdims=True) * (1.0 / N_EMBED) - mean * mean
    xn = (x - mean) * lax.rsqrt(var + LN_EPS)
    # padded gamma/beta are zero -> padded channels stay exactly zero
    return xn * g + b


# ----------------------------- fused forward kernel --------------------------
def babygpt_fused_kernel(idx_ref, tok_ref, pos_ref,
                         ln1g_ref, ln1b_ref, wqkv_ref, wo_ref, bo_ref,
                         ln2g_ref, ln2b_ref, w1_ref, b1_ref, w2_ref, b2_ref,
                         lnfg_ref, lnfb_ref, lmw_ref, lmb_ref,
                         o_ref):
    T = idx_ref.shape[0]
    vpad = tok_ref.shape[0]
    cpad = tok_ref.shape[1]

    # ---- token-embedding gather as a one-hot matmul (MXU) + positional add ---
    ids = idx_ref[...]                                          # (T, 1) int32
    vocab_iota = lax.broadcasted_iota(jnp.int32, (T, vpad), 1)
    onehot = (vocab_iota == ids).astype(jnp.float32)            # (T, V_PAD)
    x = _mm(onehot, tok_ref[...]) + pos_ref[...]                # (T, C_PAD) f32

    # ---- causal additive bias (finite negative, no -inf arithmetic) ----------
    row = lax.broadcasted_iota(jnp.int32, (T, T), 0)
    col = lax.broadcasted_iota(jnp.int32, (T, T), 1)
    causal_bias = jnp.where(col <= row, 0.0, NEG_INF).astype(jnp.float32)

    # ---- transformer blocks (static unroll over the 2 layers) ----------------
    for l in range(N_LAYER):
        # pre-LN + fused multi-head causal self-attention
        h = _layer_norm(x, ln1g_ref[l], ln1b_ref[l])
        qkv = _mm(h, wqkv_ref[l])                               # (T, 3*C_PAD)
        q = qkv[:, 0 * cpad:1 * cpad]                           # 1/sqrt(hs) folded in
        k = qkv[:, 1 * cpad:2 * cpad]
        v = qkv[:, 2 * cpad:3 * cpad]

        head_outs = []
        for hh in range(N_HEAD):
            lo, hi = hh * HEAD_SIZE, (hh + 1) * HEAD_SIZE
            s = _mm_nt(q[:, lo:hi], k[:, lo:hi]) + causal_bias  # (T, T)
            m = jnp.max(s, axis=-1, keepdims=True)
            p = jnp.exp(s - m)
            denom = jnp.sum(p, axis=-1, keepdims=True)
            p = p * pl.reciprocal(denom, approx=True)           # softmax (EUP recip)
            # dropout(p) is identity at inference
            head_outs.append(_mm(p, v[:, lo:hi]))               # (T, hs)
        head_outs.append(jnp.zeros((T, cpad - N_EMBED), jnp.float32))
        attn = jnp.concatenate(head_outs, axis=-1)              # (T, C_PAD)
        x = x + _mm(attn, wo_ref[l]) + bo_ref[l]                # residual 1

        # pre-LN + feed-forward (ReLU)
        h = _layer_norm(x, ln2g_ref[l], ln2b_ref[l])
        f = jnp.maximum(_mm(h, w1_ref[l]) + b1_ref[l], 0.0)     # (T, 4C)
        x = x + _mm(f, w2_ref[l]) + b2_ref[l]                   # residual 2

    # ---- final LN + lm_head (lane-dense padded vocab) -------------------------
    xf = _layer_norm(x, lnfg_ref[...], lnfb_ref[...])
    o_ref[...] = (_mm(xf, lmw_ref[...]) + lmb_ref[...]).astype(o_ref.dtype)


# ----------------------------- pallas_call wrapper ----------------------------
def _full_spec(shape):
    nd = len(shape)
    return pl.BlockSpec(shape, lambda i: (0,) * nd)


def babygpt_forward_impl(idx, params):
    B, T_in = idx.shape
    T = min(T_in, BLOCK_SIZE)
    idx = idx[:, -T:]
    idx3 = idx.astype(jnp.int32)[:, :, None]                    # (B, T, 1)
    pos = params["pos_emb"][:T]                                 # (T, C_PAD)

    weight_inputs = (
        params["tok_emb"], pos,
        params["ln1_g"], params["ln1_b"],
        params["wqkv"], params["wo"], params["bo"],
        params["ln2_g"], params["ln2_b"],
        params["w1"], params["b1"], params["w2"], params["b2"],
        params["lnf_g"], params["lnf_b"], params["lm_w"], params["lm_b"],
    )

    in_specs = [pl.BlockSpec((None, T, 1), lambda i: (i, 0, 0))]
    in_specs += [_full_spec(w.shape) for w in weight_inputs]

    logits_pad = pl.pallas_call(
        babygpt_fused_kernel,
        out_shape=jax.ShapeDtypeStruct((B, T, V_PAD), jnp.float32),
        grid=(B,),
        in_specs=in_specs,
        out_specs=pl.BlockSpec((None, T, V_PAD), lambda i: (i, 0, 0)),
        compiler_params=pltpu.CompilerParams(
            dimension_semantics=("parallel",)),
    )(idx3, *weight_inputs)

    # slice the padded vocab back to the real logits
    return logits_pad[:, :, :VOCAB_SIZE]


babygpt_forward = jax.jit(babygpt_forward_impl)


# ----------------------------- parameters (packed & lane-padded) --------------
def _pad2(a, shape):
    out = jnp.zeros(shape, a.dtype)
    return out.at[:a.shape[0], :a.shape[1]].set(a)


def init_params(key):
    C, H, L, hs = N_EMBED, N_HEAD, N_LAYER, HEAD_SIZE
    scale = 0.02

    def w(k, shape):
        return (scale * jax.random.normal(k, shape)).astype(jnp.float32)

    def pad_row(v):  # (n,) -> (1, C_PAD)-style zero-padded row
        return _pad2(v[None, :], (1, v.shape[0] if v.shape[0] >= C_PAD else C_PAD))

    keys = jax.random.split(key, 3 + L)
    tok = _pad2(w(keys[0], (VOCAB_SIZE, C)), (V_PAD, C_PAD))
    pos = _pad2(w(keys[1], (BLOCK_SIZE, C)), (BLOCK_SIZE, C_PAD))
    lm_w = _pad2(w(keys[2], (C, VOCAB_SIZE)), (C_PAD, V_PAD))
    lm_b = jnp.zeros((1, V_PAD), jnp.float32)

    attn_scale = 1.0 / float(hs) ** 0.5                          # folded into Wq
    ln1_g, ln1_b, ln2_g, ln2_b = [], [], [], []
    wqkv, wo, bo, w1, b1, w2, b2 = [], [], [], [], [], [], []
    for l in range(L):
        bk = jax.random.split(keys[3 + l], 6)
        wq = w(bk[0], (C, C)) * attn_scale                       # heads packed along cols
        wk = w(bk[1], (C, C))
        wv = w(bk[2], (C, C))
        wqkv.append(jnp.concatenate(
            [_pad2(wq, (C_PAD, C_PAD)),
             _pad2(wk, (C_PAD, C_PAD)),
             _pad2(wv, (C_PAD, C_PAD))], axis=1))                # (C_PAD, 3*C_PAD)
        wo.append(_pad2(w(bk[3], (C, C)), (C_PAD, C_PAD)))
        bo.append(jnp.zeros((1, C_PAD), jnp.float32))
        w1.append(_pad2(w(bk[4], (C, FFN_DIM)), (C_PAD, FFN_DIM)))
        b1.append(jnp.zeros((1, FFN_DIM), jnp.float32))
        w2.append(_pad2(w(bk[5], (FFN_DIM, C)), (FFN_DIM, C_PAD)))
        b2.append(jnp.zeros((1, C_PAD), jnp.float32))
        ln1_g.append(_pad2(jnp.ones((1, C), jnp.float32), (1, C_PAD)))  # pads = 0
        ln1_b.append(jnp.zeros((1, C_PAD), jnp.float32))
        ln2_g.append(_pad2(jnp.ones((1, C), jnp.float32), (1, C_PAD)))
        ln2_b.append(jnp.zeros((1, C_PAD), jnp.float32))

    return {
        "tok_emb": tok, "pos_emb": pos,
        "lm_w": lm_w, "lm_b": lm_b,
        "lnf_g": _pad2(jnp.ones((1, C), jnp.float32), (1, C_PAD)),
        "lnf_b": jnp.zeros((1, C_PAD), jnp.float32),
        "ln1_g": jnp.stack(ln1_g), "ln1_b": jnp.stack(ln1_b),
        "ln2_g": jnp.stack(ln2_g), "ln2_b": jnp.stack(ln2_b),
        "wqkv": jnp.stack(wqkv), "wo": jnp.stack(wo), "bo": jnp.stack(bo),
        "w1": jnp.stack(w1), "b1": jnp.stack(b1),
        "w2": jnp.stack(w2), "b2": jnp.stack(b2),
    }


# TODO(synk): cross-entropy loss path (targets != None) and multinomial sampling in
# generate() are not part of the forward kernel; omitted.

if __name__ == "__main__":
    key = jax.random.PRNGKey(0)
    pkey, dkey = jax.random.split(key)
    params = init_params(pkey)

    B, T = 2, 8
    idx = jax.random.randint(dkey, (B, T), 0, VOCAB_SIZE, dtype=jnp.int32)

    logits = babygpt_forward(idx, params)
    jax.block_until_ready(logits)
    assert logits.shape == (B, T, VOCAB_SIZE)
    assert bool(jnp.all(jnp.isfinite(logits)))
    print("KERNEL_OK")
</pallas_src>

<mosaic_0001>
module attributes {stable_mosaic.version = 11 : i64} {
  func.func @babygpt_fused_kernel(%arg0: i32, %arg1: memref<1x8x1xi32, #tpu.memory_space<vmem>>, %arg2: memref<128x128xf32, #tpu.memory_space<vmem>>, %arg3: memref<8x128xf32, #tpu.memory_space<vmem>>, %arg4: memref<2x1x128xf32, #tpu.memory_space<vmem>>, %arg5: memref<2x1x128xf32, #tpu.memory_space<vmem>>, %arg6: memref<2x128x384xf32, #tpu.memory_space<vmem>>, %arg7: memref<2x128x128xf32, #tpu.memory_space<vmem>>, %arg8: memref<2x1x128xf32, #tpu.memory_space<vmem>>, %arg9: memref<2x1x128xf32, #tpu.memory_space<vmem>>, %arg10: memref<2x1x128xf32, #tpu.memory_space<vmem>>, %arg11: memref<2x128x256xf32, #tpu.memory_space<vmem>>, %arg12: memref<2x1x256xf32, #tpu.memory_space<vmem>>, %arg13: memref<2x256x128xf32, #tpu.memory_space<vmem>>, %arg14: memref<2x1x128xf32, #tpu.memory_space<vmem>>, %arg15: memref<1x128xf32, #tpu.memory_space<vmem>>, %arg16: memref<1x128xf32, #tpu.memory_space<vmem>>, %arg17: memref<128x128xf32, #tpu.memory_space<vmem>>, %arg18: memref<1x128xf32, #tpu.memory_space<vmem>>, %arg19: memref<1x8x128xf32, #tpu.memory_space<vmem>>) attributes {dimension_semantics = [#tpu.dimension_semantics<parallel>], iteration_bounds = array<i64: 2>, scalar_prefetch = 0 : i64, scratch_operands = 0 : i64, tpu.core_type = #tpu.core_type<tc>, window_params = [{transform_indices = @transform_0, window_bounds = array<i64: 1, 8, 1>}, {pipeline_mode = #tpu.pipeline_mode<synchronous>, transform_indices = @transform_1, window_bounds = array<i64: 128, 128>}, {pipeline_mode = #tpu.pipeline_mode<synchronous>, transform_indices = @transform_2, window_bounds = array<i64: 8, 128>}, {pipeline_mode = #tpu.pipeline_mode<synchronous>, transform_indices = @transform_3, window_bounds = array<i64: 2, 1, 128>}, {pipeline_mode = #tpu.pipeline_mode<synchronous>, transform_indices = @transform_4, window_bounds = array<i64: 2, 1, 128>}, {pipeline_mode = #tpu.pipeline_mode<synchronous>, transform_indices = @transform_5, window_bounds = array<i64: 2, 128, 384>}, {pipeline_mode = #tpu.pipeline_mode<synchronous>, transform_indices = @transform_6, window_bounds = array<i64: 2, 128, 128>}, {pipeline_mode = #tpu.pipeline_mode<synchronous>, transform_indices = @transform_7, window_bounds = array<i64: 2, 1, 128>}, {pipeline_mode = #tpu.pipeline_mode<synchronous>, transform_indices = @transform_8, window_bounds = array<i64: 2, 1, 128>}, {pipeline_mode = #tpu.pipeline_mode<synchronous>, transform_indices = @transform_9, window_bounds = array<i64: 2, 1, 128>}, {pipeline_mode = #tpu.pipeline_mode<synchronous>, transform_indices = @transform_10, window_bounds = array<i64: 2, 128, 256>}, {pipeline_mode = #tpu.pipeline_mode<synchronous>, transform_indices = @transform_11, window_bounds = array<i64: 2, 1, 256>}, {pipeline_mode = #tpu.pipeline_mode<synchronous>, transform_indices = @transform_12, window_bounds = array<i64: 2, 256, 128>}, {pipeline_mode = #tpu.pipeline_mode<synchronous>, transform_indices = @transform_13, window_bounds = array<i64: 2, 1, 128>}, {pipeline_mode = #tpu.pipeline_mode<synchronous>, transform_indices = @transform_14, window_bounds = array<i64: 1, 128>}, {pipeline_mode = #tpu.pipeline_mode<synchronous>, transform_indices = @transform_15, window_bounds = array<i64: 1, 128>}, {pipeline_mode = #tpu.pipeline_mode<synchronous>, transform_indices = @transform_16, window_bounds = array<i64: 128, 128>}, {pipeline_mode = #tpu.pipeline_mode<synchronous>, transform_indices = @transform_17, window_bounds = array<i64: 1, 128>}, {transform_indices = @transform_18, window_bounds = array<i64: 1, 8, 128>}]} {
    %c0 = arith.constant 0 : index
    %c0_0 = arith.constant 0 : index
    %c0_1 = arith.constant 0 : index
    %0 = vector.load %arg1[%c0, %c0_0, %c0_1] : memref<1x8x1xi32, #tpu.memory_space<vmem>>, vector<1x8x1xi32>
    %1 = vector.shape_cast %0 : vector<1x8x1xi32> to vector<8x1xi32>
    %2 = tpu.iota {dimensions = array<i32: 1>} : vector<8x128xi32>
    %3 = vector.broadcast %1 : vector<8x1xi32> to vector<8x128xi32>
    %4 = arith.cmpi eq, %2, %3 : vector<8x128xi32>
    %5 = arith.extui %4 : vector<8x128xi1> to vector<8x128xi32>
    %6 = arith.sitofp %5 : vector<8x128xi32> to vector<8x128xf32>
    %c0_2 = arith.constant 0 : index
    %c0_3 = arith.constant 0 : index
    %7 = vector.load %arg2[%c0_2, %c0_3] : memref<128x128xf32, #tpu.memory_space<vmem>>, vector<128x128xf32>
    %cst = arith.constant dense<0.000000e+00> : vector<8x128xf32>
    %8 = tpu.matmul %6, %7, %cst {dimension_numbers = #tpu.dot_dimension_numbers<[1], [0], [0], [1], [0, 0, 1, 1], [], []>} : vector<8x128xf32>, vector<128x128xf32>, vector<8x128xf32> -> vector<8x128xf32>
    %c0_4 = arith.constant 0 : index
    %c0_5 = arith.constant 0 : index
    %9 = vector.load %arg3[%c0_4, %c0_5] : memref<8x128xf32, #tpu.memory_space<vmem>>, vector<8x128xf32>
    %10 = arith.addf %8, %9 : vector<8x128xf32>
    %11 = tpu.iota {dimensions = array<i32: 0>} : vector<8x8xi32>
    %12 = tpu.iota {dimensions = array<i32: 1>} : vector<8x8xi32>
    %13 = arith.cmpi sle, %12, %11 : vector<8x8xi32>
    %cst_6 = arith.constant 0.000000e+00 : f32
    %cst_7 = arith.constant -1.000000e+30 : f32
    %14 = vector.broadcast %cst_6 : f32 to vector<8x8xf32>
    %15 = vector.broadcast %cst_7 : f32 to vector<8x8xf32>
    %16 = arith.select %13, %14, %15 : vector<8x8xi1>, vector<8x8xf32>
    %c0_8 = arith.constant 0 : index
    %c0_9 = arith.constant 0 : index
    %c0_10 = arith.constant 0 : index
    %17 = vector.load %arg4[%c0_8, %c0_9, %c0_10] : memref<2x1x128xf32, #tpu.memory_space<vmem>>, vector<1x1x128xf32>
    %18 = vector.shape_cast %17 : vector<1x1x128xf32> to vector<1x128xf32>
    %c0_11 = arith.constant 0 : index
    %c0_12 = arith.constant 0 : index
    %c0_13 = arith.constant 0 : index
    %19 = vector.load %arg5[%c0_11, %c0_12, %c0_13] : memref<2x1x128xf32, #tpu.memory_space<vmem>>, vector<1x1x128xf32>
    %20 = vector.shape_cast %19 : vector<1x1x128xf32> to vector<1x128xf32>
    %cst_14 = arith.constant dense<0.000000e+00> : vector<8xf32>
    %21 = vector.multi_reduction <add>, %10, %cst_14 [1] : vector<8x128xf32> to vector<8xf32>
    %22 = vector.shape_cast %21 : vector<8xf32> to vector<8x1xf32>
    %cst_15 = arith.constant 1.562500e-02 : f32
    %23 = vector.broadcast %cst_15 : f32 to vector<8x1xf32>
    %24 = arith.mulf %22, %23 : vector<8x1xf32>
    %25 = arith.mulf %10, %10 : vector<8x128xf32>
    %cst_16 = arith.constant dense<0.000000e+00> : vector<8xf32>
    %26 = vector.multi_reduction <add>, %25, %cst_16 [1] : vector<8x128xf32> to vector<8xf32>
    %27 = vector.shape_cast %26 : vector<8xf32> to vector<8x1xf32>
    %cst_17 = arith.constant 1.562500e-02 : f32
    %28 = vector.broadcast %cst_17 : f32 to vector<8x1xf32>
    %29 = arith.mulf %27, %28 : vector<8x1xf32>
    %30 = arith.mulf %24, %24 : vector<8x1xf32>
    %31 = arith.subf %29, %30 : vector<8x1xf32>
    %32 = vector.broadcast %24 : vector<8x1xf32> to vector<8x128xf32>
    %33 = arith.subf %10, %32 : vector<8x128xf32>
    %cst_18 = arith.constant 9.99999974E-6 : f32
    %34 = vector.broadcast %cst_18 : f32 to vector<8x1xf32>
    %35 = arith.addf %31, %34 : vector<8x1xf32>
    %36 = math.rsqrt %35 : vector<8x1xf32>
    %37 = vector.broadcast %36 : vector<8x1xf32> to vector<8x128xf32>
    %38 = arith.mulf %33, %37 : vector<8x128xf32>
    %39 = vector.broadcast %18 : vector<1x128xf32> to vector<8x128xf32>
    %40 = arith.mulf %38, %39 : vector<8x128xf32>
    %41 = vector.broadcast %20 : vector<1x128xf32> to vector<8x128xf32>
    %42 = arith.addf %40, %41 : vector<8x128xf32>
    %c0_19 = arith.constant 0 : index
    %c0_20 = arith.constant 0 : index
    %c0_21 = arith.constant 0 : index
    %43 = vector.load %arg6[%c0_19, %c0_20, %c0_21] : memref<2x128x384xf32, #tpu.memory_space<vmem>>, vector<1x128x384xf32>
    %44 = vector.shape_cast %43 : vector<1x128x384xf32> to vector<128x384xf32>
    %cst_22 = arith.constant dense<0.000000e+00> : vector<8x384xf32>
    %45 = tpu.matmul %42, %44, %cst_22 {dimension_numbers = #tpu.dot_dimension_numbers<[1], [0], [0], [1], [0, 0, 1, 1], [], []>} : vector<8x128xf32>, vector<128x384xf32>, vector<8x384xf32> -> vector<8x384xf32>
    %46 = vector.extract_strided_slice %45 {offsets = [0, 0], sizes = [8, 128], strides = [1, 1]} : vector<8x384xf32> to vector<8x128xf32>
    %47 = vector.extract_strided_slice %45 {offsets = [0, 128], sizes = [8, 128], strides = [1, 1]} : vector<8x384xf32> to vector<8x128xf32>
    %48 = vector.extract_strided_slice %45 {offsets = [0, 256], sizes = [8, 128], strides = [1, 1]} : vector<8x384xf32> to vector<8x128xf32>
    %49 = vector.extract_strided_slice %46 {offsets = [0, 0], sizes = [8, 16], strides = [1, 1]} : vector<8x128xf32> to vector<8x16xf32>
    %50 = vector.extract_strided_slice %47 {offsets = [0, 0], sizes = [8, 16], strides = [1, 1]} : vector<8x128xf32> to vector<8x16xf32>
    %cst_23 = arith.constant dense<0.000000e+00> : vector<8x8xf32>
    %51 = tpu.matmul %49, %50, %cst_23 {dimension_numbers = #tpu.dot_dimension_numbers<[1], [1], [0], [0], [0, 0, 1, 0], [], []>} : vector<8x16xf32>, vector<8x16xf32>, vector<8x8xf32> -> vector<8x8xf32>
    %52 = arith.addf %51, %16 : vector<8x8xf32>
    %cst_24 = arith.constant dense<0xFF800000> : vector<8xf32>
    %53 = vector.multi_reduction <maximumf>, %52, %cst_24 [1] : vector<8x8xf32> to vector<8xf32>
    %54 = vector.shape_cast %53 : vector<8xf32> to vector<8x1xf32>
    %55 = vector.broadcast %54 : vector<8x1xf32> to vector<8x8xf32>
    %56 = arith.subf %52, %55 : vector<8x8xf32>
    %57 = math.exp %56 : vector<8x8xf32>
    %cst_25 = arith.constant dense<0.000000e+00> : vector<8xf32>
    %58 = vector.multi_reduction <add>, %57, %cst_25 [1] : vector<8x8xf32> to vector<8xf32>
    %59 = vector.shape_cast %58 : vector<8xf32> to vector<8x1xf32>
    %60 = tpu.reciprocal %59 {approx = true} : vector<8x1xf32> -> vector<8x1xf32>
    %61 = vector.broadcast %60 : vector<8x1xf32> to vector<8x8xf32>
    %62 = arith.mulf %57, %61 : vector<8x8xf32>
    %63 = vector.extract_strided_slice %48 {offsets = [0, 0], sizes = [8, 16], strides = [1, 1]} : vector<8x128xf32> to vector<8x16xf32>
    %cst_26 = arith.constant dense<0.000000e+00> : vector<8x16xf32>
    %64 = tpu.matmul %62, %63, %cst_26 {dimension_numbers = #tpu.dot_dimension_numbers<[1], [0], [0], [1], [0, 0, 1, 1], [], []>} : vector<8x8xf32>, vector<8x16xf32>, vector<8x16xf32> -> vector<8x16xf32>
    %65 = vector.extract_strided_slice %46 {offsets = [0, 16], sizes = [8, 16], strides = [1, 1]} : vector<8x128xf32> to vector<8x16xf32>
    %66 = vector.extract_strided_slice %47 {offsets = [0, 16], sizes = [8, 16], strides = [1, 1]} : vector<8x128xf32> to vector<8x16xf32>
    %cst_27 = arith.constant dense<0.000000e+00> : vector<8x8xf32>
    %67 = tpu.matmul %65, %66, %cst_27 {dimension_numbers = #tpu.dot_dimension_numbers<[1], [1], [0], [0], [0, 0, 1, 0], [], []>} : vector<8x16xf32>, vector<8x16xf32>, vector<8x8xf32> -> vector<8x8xf32>
    %68 = arith.addf %67, %16 : vector<8x8xf32>
    %cst_28 = arith.constant dense<0xFF800000> : vector<8xf32>
    %69 = vector.multi_reduction <maximumf>, %68, %cst_28 [1] : vector<8x8xf32> to vector<8xf32>
    %70 = vector.shape_cast %69 : vector<8xf32> to vector<8x1xf32>
    %71 = vector.broadcast %70 : vector<8x1xf32> to vector<8x8xf32>
    %72 = arith.subf %68, %71 : vector<8x8xf32>
    %73 = math.exp %72 : vector<8x8xf32>
    %cst_29 = arith.constant dense<0.000000e+00> : vector<8xf32>
    %74 = vector.multi_reduction <add>, %73, %cst_29 [1] : vector<8x8xf32> to vector<8xf32>
    %75 = vector.shape_cast %74 : vector<8xf32> to vector<8x1xf32>
    %76 = tpu.reciprocal %75 {approx = true} : vector<8x1xf32> -> vector<8x1xf32>
    %77 = vector.broadcast %76 : vector<8x1xf32> to vector<8x8xf32>
    %78 = arith.mulf %73, %77 : vector<8x8xf32>
    %79 = vector.extract_strided_slice %48 {offsets = [0, 16], sizes = [8, 16], strides = [1, 1]} : vector<8x128xf32> to vector<8x16xf32>
    %cst_30 = arith.constant dense<0.000000e+00> : vector<8x16xf32>
    %80 = tpu.matmul %78, %79, %cst_30 {dimension_numbers = #tpu.dot_dimension_numbers<[1], [0], [0], [1], [0, 0, 1, 1], [], []>} : vector<8x8xf32>, vector<8x16xf32>, vector<8x16xf32> -> vector<8x16xf32>
    %81 = vector.extract_strided_slice %46 {offsets = [0, 32], sizes = [8, 16], strides = [1, 1]} : vector<8x128xf32> to vector<8x16xf32>
    %82 = vector.extract_strided_slice %47 {offsets = [0, 32], sizes = [8, 16], strides = [1, 1]} : vector<8x128xf32> to vector<8x16xf32>
    %cst_31 = arith.constant dense<0.000000e+00> : vector<8x8xf32>
    %83 = tpu.matmul %81, %82, %cst_31 {dimension_numbers = #tpu.dot_dimension_numbers<[1], [1], [0], [0], [0, 0, 1, 0], [], []>} : vector<8x16xf32>, vector<8x16xf32>, vector<8x8xf32> -> vector<8x8xf32>
    %84 = arith.addf %83, %16 : vector<8x8xf32>
    %cst_32 = arith.constant dense<0xFF800000> : vector<8xf32>
    %85 = vector.multi_reduction <maximumf>, %84, %cst_32 [1] : vector<8x8xf32> to vector<8xf32>
    %86 = vector.shape_cast %85 : vector<8xf32> to vector<8x1xf32>
    %87 = vector.broadcast %86 : vector<8x1xf32> to vector<8x8xf32>
    %88 = arith.subf %84, %87 : vector<8x8xf32>
    %89 = math.exp %88 : vector<8x8xf32>
    %cst_33 = arith.constant dense<0.000000e+00> : vector<8xf32>
    %90 = vector.multi_reduction <add>, %89, %cst_33 [1] : vector<8x8xf32> to vector<8xf32>
    %91 = vector.shape_cast %90 : vector<8xf32> to vector<8x1xf32>
    %92 = tpu.reciprocal %91 {approx = true} : vector<8x1xf32> -> vector<8x1xf32>
    %93 = vector.broadcast %92 : vector<8x1xf32> to vector<8x8xf32>
    %94 = arith.mulf %89, %93 : vector<8x8xf32>
    %95 = vector.extract_strided_slice %48 {offsets = [0, 32], sizes = [8, 16], strides = [1, 1]} : vector<8x128xf32> to vector<8x16xf32>
    %cst_34 = arith.constant dense<0.000000e+00> : vector<8x16xf32>
    %96 = tpu.matmul %94, %95, %cst_34 {dimension_numbers = #tpu.dot_dimension_numbers<[1], [0], [0], [1], [0, 0, 1, 1], [], []>} : vector<8x8xf32>, vector<8x16xf32>, vector<8x16xf32> -> vector<8x16xf32>
    %97 = vector.extract_strided_slice %46 {offsets = [0, 48], sizes = [8, 16], strides = [1, 1]} : vector<8x128xf32> to vector<8x16xf32>
    %98 = vector.extract_strided_slice %47 {offsets = [0, 48], sizes = [8, 16], strides = [1, 1]} : vector<8x128xf32> to vector<8x16xf32>
    %cst_35 = arith.constant dense<0.000000e+00> : vector<8x8xf32>
    %99 = tpu.matmul %97, %98, %cst_35 {dimension_numbers = #tpu.dot_dimension_numbers<[1], [1], [0], [0], [0, 0, 1, 0], [], []>} : vector<8x16xf32>, vector<8x16xf32>, vector<8x8xf32> -> vector<8x8xf32>
    %100 = arith.addf %99, %16 : vector<8x8xf32>
    %cst_36 = arith.constant dense<0xFF800000> : vector<8xf32>
    %101 = vector.multi_reduction <maximumf>, %100, %cst_36 [1] : vector<8x8xf32> to vector<8xf32>
    %102 = vector.shape_cast %101 : vector<8xf32> to vector<8x1xf32>
    %103 = vector.broadcast %102 : vector<8x1xf32> to vector<8x8xf32>
    %104 = arith.subf %100, %103 : vector<8x8xf32>
    %105 = math.exp %104 : vector<8x8xf32>
    %cst_37 = arith.constant dense<0.000000e+00> : vector<8xf32>
    %106 = vector.multi_reduction <add>, %105, %cst_37 [1] : vector<8x8xf32> to vector<8xf32>
    %107 = vector.shape_cast %106 : vector<8xf32> to vector<8x1xf32>
    %108 = tpu.reciprocal %107 {approx = true} : vector<8x1xf32> -> vector<8x1xf32>
    %109 = vector.broadcast %108 : vector<8x1xf32> to vector<8x8xf32>
    %110 = arith.mulf %105, %109 : vector<8x8xf32>
    %111 = vector.extract_strided_slice %48 {offsets = [0, 48], sizes = [8, 16], strides = [1, 1]} : vector<8x128xf32> to vector<8x16xf32>
    %cst_38 = arith.constant dense<0.000000e+00> : vector<8x16xf32>
    %112 = tpu.matmul %110, %111, %cst_38 {dimension_numbers = #tpu.dot_dimension_numbers<[1], [0], [0], [1], [0, 0, 1, 1], [], []>} : vector<8x8xf32>, vector<8x16xf32>, vector<8x16xf32> -> vector<8x16xf32>
    %cst_39 = arith.constant 0.000000e+00 : f32
    %113 = vector.broadcast %cst_39 : f32 to vector<8x64xf32>
    %114 = tpu.concatenate %64, %80, %96, %112, %113 in 1 : vector<8x16xf32>, vector<8x16xf32>, vector<8x16xf32>, vector<8x16xf32>, vector<8x64xf32> -> vector<8x128xf32>
    %c0_40 = arith.constant 0 : index
    %c0_41 = arith.constant 0 : index
    %c0_42 = arith.constant 0 : index
    %115 = vector.load %arg7[%c0_40, %c0_41, %c0_42] : memref<2x128x128xf32, #tpu.memory_space<vmem>>, vector<1x128x128xf32>
    %116 = vector.shape_cast %115 : vector<1x128x128xf32> to vector<128x128xf32>
    %cst_43 = arith.constant dense<0.000000e+00> : vector<8x128xf32>
    %117 = tpu.matmul %114, %116, %cst_43 {dimension_numbers = #tpu.dot_dimension_numbers<[1], [0], [0], [1], [0, 0, 1, 1], [], []>} : vector<8x128xf32>, vector<128x128xf32>, vector<8x128xf32> -> vector<8x128xf32>
    %118 = arith.addf %10, %117 : vector<8x128xf32>
    %c0_44 = arith.constant 0 : index
    %c0_45 = arith.constant 0 : index
    %c0_46 = arith.constant 0 : index
    %119 = vector.load %arg8[%c0_44, %c0_45, %c0_46] : memref<2x1x128xf32, #tpu.memory_space<vmem>>, vector<1x1x128xf32>
    %120 = vector.shape_cast %119 : vector<1x1x128xf32> to vector<1x128xf32>
    %121 = vector.broadcast %120 : vector<1x128xf32> to vector<8x128xf32>
    %122 = arith.addf %118, %121 : vector<8x128xf32>
    %c0_47 = arith.constant 0 : index
    %c0_48 = arith.constant 0 : index
    %c0_49 = arith.constant 0 : index
    %123 = vector.load %arg9[%c0_47, %c0_48, %c0_49] : memref<2x1x128xf32, #tpu.memory_space<vmem>>, vector<1x1x128xf32>
    %124 = vector.shape_cast %123 : vector<1x1x128xf32> to vector<1x128xf32>
    %c0_50 = arith.constant 0 : index
    %c0_51 = arith.constant 0 : index
    %c0_52 = arith.constant 0 : index
    %125 = vector.load %arg10[%c0_50, %c0_51, %c0_52] : memref<2x1x128xf32, #tpu.memory_space<vmem>>, vector<1x1x128xf32>
    %126 = vector.shape_cast %125 : vector<1x1x128xf32> to vector<1x128xf32>
    %cst_53 = arith.constant dense<0.000000e+00> : vector<8xf32>
    %127 = vector.multi_reduction <add>, %122, %cst_53 [1] : vector<8x128xf32> to vector<8xf32>
    %128 = vector.shape_cast %127 : vector<8xf32> to vector<8x1xf32>
    %cst_54 = arith.constant 1.562500e-02 : f32
    %129 = vector.broadcast %cst_54 : f32 to vector<8x1xf32>
    %130 = arith.mulf %128, %129 : vector<8x1xf32>
    %131 = arith.mulf %122, %122 : vector<8x128xf32>
    %cst_55 = arith.constant dense<0.000000e+00> : vector<8xf32>
    %132 = vector.multi_reduction <add>, %131, %cst_55 [1] : vector<8x128xf32> to vector<8xf32>
    %133 = vector.shape_cast %132 : vector<8xf32> to vector<8x1xf32>
    %cst_56 = arith.constant 1.562500e-02 : f32
    %134 = vector.broadcast %cst_56 : f32 to vector<8x1xf32>
    %135 = arith.mulf %133, %134 : vector<8x1xf32>
    %136 = arith.mulf %130, %130 : vector<8x1xf32>
    %137 = arith.subf %135, %136 : vector<8x1xf32>
    %138 = vector.broadcast %130 : vector<8x1xf32> to vector<8x128xf32>
    %139 = arith.subf %122, %138 : vector<8x128xf32>
    %cst_57 = arith.constant 9.99999974E-6 : f32
    %140 = vector.broadcast %cst_57 : f32 to vector<8x1xf32>
    %141 = arith.addf %137, %140 : vector<8x1xf32>
    %142 = math.rsqrt %141 : vector<8x1xf32>
    %143 = vector.broadcast %142 : vector<8x1xf32> to vector<8x128xf32>
    %144 = arith.mulf %139, %143 : vector<8x128xf32>
    %145 = vector.broadcast %124 : vector<1x128xf32> to vector<8x128xf32>
    %146 = arith.mulf %144, %145 : vector<8x128xf32>
    %147 = vector.broadcast %126 : vector<1x128xf32> to vector<8x128xf32>
    %148 = arith.addf %146, %147 : vector<8x128xf32>
    %c0_58 = arith.constant 0 : index
    %c0_59 = arith.constant 0 : index
    %c0_60 = arith.constant 0 : index
    %149 = vector.load %arg11[%c0_58, %c0_59, %c0_60] : memref<2x128x256xf32, #tpu.memory_space<vmem>>, vector<1x128x256xf32>
    %150 = vector.shape_cast %149 : vector<1x128x256xf32> to vector<128x256xf32>
    %cst_61 = arith.constant dense<0.000000e+00> : vector<8x256xf32>
    %151 = tpu.matmul %148, %150, %cst_61 {dimension_numbers = #tpu.dot_dimension_numbers<[1], [0], [0], [1], [0, 0, 1, 1], [], []>} : vector<8x128xf32>, vector<128x256xf32>, vector<8x256xf32> -> vector<8x256xf32>
    %c0_62 = arith.constant 0 : index
    %c0_63 = arith.constant 0 : index
    %c0_64 = arith.constant 0 : index
    %152 = vector.load %arg12[%c0_62, %c0_63, %c0_64] : memref<2x1x256xf32, #tpu.memory_space<vmem>>, vector<1x1x256xf32>
    %153 = vector.shape_cast %152 : vector<1x1x256xf32> to vector<1x256xf32>
    %154 = vector.broadcast %153 : vector<1x256xf32> to vector<8x256xf32>
    %155 = arith.addf %151, %154 : vector<8x256xf32>
    %cst_65 = arith.constant 0.000000e+00 : f32
    %156 = vector.broadcast %cst_65 : f32 to vector<8x256xf32>
    %157 = arith.maximumf %155, %156 : vector<8x256xf32>
    %c0_66 = arith.constant 0 : index
    %c0_67 = arith.constant 0 : index
    %c0_68 = arith.constant 0 : index
    %158 = vector.load %arg13[%c0_66, %c0_67, %c0_68] : memref<2x256x128xf32, #tpu.memory_space<vmem>>, vector<1x256x128xf32>
    %159 = vector.shape_cast %158 : vector<1x256x128xf32> to vector<256x128xf32>
    %cst_69 = arith.constant dense<0.000000e+00> : vector<8x128xf32>
    %160 = tpu.matmul %157, %159, %cst_69 {dimension_numbers = #tpu.dot_dimension_numbers<[1], [0], [0], [1], [0, 0, 1, 1], [], []>} : vector<8x256xf32>, vector<256x128xf32>, vector<8x128xf32> -> vector<8x128xf32>
    %161 = arith.addf %122, %160 : vector<8x128xf32>
    %c0_70 = arith.constant 0 : index
    %c0_71 = arith.constant 0 : index
    %c0_72 = arith.constant 0 : index
    %162 = vector.load %arg14[%c0_70, %c0_71, %c0_72] : memref<2x1x128xf32, #tpu.memory_space<vmem>>, vector<1x1x128xf32>
    %163 = vector.shape_cast %162 : vector<1x1x128xf32> to vector<1x128xf32>
    %164 = vector.broadcast %163 : vector<1x128xf32> to vector<8x128xf32>
    %165 = arith.addf %161, %164 : vector<8x128xf32>
    %c1 = arith.constant 1 : index
    %c0_73 = arith.constant 0 : index
    %c0_74 = arith.constant 0 : index
    %166 = vector.load %arg4[%c1, %c0_73, %c0_74] : memref<2x1x128xf32, #tpu.memory_space<vmem>>, vector<1x1x128xf32>
    %167 = vector.shape_cast %166 : vector<1x1x128xf32> to vector<1x128xf32>
    %c1_75 = arith.constant 1 : index
    %c0_76 = arith.constant 0 : index
    %c0_77 = arith.constant 0 : index
    %168 = vector.load %arg5[%c1_75, %c0_76, %c0_77] : memref<2x1x128xf32, #tpu.memory_space<vmem>>, vector<1x1x128xf32>
    %169 = vector.shape_cast %168 : vector<1x1x128xf32> to vector<1x128xf32>
    %cst_78 = arith.constant dense<0.000000e+00> : vector<8xf32>
    %170 = vector.multi_reduction <add>, %165, %cst_78 [1] : vector<8x128xf32> to vector<8xf32>
    %171 = vector.shape_cast %170 : vector<8xf32> to vector<8x1xf32>
    %cst_79 = arith.constant 1.562500e-02 : f32
    %172 = vector.broadcast %cst_79 : f32 to vector<8x1xf32>
    %173 = arith.mulf %171, %172 : vector<8x1xf32>
    %174 = arith.mulf %165, %165 : vector<8x128xf32>
    %cst_80 = arith.constant dense<0.000000e+00> : vector<8xf32>
    %175 = vector.multi_reduction <add>, %174, %cst_80 [1] : vector<8x128xf32> to vector<8xf32>
    %176 = vector.shape_cast %175 : vector<8xf32> to vector<8x1xf32>
    %cst_81 = arith.constant 1.562500e-02 : f32
    %177 = vector.broadcast %cst_81 : f32 to vector<8x1xf32>
    %178 = arith.mulf %176, %177 : vector<8x1xf32>
    %179 = arith.mulf %173, %173 : vector<8x1xf32>
    %180 = arith.subf %178, %179 : vector<8x1xf32>
    %181 = vector.broadcast %173 : vector<8x1xf32> to vector<8x128xf32>
    %182 = arith.subf %165, %181 : vector<8x128xf32>
    %cst_82 = arith.constant 9.99999974E-6 : f32
    %183 = vector.broadcast %cst_82 : f32 to vector<8x1xf32>
    %184 = arith.addf %180, %183 : vector<8x1xf32>
    %185 = math.rsqrt %184 : vector<8x1xf32>
    %186 = vector.broadcast %185 : vector<8x1xf32> to vector<8x128xf32>
    %187 = arith.mulf %182, %186 : vector<8x128xf32>
    %188 = vector.broadcast %167 : vector<1x128xf32> to vector<8x128xf32>
    %189 = arith.mulf %187, %188 : vector<8x128xf32>
    %190 = vector.broadcast %169 : vector<1x128xf32> to vector<8x128xf32>
    %191 = arith.addf %189, %190 : vector<8x128xf32>
    %c1_83 = arith.constant 1 : index
    %c0_84 = arith.constant 0 : index
    %c0_85 = arith.constant 0 : index
    %192 = vector.load %arg6[%c1_83, %c0_84, %c0_85] : memref<2x128x384xf32, #tpu.memory_space<vmem>>, vector<1x128x384xf32>
    %193 = vector.shape_cast %192 : vector<1x128x384xf32> to vector<128x384xf32>
    %cst_86 = arith.constant dense<0.000000e+00> : vector<8x384xf32>
    %194 = tpu.matmul %191, %193, %cst_86 {dimension_numbers = #tpu.dot_dimension_numbers<[1], [0], [0], [1], [0, 0, 1, 1], [], []>} : vector<8x128xf32>, vector<128x384xf32>, vector<8x384xf32> -> vector<8x384xf32>
    %195 = vector.extract_strided_slice %194 {offsets = [0, 0], sizes = [8, 128], strides = [1, 1]} : vector<8x384xf32> to vector<8x128xf32>
    %196 = vector.extract_strided_slice %194 {offsets = [0, 128], sizes = [8, 128], strides = [1, 1]} : vector<8x384xf32> to vector<8x128xf32>
    %197 = vector.extract_strided_slice %194 {offsets = [0, 256], sizes = [8, 128], strides = [1, 1]} : vector<8x384xf32> to vector<8x128xf32>
    %198 = vector.extract_strided_slice %195 {offsets = [0, 0], sizes = [8, 16], strides = [1, 1]} : vector<8x128xf32> to vector<8x16xf32>
    %199 = vector.extract_strided_slice %196 {offsets = [0, 0], sizes = [8, 16], strides = [1, 1]} : vector<8x128xf32> to vector<8x16xf32>
    %cst_87 = arith.constant dense<0.000000e+00> : vector<8x8xf32>
    %200 = tpu.matmul %198, %199, %cst_87 {dimension_numbers = #tpu.dot_dimension_numbers<[1], [1], [0], [0], [0, 0, 1, 0], [], []>} : vector<8x16xf32>, vector<8x16xf32>, vector<8x8xf32> -> vector<8x8xf32>
    %201 = arith.addf %200, %16 : vector<8x8xf32>
    %cst_88 = arith.constant dense<0xFF800000> : vector<8xf32>
    %202 = vector.multi_reduction <maximumf>, %201, %cst_88 [1] : vector<8x8xf32> to vector<8xf32>
    %203 = vector.shape_cast %202 : vector<8xf32> to vector<8x1xf32>
    %204 = vector.broadcast %203 : vector<8x1xf32> to vector<8x8xf32>
    %205 = arith.subf %201, %204 : vector<8x8xf32>
    %206 = math.exp %205 : vector<8x8xf32>
    %cst_89 = arith.constant dense<0.000000e+00> : vector<8xf32>
    %207 = vector.multi_reduction <add>, %206, %cst_89 [1] : vector<8x8xf32> to vector<8xf32>
    %208 = vector.shape_cast %207 : vector<8xf32> to vector<8x1xf32>
    %209 = tpu.reciprocal %208 {approx = true} : vector<8x1xf32> -> vector<8x1xf32>
    %210 = vector.broadcast %209 : vector<8x1xf32> to vector<8x8xf32>
    %211 = arith.mulf %206, %210 : vector<8x8xf32>
    %212 = vector.extract_strided_slice %197 {offsets = [0, 0], sizes = [8, 16], strides = [1, 1]} : vector<8x128xf32> to vector<8x16xf32>
    %cst_90 = arith.constant dense<0.000000e+00> : vector<8x16xf32>
    %213 = tpu.matmul %211, %212, %cst_90 {dimension_numbers = #tpu.dot_dimension_numbers<[1], [0], [0], [1], [0, 0, 1, 1], [], []>} : vector<8x8xf32>, vector<8x16xf32>, vector<8x16xf32> -> vector<8x16xf32>
    %214 = vector.extract_strided_slice %195 {offsets = [0, 16], sizes = [8, 16], strides = [1, 1]} : vector<8x128xf32> to vector<8x16xf32>
    %215 = vector.extract_strided_slice %196 {offsets = [0, 16], sizes = [8, 16], strides = [1, 1]} : vector<8x128xf32> to vector<8x16xf32>
    %cst_91 = arith.constant dense<0.000000e+00> : vector<8x8xf32>
    %216 = tpu.matmul %214, %215, %cst_91 {dimension_numbers = #tpu.dot_dimension_numbers<[1], [1], [0], [0], [0, 0, 1, 0], [], []>} : vector<8x16xf32>, vector<8x16xf32>, vector<8x8xf32> -> vector<8x8xf32>
    %217 = arith.addf %216, %16 : vector<8x8xf32>
    %cst_92 = arith.constant dense<0xFF800000> : vector<8xf32>
    %218 = vector.multi_reduction <maximumf>, %217, %cst_92 [1] : vector<8x8xf32> to vector<8xf32>
    %219 = vector.shape_cast %218 : vector<8xf32> to vector<8x1xf32>
    %220 = vector.broadcast %219 : vector<8x1xf32> to vector<8x8xf32>
    %221 = arith.subf %217, %220 : vector<8x8xf32>
    %222 = math.exp %221 : vector<8x8xf32>
    %cst_93 = arith.constant dense<0.000000e+00> : vector<8xf32>
    %223 = vector.multi_reduction <add>, %222, %cst_93 [1] : vector<8x8xf32> to vector<8xf32>
    %224 = vector.shape_cast %223 : vector<8xf32> to vector<8x1xf32>
    %225 = tpu.reciprocal %224 {approx = true} : vector<8x1xf32> -> vector<8x1xf32>
    %226 = vector.broadcast %225 : vector<8x1xf32> to vector<8x8xf32>
    %227 = arith.mulf %222, %226 : vector<8x8xf32>
    %228 = vector.extract_strided_slice %197 {offsets = [0, 16], sizes = [8, 16], strides = [1, 1]} : vector<8x128xf32> to vector<8x16xf32>
    %cst_94 = arith.constant dense<0.000000e+00> : vector<8x16xf32>
    %229 = tpu.matmul %227, %228, %cst_94 {dimension_numbers = #tpu.dot_dimension_numbers<[1], [0], [0], [1], [0, 0, 1, 1], [], []>} : vector<8x8xf32>, vector<8x16xf32>, vector<8x16xf32> -> vector<8x16xf32>
    %230 = vector.extract_strided_slice %195 {offsets = [0, 32], sizes = [8, 16], strides = [1, 1]} : vector<8x128xf32> to vector<8x16xf32>
    %231 = vector.extract_strided_slice %196 {offsets = [0, 32], sizes = [8, 16], strides = [1, 1]} : vector<8x128xf32> to vector<8x16xf32>
    %cst_95 = arith.constant dense<0.000000e+00> : vector<8x8xf32>
    %232 = tpu.matmul %230, %231, %cst_95 {dimension_numbers = #tpu.dot_dimension_numbers<[1], [1], [0], [0], [0, 0, 1, 0], [], []>} : vector<8x16xf32>, vector<8x16xf32>, vector<8x8xf32> -> vector<8x8xf32>
    %233 = arith.addf %232, %16 : vector<8x8xf32>
    %cst_96 = arith.constant dense<0xFF800000> : vector<8xf32>
    %234 = vector.multi_reduction <maximumf>, %233, %cst_96 [1] : vector<8x8xf32> to vector<8xf32>
    %235 = vector.shape_cast %234 : vector<8xf32> to vector<8x1xf32>
    %236 = vector.broadcast %235 : vector<8x1xf32> to vector<8x8xf32>
    %237 = arith.subf %233, %236 : vector<8x8xf32>
    %238 = math.exp %237 : vector<8x8xf32>
    %cst_97 = arith.constant dense<0.000000e+00> : vector<8xf32>
    %239 = vector.multi_reduction <add>, %238, %cst_97 [1] : vector<8x8xf32> to vector<8xf32>
    %240 = vector.shape_cast %239 : vector<8xf32> to vector<8x1xf32>
    %241 = tpu.reciprocal %240 {approx = true} : vector<8x1xf32> -> vector<8x1xf32>
    %242 = vector.broadcast %241 : vector<8x1xf32> to vector<8x8xf32>
    %243 = arith.mulf %238, %242 : vector<8x8xf32>
    %244 = vector.extract_strided_slice %197 {offsets = [0, 32], sizes = [8, 16], strides = [1, 1]} : vector<8x128xf32> to vector<8x16xf32>
    %cst_98 = arith.constant dense<0.000000e+00> : vector<8x16xf32>
    %245 = tpu.matmul %243, %244, %cst_98 {dimension_numbers = #tpu.dot_dimension_numbers<[1], [0], [0], [1], [0, 0, 1, 1], [], []>} : vector<8x8xf32>, vector<8x16xf32>, vector<8x16xf32> -> vector<8x16xf32>
    %246 = vector.extract_strided_slice %195 {offsets = [0, 48], sizes = [8, 16], strides = [1, 1]} : vector<8x128xf32> to vector<8x16xf32>
    %247 = vector.extract_strided_slice %196 {offsets = [0, 48], sizes = [8, 16], strides = [1, 1]} : vector<8x128xf32> to vector<8x16xf32>
    %cst_99 = arith.constant dense<0.000000e+00> : vector<8x8xf32>
    %248 = tpu.matmul %246, %247, %cst_99 {dimension_numbers = #tpu.dot_dimension_numbers<[1], [1], [0], [0], [0, 0, 1, 0], [], []>} : vector<8x16xf32>, vector<8x16xf32>, vector<8x8xf32> -> vector<8x8xf32>
    %249 = arith.addf %248, %16 : vector<8x8xf32>
    %cst_100 = arith.constant dense<0xFF800000> : vector<8xf32>
    %250 = vector.multi_reduction <maximumf>, %249, %cst_100 [1] : vector<8x8xf32> to vector<8xf32>
    %251 = vector.shape_cast %250 : vector<8xf32> to vector<8x1xf32>
    %252 = vector.broadcast %251 : vector<8x1xf32> to vector<8x8xf32>
    %253 = arith.subf %249, %252 : vector<8x8xf32>
    %254 = math.exp %253 : vector<8x8xf32>
    %cst_101 = arith.constant dense<0.000000e+00> : vector<8xf32>
    %255 = vector.multi_reduction <add>, %254, %cst_101 [1] : vector<8x8xf32> to vector<8xf32>
    %256 = vector.shape_cast %255 : vector<8xf32> to vector<8x1xf32>
    %257 = tpu.reciprocal %256 {approx = true} : vector<8x1xf32> -> vector<8x1xf32>
    %258 = vector.broadcast %257 : vector<8x1xf32> to vector<8x8xf32>
    %259 = arith.mulf %254, %258 : vector<8x8xf32>
    %260 = vector.extract_strided_slice %197 {offsets = [0, 48], sizes = [8, 16], strides = [1, 1]} : vector<8x128xf32> to vector<8x16xf32>
    %cst_102 = arith.constant dense<0.000000e+00> : vector<8x16xf32>
    %261 = tpu.matmul %259, %260, %cst_102 {dimension_numbers = #tpu.dot_dimension_numbers<[1], [0], [0], [1], [0, 0, 1, 1], [], []>} : vector<8x8xf32>, vector<8x16xf32>, vector<8x16xf32> -> vector<8x16xf32>
    %cst_103 = arith.constant 0.000000e+00 : f32
    %262 = vector.broadcast %cst_103 : f32 to vector<8x64xf32>
    %263 = tpu.concatenate %213, %229, %245, %261, %262 in 1 : vector<8x16xf32>, vector<8x16xf32>, vector<8x16xf32>, vector<8x16xf32>, vector<8x64xf32> -> vector<8x128xf32>
    %c1_104 = arith.constant 1 : index
    %c0_105 = arith.constant 0 : index
    %c0_106 = arith.constant 0 : index
    %264 = vector.load %arg7[%c1_104, %c0_105, %c0_106] : memref<2x128x128xf32, #tpu.memory_space<vmem>>, vector<1x128x128xf32>
    %265 = vector.shape_cast %264 : vector<1x128x128xf32> to vector<128x128xf32>
    %cst_107 = arith.constant dense<0.000000e+00> : vector<8x128xf32>
    %266 = tpu.matmul %263, %265, %cst_107 {dimension_numbers = #tpu.dot_dimension_numbers<[1], [0], [0], [1], [0, 0, 1, 1], [], []>} : vector<8x128xf32>, vector<128x128xf32>, vector<8x128xf32> -> vector<8x128xf32>
    %267 = arith.addf %165, %266 : vector<8x128xf32>
    %c1_108 = arith.constant 1 : index
    %c0_109 = arith.constant 0 : index
    %c0_110 = arith.constant 0 : index
    %268 = vector.load %arg8[%c1_108, %c0_109, %c0_110] : memref<2x1x128xf32, #tpu.memory_space<vmem>>, vector<1x1x128xf32>
    %269 = vector.shape_cast %268 : vector<1x1x128xf32> to vector<1x128xf32>
    %270 = vector.broadcast %269 : vector<1x128xf32> to vector<8x128xf32>
    %271 = arith.addf %267, %270 : vector<8x128xf32>
    %c1_111 = arith.constant 1 : index
    %c0_112 = arith.constant 0 : index
    %c0_113 = arith.constant 0 : index
    %272 = vector.load %arg9[%c1_111, %c0_112, %c0_113] : memref<2x1x128xf32, #tpu.memory_space<vmem>>, vector<1x1x128xf32>
    %273 = vector.shape_cast %272 : vector<1x1x128xf32> to vector<1x128xf32>
    %c1_114 = arith.constant 1 : index
    %c0_115 = arith.constant 0 : index
    %c0_116 = arith.constant 0 : index
    %274 = vector.load %arg10[%c1_114, %c0_115, %c0_116] : memref<2x1x128xf32, #tpu.memory_space<vmem>>, vector<1x1x128xf32>
    %275 = vector.shape_cast %274 : vector<1x1x128xf32> to vector<1x128xf32>
    %cst_117 = arith.constant dense<0.000000e+00> : vector<8xf32>
    %276 = vector.multi_reduction <add>, %271, %cst_117 [1] : vector<8x128xf32> to vector<8xf32>
    %277 = vector.shape_cast %276 : vector<8xf32> to vector<8x1xf32>
    %cst_118 = arith.constant 1.562500e-02 : f32
    %278 = vector.broadcast %cst_118 : f32 to vector<8x1xf32>
    %279 = arith.mulf %277, %278 : vector<8x1xf32>
    %280 = arith.mulf %271, %271 : vector<8x128xf32>
    %cst_119 = arith.constant dense<0.000000e+00> : vector<8xf32>
    %281 = vector.multi_reduction <add>, %280, %cst_119 [1] : vector<8x128xf32> to vector<8xf32>
    %282 = vector.shape_cast %281 : vector<8xf32> to vector<8x1xf32>
    %cst_120 = arith.constant 1.562500e-02 : f32
    %283 = vector.broadcast %cst_120 : f32 to vector<8x1xf32>
    %284 = arith.mulf %282, %283 : vector<8x1xf32>
    %285 = arith.mulf %279, %279 : vector<8x1xf32>
    %286 = arith.subf %284, %285 : vector<8x1xf32>
    %287 = vector.broadcast %279 : vector<8x1xf32> to vector<8x128xf32>
    %288 = arith.subf %271, %287 : vector<8x128xf32>
    %cst_121 = arith.constant 9.99999974E-6 : f32
    %289 = vector.broadcast %cst_121 : f32 to vector<8x1xf32>
    %290 = arith.addf %286, %289 : vector<8x1xf32>
    %291 = math.rsqrt %290 : vector<8x1xf32>
    %292 = vector.broadcast %291 : vector<8x1xf32> to vector<8x128xf32>
    %293 = arith.mulf %288, %292 : vector<8x128xf32>
    %294 = vector.broadcast %273 : vector<1x128xf32> to vector<8x128xf32>
    %295 = arith.mulf %293, %294 : vector<8x128xf32>
    %296 = vector.broadcast %275 : vector<1x128xf32> to vector<8x128xf32>
    %297 = arith.addf %295, %296 : vector<8x128xf32>
    %c1_122 = arith.constant 1 : index
    %c0_123 = arith.constant 0 : index
    %c0_124 = arith.constant 0 : index
    %298 = vector.load %arg11[%c1_122, %c0_123, %c0_124] : memref<2x128x256xf32, #tpu.memory_space<vmem>>, vector<1x128x256xf32>
    %299 = vector.shape_cast %298 : vector<1x128x256xf32> to vector<128x256xf32>
    %cst_125 = arith.constant dense<0.000000e+00> : vector<8x256xf32>
    %300 = tpu.matmul %297, %299, %cst_125 {dimension_numbers = #tpu.dot_dimension_numbers<[1], [0], [0], [1], [0, 0, 1, 1], [], []>} : vector<8x128xf32>, vector<128x256xf32>, vector<8x256xf32> -> vector<8x256xf32>
    %c1_126 = arith.constant 1 : index
    %c0_127 = arith.constant 0 : index
    %c0_128 = arith.constant 0 : index
    %301 = vector.load %arg12[%c1_126, %c0_127, %c0_128] : memref<2x1x256xf32, #tpu.memory_space<vmem>>, vector<1x1x256xf32>
    %302 = vector.shape_cast %301 : vector<1x1x256xf32> to vector<1x256xf32>
    %303 = vector.broadcast %302 : vector<1x256xf32> to vector<8x256xf32>
    %304 = arith.addf %300, %303 : vector<8x256xf32>
    %cst_129 = arith.constant 0.000000e+00 : f32
    %305 = vector.broadcast %cst_129 : f32 to vector<8x256xf32>
    %306 = arith.maximumf %304, %305 : vector<8x256xf32>
    %c1_130 = arith.constant 1 : index
    %c0_131 = arith.constant 0 : index
    %c0_132 = arith.constant 0 : index
    %307 = vector.load %arg13[%c1_130, %c0_131, %c0_132] : memref<2x256x128xf32, #tpu.memory_space<vmem>>, vector<1x256x128xf32>
    %308 = vector.shape_cast %307 : vector<1x256x128xf32> to vector<256x128xf32>
    %cst_133 = arith.constant dense<0.000000e+00> : vector<8x128xf32>
    %309 = tpu.matmul %306, %308, %cst_133 {dimension_numbers = #tpu.dot_dimension_numbers<[1], [0], [0], [1], [0, 0, 1, 1], [], []>} : vector<8x256xf32>, vector<256x128xf32>, vector<8x128xf32> -> vector<8x128xf32>
    %310 = arith.addf %271, %309 : vector<8x128xf32>
    %c1_134 = arith.constant 1 : index
    %c0_135 = arith.constant 0 : index
    %c0_136 = arith.constant 0 : index
    %311 = vector.load %arg14[%c1_134, %c0_135, %c0_136] : memref<2x1x128xf32, #tpu.memory_space<vmem>>, vector<1x1x128xf32>
    %312 = vector.shape_cast %311 : vector<1x1x128xf32> to vector<1x128xf32>
    %313 = vector.broadcast %312 : vector<1x128xf32> to vector<8x128xf32>
    %314 = arith.addf %310, %313 : vector<8x128xf32>
    %c0_137 = arith.constant 0 : index
    %c0_138 = arith.constant 0 : index
    %315 = vector.load %arg15[%c0_137, %c0_138] : memref<1x128xf32, #tpu.memory_space<vmem>>, vector<1x128xf32>
    %c0_139 = arith.constant 0 : index
    %c0_140 = arith.constant 0 : index
    %316 = vector.load %arg16[%c0_139, %c0_140] : memref<1x128xf32, #tpu.memory_space<vmem>>, vector<1x128xf32>
    %cst_141 = arith.constant dense<0.000000e+00> : vector<8xf32>
    %317 = vector.multi_reduction <add>, %314, %cst_141 [1] : vector<8x128xf32> to vector<8xf32>
    %318 = vector.shape_cast %317 : vector<8xf32> to vector<8x1xf32>
    %cst_142 = arith.constant 1.562500e-02 : f32
    %319 = vector.broadcast %cst_142 : f32 to vector<8x1xf32>
    %320 = arith.mulf %318, %319 : vector<8x1xf32>
    %321 = arith.mulf %314, %314 : vector<8x128xf32>
    %cst_143 = arith.constant dense<0.000000e+00> : vector<8xf32>
    %322 = vector.multi_reduction <add>, %321, %cst_143 [1] : vector<8x128xf32> to vector<8xf32>
    %323 = vector.shape_cast %322 : vector<8xf32> to vector<8x1xf32>
    %cst_144 = arith.constant 1.562500e-02 : f32
    %324 = vector.broadcast %cst_144 : f32 to vector<8x1xf32>
    %325 = arith.mulf %323, %324 : vector<8x1xf32>
    %326 = arith.mulf %320, %320 : vector<8x1xf32>
    %327 = arith.subf %325, %326 : vector<8x1xf32>
    %328 = vector.broadcast %320 : vector<8x1xf32> to vector<8x128xf32>
    %329 = arith.subf %314, %328 : vector<8x128xf32>
    %cst_145 = arith.constant 9.99999974E-6 : f32
    %330 = vector.broadcast %cst_145 : f32 to vector<8x1xf32>
    %331 = arith.addf %327, %330 : vector<8x1xf32>
    %332 = math.rsqrt %331 : vector<8x1xf32>
    %333 = vector.broadcast %332 : vector<8x1xf32> to vector<8x128xf32>
    %334 = arith.mulf %329, %333 : vector<8x128xf32>
    %335 = vector.broadcast %315 : vector<1x128xf32> to vector<8x128xf32>
    %336 = arith.mulf %334, %335 : vector<8x128xf32>
    %337 = vector.broadcast %316 : vector<1x128xf32> to vector<8x128xf32>
    %338 = arith.addf %336, %337 : vector<8x128xf32>
    %c0_146 = arith.constant 0 : index
    %c0_147 = arith.constant 0 : index
    %339 = vector.load %arg17[%c0_146, %c0_147] : memref<128x128xf32, #tpu.memory_space<vmem>>, vector<128x128xf32>
    %cst_148 = arith.constant dense<0.000000e+00> : vector<8x128xf32>
    %340 = tpu.matmul %338, %339, %cst_148 {dimension_numbers = #tpu.dot_dimension_numbers<[1], [0], [0], [1], [0, 0, 1, 1], [], []>} : vector<8x128xf32>, vector<128x128xf32>, vector<8x128xf32> -> vector<8x128xf32>
    %c0_149 = arith.constant 0 : index
    %c0_150 = arith.constant 0 : index
    %341 = vector.load %arg18[%c0_149, %c0_150] : memref<1x128xf32, #tpu.memory_space<vmem>>, vector<1x128xf32>
    %342 = vector.broadcast %341 : vector<1x128xf32> to vector<8x128xf32>
    %343 = arith.addf %340, %342 : vector<8x128xf32>
    %c0_151 = arith.constant 0 : index
    %c0_152 = arith.constant 0 : index
    %c0_153 = arith.constant 0 : index
    %344 = vector.load %arg19[%c0_151, %c0_152, %c0_153] : memref<1x8x128xf32, #tpu.memory_space<vmem>>, vector<1x8x128xf32>
    %345 = vector.shape_cast %344 : vector<1x8x128xf32> to vector<8x128xf32>
    %346 = vector.shape_cast %343 : vector<8x128xf32> to vector<1x8x128xf32>
    tpu.vector_store %arg19[%c0_151, %c0_152, %c0_153], %346 {strides = array<i32>} : memref<1x8x128xf32, #tpu.memory_space<vmem>>, vector<1x8x128xf32>,
    return
  }
  func.func @transform_0(%arg0: i32) -> (i32, i32, i32) {
    %c0_i32 = arith.constant 0 : i32
    %c0_i32_0 = arith.constant 0 : i32
    %c0_i32_1 = arith.constant 0 : i32
    return %arg0, %c0_i32, %c0_i32_0 : i32, i32, i32
  }
  func.func @transform_1(%arg0: i32) -> (i32, i32) {
    %c0_i32 = arith.constant 0 : i32
    %c0_i32_0 = arith.constant 0 : i32
    %c0_i32_1 = arith.constant 0 : i32
    return %c0_i32, %c0_i32_0 : i32, i32
  }
  func.func @transform_2(%arg0: i32) -> (i32, i32) {
    %c0_i32 = arith.constant 0 : i32
    %c0_i32_0 = arith.constant 0 : i32
    %c0_i32_1 = arith.constant 0 : i32
    return %c0_i32, %c0_i32_0 : i32, i32
  }
  func.func @transform_3(%arg0: i32) -> (i32, i32, i32) {
    %c0_i32 = arith.constant 0 : i32
    %c0_i32_0 = arith.constant 0 : i32
    %c0_i32_1 = arith.constant 0 : i32
    %c0_i32_2 = arith.constant 0 : i32
    return %c0_i32, %c0_i32_0, %c0_i32_1 : i32, i32, i32
  }
  func.func @transform_4(%arg0: i32) -> (i32, i32, i32) {
    %c0_i32 = arith.constant 0 : i32
    %c0_i32_0 = arith.constant 0 : i32
    %c0_i32_1 = arith.constant 0 : i32
    %c0_i32_2 = arith.constant 0 : i32
    return %c0_i32, %c0_i32_0, %c0_i32_1 : i32, i32, i32
  }
  func.func @transform_5(%arg0: i32) -> (i32, i32, i32) {
    %c0_i32 = arith.constant 0 : i32
    %c0_i32_0 = arith.constant 0 : i32
    %c0_i32_1 = arith.constant 0 : i32
    %c0_i32_2 = arith.constant 0 : i32
    return %c0_i32, %c0_i32_0, %c0_i32_1 : i32, i32, i32
  }
  func.func @transform_6(%arg0: i32) -> (i32, i32, i32) {
    %c0_i32 = arith.constant 0 : i32
    %c0_i32_0 = arith.constant 0 : i32
    %c0_i32_1 = arith.constant 0 : i32
    %c0_i32_2 = arith.constant 0 : i32
    return %c0_i32, %c0_i32_0, %c0_i32_1 : i32, i32, i32
  }
  func.func @transform_7(%arg0: i32) -> (i32, i32, i32) {
    %c0_i32 = arith.constant 0 : i32
    %c0_i32_0 = arith.constant 0 : i32
    %c0_i32_1 = arith.constant 0 : i32
    %c0_i32_2 = arith.constant 0 : i32
    return %c0_i32, %c0_i32_0, %c0_i32_1 : i32, i32, i32
  }
  func.func @transform_8(%arg0: i32) -> (i32, i32, i32) {
    %c0_i32 = arith.constant 0 : i32
    %c0_i32_0 = arith.constant 0 : i32
    %c0_i32_1 = arith.constant 0 : i32
    %c0_i32_2 = arith.constant 0 : i32
    return %c0_i32, %c0_i32_0, %c0_i32_1 : i32, i32, i32
  }
  func.func @transform_9(%arg0: i32) -> (i32, i32, i32) {
    %c0_i32 = arith.constant 0 : i32
    %c0_i32_0 = arith.constant 0 : i32
    %c0_i32_1 = arith.constant 0 : i32
    %c0_i32_2 = arith.constant 0 : i32
    return %c0_i32, %c0_i32_0, %c0_i32_1 : i32, i32, i32
  }
  func.func @transform_10(%arg0: i32) -> (i32, i32, i32) {
    %c0_i32 = arith.constant 0 : i32
    %c0_i32_0 = arith.constant 0 : i32
    %c0_i32_1 = arith.constant 0 : i32
    %c0_i32_2 = arith.constant 0 : i32
    return %c0_i32, %c0_i32_0, %c0_i32_1 : i32, i32, i32
  }
  func.func @transform_11(%arg0: i32) -> (i32, i32, i32) {
    %c0_i32 = arith.constant 0 : i32
    %c0_i32_0 = arith.constant 0 : i32
    %c0_i32_1 = arith.constant 0 : i32
    %c0_i32_2 = arith.constant 0 : i32
    return %c0_i32, %c0_i32_0, %c0_i32_1 : i32, i32, i32
  }
  func.func @transform_12(%arg0: i32) -> (i32, i32, i32) {
    %c0_i32 = arith.constant 0 : i32
    %c0_i32_0 = arith.constant 0 : i32
    %c0_i32_1 = arith.constant 0 : i32
    %c0_i32_2 = arith.constant 0 : i32
    return %c0_i32, %c0_i32_0, %c0_i32_1 : i32, i32, i32
  }
  func.func @transform_13(%arg0: i32) -> (i32, i32, i32) {
    %c0_i32 = arith.constant 0 : i32
    %c0_i32_0 = arith.constant 0 : i32
    %c0_i32_1 = arith.constant 0 : i32
    %c0_i32_2 = arith.constant 0 : i32
    return %c0_i32, %c0_i32_0, %c0_i32_1 : i32, i32, i32
  }
  func.func @transform_14(%arg0: i32) -> (i32, i32) {
    %c0_i32 = arith.constant 0 : i32
    %c0_i32_0 = arith.constant 0 : i32
    %c0_i32_1 = arith.constant 0 : i32
    return %c0_i32, %c0_i32_0 : i32, i32
  }
  func.func @transform_15(%arg0: i32) -> (i32, i32) {
    %c0_i32 = arith.constant 0 : i32
    %c0_i32_0 = arith.constant 0 : i32
    %c0_i32_1 = arith.constant 0 : i32
    return %c0_i32, %c0_i32_0 : i32, i32
  }
  func.func @transform_16(%arg0: i32) -> (i32, i32) {
    %c0_i32 = arith.constant 0 : i32
    %c0_i32_0 = arith.constant 0 : i32
    %c0_i32_1 = arith.constant 0 : i32
    return %c0_i32, %c0_i32_0 : i32, i32
  }
  func.func @transform_17(%arg0: i32) -> (i32, i32) {
    %c0_i32 = arith.constant 0 : i32
    %c0_i32_0 = arith.constant 0 : i32
    %c0_i32_1 = arith.constant 0 : i32
    return %c0_i32, %c0_i32_0 : i32, i32
  }
  func.func @transform_18(%arg0: i32) -> (i32, i32, i32) {
    %c0_i32 = arith.constant 0 : i32
    %c0_i32_0 = arith.constant 0 : i32
    %c0_i32_1 = arith.constant 0 : i32
    return %arg0, %c0_i32, %c0_i32_0 : i32, i32, i32
  }
}

</mosaic_0001>

<bundles_post_ra>
// kernel: babygpt_forward_impl.1
= control target key start
LH: loop header
LB: loop body
LE: loop exit
PB: predicated region body
PF: predicated region fallthrough
CT: control target
= control target key end

     0   :  { %s5157_s0 = inlined_call_operand.vmem [shape: s32[2,8,1], index: 0, kind: input, shape index: {}]   ;;  %s5158_s1 = inlined_call_operand.hbm [shape: f32[128,128], index: 1, kind: input, shape index: {}]   ;;  %s5159_s2 = inlined_call_operand.vmem [shape: f32[8,128], index: 2, kind: input, shape index: {}]   ;;  %s5160_s3 = inlined_call_operand.vmem [shape: f32[2,1,128], index: 3, kind: input, shape index: {}]   ;;  %s5161_s4 = inlined_call_operand.vmem [shape: f32[2,1,128], index: 4, kind: input, shape index: {}]   ;;  %s5162_s5 = inlined_call_operand.hbm [shape: f32[2,128,384], index: 5, kind: input, shape index: {}]   ;;  %s5163_s6 = inlined_call_operand.hbm [shape: f32[2,128,128], index: 6, kind: input, shape index: {}]   ;;  %s5164_s7 = inlined_call_operand.vmem [shape: f32[2,1,128], index: 7, kind: input, shape index: {}]   ;;  %s5165_s8 = inlined_call_operand.vmem [shape: f32[2,1,128], index: 8, kind: input, shape index: {}]   ;;  %s5166_s9 = inlined_call_operand.vmem [shape: f32[2,1,128], index: 9, kind: input, shape index: {}]   ;;  %s5167_s10 = inlined_call_operand.hbm [shape: f32[2,128,256], index: 10, kind: input, shape index: {}]   ;;  %s5168_s11 = inlined_call_operand.vmem [shape: f32[2,1,256], index: 11, kind: input, shape index: {}]   ;;  %s5169_s12 = inlined_call_operand.hbm [shape: f32[2,256,128], index: 12, kind: input, shape index: {}]   ;;  %s5170_s13 = inlined_call_operand.vmem [shape: f32[2,1,128], index: 13, kind: input, shape index: {}]   ;;  %s5171_s14 = inlined_call_operand.vmem [shape: f32[1,128], index: 14, kind: input, shape index: {}]   ;;  %s5172_s15 = inlined_call_operand.vmem [shape: f32[1,128], index: 15, kind: input, shape index: {}]   ;;  %s5173_s16 = inlined_call_operand.hbm [shape: f32[128,128], index: 16, kind: input, shape index: {}]   ;;  %s5174_s17 = inlined_call_operand.vmem [shape: f32[1,128], index: 17, kind: input, shape index: {}]   ;;  %s5175_s18 = inlined_call_operand.hbm [shape: f32[2,8,128], index: 18, kind: output, shape index: {}]  }
   0x1   :  { %5185 = sst [smem:[#allocation25_spill]] %s5157_s0 }
   0x2   :  { %5186 = sst [smem:[#allocation26_spill]] %s5158_s1 }
   0x3   :  { %5187 = sst [smem:[#allocation27_spill]] %s5159_s2 }
   0x4   :  { %5188 = sst [smem:[#allocation28_spill]] %s5160_s3 }
   0x5   :  { %5189 = sst [smem:[#allocation29_spill]] %s5174_s17 }
   0x6   :  { %5190 = sst [smem:[#allocation30_spill]] %s5175_s18 }
   0x7   :  { %23 = vsyncpa [#allocation3], 0 }
   0x8   :  { %24 = vsyncpa [#allocation6], 0 }
   0x9   :  { %25 = vsyncpa [#allocation9], 0 }
   0xa   :  { %26 = vsyncpa [#allocation12], 0 }
   0xb   :  { %27 = vsyncpa [#allocation4], 0 }
   0xc   :  { %29 = vsyncpa [#allocation4 + $0x1], 0  ;;  %s4594_s27 = smov 0   ;;  %s4596_s28 = smov 0  }
   0xd   :  { %s4598_s29 = smov 0   ;;  %s4600_s30 = smov 0  }
   0xe LB: > { %5191 = sst [smem:[#allocation19_spill]] %s4461_s27  ;;  %s4615_s0 = sadd.s32 4294967295, %s4473_s30   ;;  %s4473_s30 = sphi %s4600_s30, %s5222_s30   ;;  %s4469_s29 = sphi %s4598_s29, %s5224_s29   ;;  %s4465_s28 = sphi %s4596_s28, %s5226_s28   ;;  %s4461_s27 = sphi %s4594_s27, %s5225_s27  }
   0xf   : > { %5192 = sst [smem:[#allocation20_spill]] %s4469_s29  ;;  %s3515_s19 = sadd.s32 4294967294, %s4473_s30  }
  0x10   : > { %5193 = sst [smem:[#allocation21_spill]] %s4473_s30  ;;  %s4619_s1 = sadd.s32 1, %s4473_s30  }
  0x11   : > { %5194 = sst [smem:[#allocation22_spill]] %s4619_s1  ;;  %s425_s20 = sadd.s32 1, %s4469_s29 }
  0x12   : > { %s422_s21 = ssub.s32 %s4473_s30, %s4619_s1  ;;  %p435_p0 = scmp.ne.s32.totalorder %s4469_s29, %s4465_s28 }
  0x13   : > { %p423_p1 = scmp.eq.s32.totalorder %s422_s21, 0  ;;  %p436_p2 = scmp.eq.s32.totalorder %s4615_s0, 1 }
  0x14   : > { %p441_p3 = scmp.ne.s32.totalorder %s4465_s28, %s4461_s27  ;;  %p442_p4 = scmp.eq.s32.totalorder %s3515_s19, 1 }
  0x15   : > { %s4630_s22 = scalar_select %p423_p1, %s4469_s29, %s425_s20  }
  0x16   : > { %p4632_p5 = por %p436_p2, %p435_p0  ;;  %p4636_p6 = por %p442_p4, %p441_p3 }
  0x17   : > { %5195 = sst [smem:[#allocation23_spill]] %s4630_s22  ;;  %p3516_p7 = scmp.ge.s32.totalorder %s4473_s30, 1 }
  0x18   : > { %s5196_s2 = scalar_select %p4632_p5, 1, 0 }
  0x19   : > { %s5197_s23 = scalar_select %p4636_p6, 1, 0 }
  0x1a   : > { %p449_p8 = scmp.lt.s32.totalorder %s4473_s30, 3  ;;  %p5181_p9 = scmp.eq.s32.totalorder %s4615_s0, 0 }
  0x1b   : > { %5198 = sst [smem:[#allocation24_spill]] %s5197_s23  ;;  %s4475_s25 = smov [#allocation5]  }
  0x1c   : > { %p4643_p10 = pnand %p3516_p7, %p449_p8  ;;  %s483_s26 = sshll.u32 %s4475_s25, 4  ;;  %s484_s26 = int_to_ptr.vmem [resolvable:$true] %s483_s26 }
  0x1d   : > { %s4476_s20 = smov [#allocation8]   ;;  %s4252_s29 = scalar_lea.vmem %s484_s26, 12288 }
  0x1e   : > { %p4107_p11 = pneg %p4643_p10  ;;  %s518_s21 = sshll.u32 %s4476_s20, 4  ;;  %s519_s21 = int_to_ptr.vmem [resolvable:$true] %s518_s21 }
  0x1f   : > { %p4253_p0 = scmp.ne.s32.totalorder %s484_s26, %s4252_s29  ;;  %p4260_p3 = scmp.lt.s32.totalorder %s484_s26, %s484_s26 }
  0x20   : > { %p4651_p12 = pnand %p5181_p9, %p4107_p11  ;;  %p4261_p4 = scmp.lt.s32.totalorder %s4252_s29, %s4252_s29 }
  0x22   : > { %p4657_p13 = pneg %p4651_p12  ;;  %p4262_p7 = por %p4261_p4, %p4260_p3 }
  0x24   : > { %p4255_p1 = pnand %p4253_p0, %p4657_p13 }
  0x26   : > { %p4256_p2 = pneg %p4255_p1 }
  0x28   : > { %p4263_p8 = pnand %p4262_p7, %p4256_p2 }
  0x2a   : > { %4266 = shalt.err (!%p4263_p8)
}
  0x2b   : > { %s4477_s25 = smov 384   ;;  %s4478_s20 = smov 24  }
  0x2c   : > { %4113 = dma.hbm_to_vmem [thread:$0]  (!%p4651_p12), %s5162_s5, 12288, %s484_s26, [#allocation6], %s4477_s25, %s4477_s25, %s4478_s20  }
  0x2d   : > { %s4278_s27 = scalar_lea.vmem %s519_s21, 8192  ;;  %p4286_p1 = scmp.lt.s32.totalorder %s519_s21, %s519_s21 }
  0x2e   : > { %p4279_p11 = scmp.ne.s32.totalorder %s519_s21, %s4278_s27  ;;  %p4287_p6 = scmp.lt.s32.totalorder %s4278_s27, %s4278_s27 }
  0x30   : > { %p4281_p9 = pnand %p4279_p11, %p4657_p13  ;;  %p4288_p5 = por %p4287_p6, %p4286_p1 }
  0x32   : > { %p4282_p0 = pneg %p4281_p9 }
  0x34   : > { %p4289_p3 = pnand %p4288_p5, %p4282_p0 }
  0x36   : > { %4292 = shalt.err (!%p4289_p3)
}
  0x37   : > { %s4479_s29 = smov 256   ;;  %s4480_s30 = smov 16  }
  0x38   : > { %4119 = dma.hbm_to_vmem [thread:$0]  (!%p4651_p12), %s5167_s10, 8192, %s519_s21, [#allocation9], %s4479_s29, %s4479_s29, %s4480_s30  }
  0x39   : > { %s4481_s1 = smov [#allocation2]  }
  0x3a   : > { %s461_s23 = sshll.u32 %s4481_s1, 4  ;;  %s462_s23 = int_to_ptr.vmem [resolvable:$true] %s461_s23 }
  0x3b   : > { %s4304_s26 = scalar_lea.vmem %s462_s23, 2048  ;;  %p4312_p6 = scmp.lt.s32.totalorder %s462_s23, %s462_s23 }
  0x3c   : > { %p4305_p2 = scmp.ne.s32.totalorder %s462_s23, %s4304_s26  ;;  %p4313_p5 = scmp.lt.s32.totalorder %s4304_s26, %s4304_s26 }
  0x3e   : > { %p4307_p9 = pnand %p4305_p2, %p4657_p13  ;;  %p4314_p7 = por %p4313_p5, %p4312_p6 }
  0x40   : > { %p4308_p4 = pneg %p4307_p9 }
  0x42   : > { %p4315_p8 = pnand %p4314_p7, %p4308_p4 }
  0x44   : > { %4318 = shalt.err (!%p4315_p8)
}
  0x45   : > { %s4482_s27 = smov 128   ;;  %s4483_s25 = smov 8  }
  0x46   : > { %s5202_s30 = sld [smem:[#allocation26_spill]]  ;;  %s4484_s21 = smov [#allocation7]  }
  0x47   : > { %s496_s20 = sshll.u32 %s4484_s21, 4  ;;  %s4485_s29 = smov [#allocation10]   ;;  %s497_s20 = int_to_ptr.vmem [resolvable:$true] %s496_s20 }
  0x48   : > { %s534_s1 = sshll.u32 %s4485_s29, 4  ;;  %s4330_s26 = scalar_lea.vmem %s497_s20, 4096  ;;  %s535_s1 = int_to_ptr.vmem [resolvable:$true] %s534_s1 }
  0x49   : > { %p4331_p11 = scmp.ne.s32.totalorder %s497_s20, %s4330_s26  ;;  %p4338_p3 = scmp.lt.s32.totalorder %s497_s20, %s497_s20 }
  0x4a   : > { %p4339_p2 = scmp.lt.s32.totalorder %s4330_s26, %s4330_s26 }
  0x4b   : > { %p4333_p0 = pnand %p4331_p11, %p4657_p13 }
  0x4c   : > { %4110 = dma.hbm_to_vmem [thread:$0]  (!%p4651_p12), %s5202_s30, 2048, %s462_s23, [#allocation3], %s4482_s27, %s4482_s27, %s4483_s25  }
  0x4d   : > { %p4334_p1 = pneg %p4333_p0  ;;  %p4340_p9 = por %p4339_p2, %p4338_p3 }
  0x4f   : > { %p4341_p4 = pnand %p4340_p9, %p4334_p1 }
  0x51   : > { %4344 = shalt.err (!%p4341_p4)
}
  0x52   : > { %4116 = dma.hbm_to_vmem [thread:$0]  (!%p4651_p12), %s5163_s6, 4096, %s497_s20, [#allocation6], %s4482_s27, %s4482_s27, %s4483_s25  }
  0x53   : > { %s4356_s18 = scalar_lea.vmem %s535_s1, 8192  ;;  %p4364_p8 = scmp.lt.s32.totalorder %s535_s1, %s535_s1 }
  0x54   : > { %p4357_p6 = scmp.ne.s32.totalorder %s535_s1, %s4356_s18  ;;  %p4365_p11 = scmp.lt.s32.totalorder %s4356_s18, %s4356_s18 }
  0x56   : > { %p4359_p5 = pnand %p4357_p6, %p4657_p13  ;;  %p4366_p0 = por %p4365_p11, %p4364_p8 }
  0x58   : > { %p4360_p7 = pneg %p4359_p5 }
  0x5a   : > { %p4367_p1 = pnand %p4366_p0, %p4360_p7 }
  0x5c   : > { %4370 = shalt.err (!%p4367_p1)
}
  0x5d   : > { %4122 = dma.hbm_to_vmem [thread:$0]  (!%p4651_p12), %s5169_s12, 8192, %s535_s1, [#allocation9], %s4482_s27, %s4482_s27, %s4483_s25  }
  0x5e   : > { %s4486_s20 = smov [#allocation11]  }
  0x5f   : > { %s556_s29 = sshll.u32 %s4486_s20, 4  ;;  %s557_s29 = int_to_ptr.vmem [resolvable:$true] %s556_s29 }
  0x60   : > { %s4382_s26 = scalar_lea.vmem %s557_s29, 2048  ;;  %p4390_p4 = scmp.lt.s32.totalorder %s557_s29, %s557_s29 }
  0x61   : > { %p4383_p3 = scmp.ne.s32.totalorder %s557_s29, %s4382_s26  ;;  %p4391_p6 = scmp.lt.s32.totalorder %s4382_s26, %s4382_s26 }
  0x63   : > { %p4385_p2 = pnand %p4383_p3, %p4657_p13  ;;  %p4392_p5 = por %p4391_p6, %p4390_p4 }
  0x65   : > { %p4386_p9 = pneg %p4385_p2 }
  0x67   : > { %p4393_p7 = pnand %p4392_p5, %p4386_p9 }
  0x69   : > { %4396 = shalt.err (!%p4393_p7)
}
  0x6a   : > { %4125 = dma.hbm_to_vmem [thread:$0]  (!%p4651_p12), %s5173_s16, 2048, %s557_s29, [#allocation12], %s4482_s27, %s4482_s27, %s4483_s25  }
  0x6b   : > { %582 = sbr.rel (%p4643_p10) target bundleno = 7782 (0x1e66), region = 92  ;;  %p5203_p13 = scmp.eq.s32.totalorder (!%p4643_p10), %s4615_s0, 0 }
  0x70   : > { %4440 = dma.done.wait (%p5203_p13), [#allocation3], 2048   ;;  %p5204_p8 = pmov %p5203_p13 }
  0x72   : > { %4442 = vsyncadd (%p5204_p8), [#allocation3], 4294965248  ;;  %p5205_p11 = pmov %p5204_p8 }
  0x73   : > { %p5206_p0 = pmov %p5204_p8 }
  0x74   : > { %4444 = dma.done.wait (%p5205_p11), [#allocation6], 16384  }
  0x75   : > { %4446 = vsyncadd (%p5206_p0), [#allocation6], 4294950912  ;;  %p5207_p1 = pmov %p5206_p0 }
  0x76   : > { %p5208_p12 = pmov %p5206_p0 }
  0x77   : > { %4448 = dma.done.wait (%p5207_p1), [#allocation9], 16384  }
  0x78   : > { %4450 = vsyncadd (%p5208_p12), [#allocation9], 4294950912  ;;  %p5209_p10 = pmov %p5206_p0 }
  0x79   : > { %p5210_p3 = pmov %p5206_p0 }
  0x7a   : > { %4452 = dma.done.wait (%p5209_p10), [#allocation12], 2048  }
  0x7b   : > { %4454 = vsyncadd (%p5210_p3), [#allocation12], 4294965248  ;;  %p655_p2 = scmp.lt.s32.totalorder %s4615_s0, 1  ;;  %v4487_v0 = vmov 0   ;;  %v4488_v1 = vmov 0.0   ;;  %vm4489_vm0 = vmmov 0   ;;  %v660_v19 = vlaneseq }
  0x7c   : > { %4198 = vset.pattern.permute.xlu0 %v4487_v0  ;;  %3791 = vmatprep.subr.mxu0 %v4488_v1  ;;  %s5211_s25 = sld [smem:[#allocation25_spill]]  ;;  %v683_v3 = vld [vmem:[#allocation2 + $0x78] sm:$0xff]  ;;  %v682_v4 = vld [vmem:[#allocation2 + $0x70] sm:$0xff]  ;;  %v681_v5 = vld [vmem:[#allocation2 + $0x68] sm:$0xff]  ;;  %v4490_v22 = vmov 1.0   ;;  %vm977_vm2 = vcmask 130048  }
  0x7d   : > { %s656_s22 = scalar_select %p655_p2, %s4615_s0, 1  ;;  %900 = vmatprep.mubr.f32.mxu1 %v4488_v1  ;;  %3823 = vmatprep.mubr.msk.f32.mxu0 %vm4489_vm0, %v4488_v1  ;;  %v680_v6 = vld [vmem:[#allocation2 + $0x60] sm:$0xff]  ;;  %v679_v7 = vld [vmem:[#allocation2 + $0x58] sm:$0xff]  ;;  %v678_v8 = vld [vmem:[#allocation2 + $0x50] sm:$0xff]  ;;  %v4759_v20 = vand.u32 127, %v660_v19  ;;  %vm1054_vm4 = vcmask 64512  }
  0x7e   : > { %3792 = vmatpush3.msra.mxu0 %v683_v3  ;;  %v677_v9 = vld [vmem:[#allocation2 + $0x48] sm:$0xff]  ;;  %v676_v10 = vld [vmem:[#allocation2 + $0x40] sm:$0xff]  ;;  %v675_v11 = vld [vmem:[#allocation2 + $0x38] sm:$0xff]  ;;  %s5212_s21 = sld [smem:[#allocation27_spill]]  ;;  %s4491_s1 = smov 112   ;;  %vm1648_vm5 = vcmask 261120  }
  0x7f   : > { %s3532_s24 = sshll.u32 %s656_s22, 3  ;;  %3793 = vmatprep.subr.mxu0 %v4488_v1  ;;  %v674_v12 = vld [vmem:[#allocation2 + $0x30] sm:$0xff]  ;;  %v673_v13 = vld [vmem:[#allocation2 + $0x28] sm:$0xff]  ;;  %v672_v14 = vld [vmem:[#allocation2 + $0x20] sm:$0xff]  ;;  %s5213_s3 = sld [smem:[#allocation28_spill]]  ;;  %vm1650_vm6 = vcmask 392192  }
  0x80   : > { %3794 = vmatpush3.msra.mxu0 %v682_v4  ;;  %v671_v15 = vld [vmem:[#allocation2 + $0x18] sm:$0xff]  ;;  %v670_v16 = vld [vmem:[#allocation2 + $0x10] sm:$0xff]  ;;  %v669_v17 = vld [vmem:[#allocation2 + $0x8] sm:$0xff]  ;;  %s4493_s22 = smov 96   ;;  %s4495_s19 = smov 16   ;;  %vm1652_vm7 = vcmask 523264  }
  0x81   : > { %3795 = vmatprep.subr.mxu0 %v4488_v1  ;;  %v668_v18 = vld [vmem:[#allocation2] sm:$0xff]  ;;  %v834_v23 = vld [vmem:[#allocation5 + $0x170] sm:$0xff]  ;;  %v833_v24 = vld [vmem:[#allocation5 + $0x168] sm:$0xff]  ;;  %s4496_s27 = smov 32   ;;  %s5215_s30 = sld [smem:[#allocation30_spill]] }
  0x82   : > { %s658_s17 = scalar_lea.vmem %s5211_s25, %s3532_s24  ;;  %3796 = vmatpush3.msra.mxu0 %v681_v5  ;;  %v835_v25 = vld [vmem:[#allocation5 + $0x178] sm:$0xff]  ;;  %836 = vmatprep.subr.mxu1 %v834_v23  ;;  %v830_v27 = vld [vmem:[#allocation5 + $0x150] sm:$0xff]  ;;  %v832_v28 = vld [vmem:[#allocation5 + $0x160] sm:$0xff]  ;;  %s4494_s24 = smov 80  }
  0x83   : > { %v659_v2 = vld [vmem:[%s658_s17] sm:$0xff]  ;;  %3797 = vmatprep.subr.mxu0 %v4488_v1  ;;  %v831_v26 = vld [vmem:[#allocation5 + $0x158] sm:$0xff]  ;;  %837 = vmatpush1.msra.mxu1 %v833_v24  ;;  %v829_v36 = vld [vmem:[#allocation5 + $0x148] sm:$0xff]  ;;  %s4497_s25 = smov 48   ;;  %p5217_p4 = scmp.ne.s32.totalorder %s5196_s2, 0 }
  0x84   : > { %663 = vperm.xlu0 %4198, %v659_v2   ;;  %3798 = vmatpush3.msra.mxu0 %v680_v6  ;;  %v684_v29 = vld [vmem:[%s5212_s21] sm:$0xff]  ;;  %v827_v35 = vld [vmem:[#allocation5 + $0x138] sm:$0xff]  ;;  %v825_v37 = vld [vmem:[#allocation5 + $0x128] sm:$0xff] }
  0x85   : > { %3799 = vmatprep.subr.mxu0 %v4488_v1  ;;  %838 = vmatprep.subr.mxu1 %v831_v26  ;;  %v828_v34 = vld [vmem:[#allocation5 + $0x140] sm:$0xff]  ;;  %v826_v39 = vld [vmem:[#allocation5 + $0x130] sm:$0xff]  ;;  %v821_v41 = vld [vmem:[#allocation5 + $0x108] sm:$0xff] }
  0x86   : > { %3800 = vmatpush3.msra.mxu0 %v679_v7  ;;  %839 = vmatpush1.msra.mxu1 %v830_v27  ;;  %v824_v38 = vld [vmem:[#allocation5 + $0x120] sm:$0xff]  ;;  %v822_v40 = vld [vmem:[#allocation5 + $0x110] sm:$0xff]  ;;  %v823_v42 = vld [vmem:[#allocation5 + $0x118] sm:$0xff] }
  0x87   : > { %3801 = vmatprep.subr.mxu0 %v4488_v1  ;;  %840 = vmatprep.subr.mxu1 %v828_v34  ;;  %v819_v43 = vld [vmem:[#allocation5 + $0xf8] sm:$0xff]  ;;  %v818_v44 = vld [vmem:[#allocation5 + $0xf0] sm:$0xff]  ;;  %v820_v45 = vld [vmem:[#allocation5 + $0x100] sm:$0xff]  ;;  %v4815_v34 = vshrl.u32 %v660_v19, 7  ;;  %s5216_s21 = smov %s5215_s30 }
  0x88   : > { %3802 = vmatpush3.msra.mxu0 %v678_v8  ;;  %841 = vmatpush1.msra.mxu1 %v827_v35  ;;  %v816_v46 = vld [vmem:[#allocation5 + $0xe0] sm:$0xff]  ;;  %v815_v47 = vld [vmem:[#allocation5 + $0xd8] sm:$0xff]  ;;  %v817_v48 = vld [vmem:[#allocation5 + $0xe8] sm:$0xff]  ;;  %v4492_v35 = vmov -1e+30  }
  0x89   : > { %3803 = vmatprep.subr.mxu0 %v4488_v1  ;;  %842 = vmatprep.subr.mxu1 %v825_v37  ;;  %v813_v49 = vld [vmem:[#allocation5 + $0xc8] sm:$0xff]  ;;  %v812_v50 = vld [vmem:[#allocation5 + $0xc0] sm:$0xff]  ;;  %v814_v51 = vld [vmem:[#allocation5 + $0xd0] sm:$0xff]  ;;  %vm757_vm3 = vcmp.le.s32.totalorder %v4759_v20, %v4815_v34 }
  0x8a   : > { %3804 = vmatpush3.msra.mxu0 %v677_v9  ;;  %843 = vmatpush1.msra.mxu1 %v824_v38  ;;  %v810_v52 = vld [vmem:[#allocation5 + $0xb0] sm:$0xff]  ;;  %v809_v53 = vld [vmem:[#allocation5 + $0xa8] sm:$0xff]  ;;  %v811_v54 = vld [vmem:[#allocation5 + $0xb8] sm:$0xff] }
  0x8b   : > { %3805 = vmatprep.subr.mxu0 %v4488_v1  ;;  %844 = vmatprep.subr.mxu1 %v822_v40  ;;  %v807_v55 = vld [vmem:[#allocation5 + $0x98] sm:$0xff]  ;;  %v806_v56 = vld [vmem:[#allocation5 + $0x90] sm:$0xff]  ;;  %v808_v57 = vld [vmem:[#allocation5 + $0xa0] sm:$0xff] }
  0x8c   : > { %3806 = vmatpush3.msra.mxu0 %v676_v10  ;;  %845 = vmatpush1.msra.mxu1 %v821_v41  ;;  %v804_v58 = vld [vmem:[#allocation5 + $0x80] sm:$0xff]  ;;  %v803_v59 = vld [vmem:[#allocation5 + $0x78] sm:$0xff]  ;;  %v805_v60 = vld [vmem:[#allocation5 + $0x88] sm:$0xff] }
  0x8d   : > { %3807 = vmatprep.subr.mxu0 %v4488_v1  ;;  %846 = vmatprep.subr.mxu1 %v819_v43  ;;  %v801_v61 = vld [vmem:[#allocation5 + $0x68] sm:$0xff]  ;;  %v800_v62 = vld [vmem:[#allocation5 + $0x60] sm:$0xff]  ;;  %v802_v63 = vld [vmem:[#allocation5 + $0x70] sm:$0xff] }
  0x8e   : > { %3808 = vmatpush3.msra.mxu0 %v675_v11  ;;  %847 = vmatpush1.msra.mxu1 %v818_v44  ;;  %v798_v0 = vld [vmem:[#allocation5 + $0x50] sm:$0xff]  ;;  %v797_v2 = vld [vmem:[#allocation5 + $0x48] sm:$0xff]  ;;  %v799_v3 = vld [vmem:[#allocation5 + $0x58] sm:$0xff] }
  0x8f   : > { %3809 = vmatprep.subr.mxu0 %v4488_v1  ;;  %848 = vmatprep.subr.mxu1 %v816_v46  ;;  %v795_v4 = vld [vmem:[#allocation5 + $0x38] sm:$0xff]  ;;  %v794_v5 = vld [vmem:[#allocation5 + $0x30] sm:$0xff]  ;;  %v796_v6 = vld [vmem:[#allocation5 + $0x40] sm:$0xff] }
  0x90   : > { %3810 = vmatpush3.msra.mxu0 %v674_v12  ;;  %849 = vmatpush1.msra.mxu1 %v815_v47  ;;  %v792_v7 = vld [vmem:[#allocation5 + $0x20] sm:$0xff]  ;;  %v791_v8 = vld [vmem:[#allocation5 + $0x18] sm:$0xff]  ;;  %v793_v9 = vld [vmem:[#allocation5 + $0x28] sm:$0xff] }
  0x91   : > { %3811 = vmatprep.subr.mxu0 %v4488_v1  ;;  %850 = vmatprep.subr.mxu1 %v813_v49  ;;  %v789_v10 = vld [vmem:[#allocation5 + $0x8] sm:$0xff]  ;;  %v788_v11 = vld [vmem:[#allocation5] sm:$0xff]  ;;  %v790_v12 = vld [vmem:[#allocation5 + $0x10] sm:$0xff] }
  0x92   : > { %3812 = vmatpush3.msra.mxu0 %v673_v13  ;;  %851 = vmatpush1.msra.mxu1 %v812_v50  ;;  %v3535_v24 = vld [vmem:[%s5213_s3] ss:$0 sm:$0xff] }
  0x93   : > { %3813 = vmatprep.subr.mxu0 %v4488_v1  ;;  %852 = vmatprep.subr.mxu1 %v810_v52  ;;  %v3536_v26 = vld [vmem:[%s5161_s4] ss:$0 sm:$0xff] }
  0x94   : > { %3814 = vmatpush3.msra.mxu0 %v672_v14  ;;  %853 = vmatpush1.msra.mxu1 %v809_v53 }
  0x95   : > { %3815 = vmatprep.subr.mxu0 %v4488_v1  ;;  %854 = vmatprep.subr.mxu1 %v807_v55 }
  0x96   : > { %3816 = vmatpush3.msra.mxu0 %v671_v15  ;;  %855 = vmatpush1.msra.mxu1 %v806_v56 }
  0x97   : > { %3817 = vmatprep.subr.mxu0 %v4488_v1  ;;  %856 = vmatprep.subr.mxu1 %v804_v58 }
  0x98   : > { %3818 = vmatpush3.msra.mxu0 %v670_v16  ;;  %857 = vmatpush1.msra.mxu1 %v803_v59 }
  0x99   : > { %3819 = vmatprep.subr.mxu0 %v4488_v1  ;;  %858 = vmatprep.subr.mxu1 %v801_v61 }
  0x9a   : > { %3820 = vmatpush3.msra.mxu0 %v669_v17  ;;  %859 = vmatpush1.msra.mxu1 %v800_v62 }
  0x9b   : > { %3821 = vmatprep.subr.mxu0 %v4488_v1  ;;  %860 = vmatprep.subr.mxu1 %v798_v0 }
  0x9c   : > { %3822 = vmatpush3.msra.mxu0 %v668_v18  ;;  %861 = vmatpush1.msra.mxu1 %v797_v2 }
  0x9d   : > { %3826 = vmatprep.subr.mxu0 %v4488_v1  ;;  %862 = vmatprep.subr.mxu1 %v795_v4 }
  0x9e   : > { %863 = vmatpush1.msra.mxu1 %v794_v5 }
  0x9f   : > { %864 = vmatprep.subr.mxu1 %v792_v7 }
  0xa0   : > { %865 = vmatpush1.msra.mxu1 %v791_v8 }
  0xa1   : > { %866 = vmatprep.subr.mxu1 %v789_v10 }
  0xa2   : > { %867 = vmatpush1.msra.mxu1 %v788_v11 }
  0xa3   : > { %3861 = vmatprep.subr.mxu1 %v4488_v1 }
  0xff   : > { %v664_v21 = vpop.permute.xlu0 %663 }
 0x100   : > { %vm665_vm1 = vcmp.eq.s32.totalorder %v4759_v20, %v664_v21 }
 0x101   : > { %3824 = vmatmul.mubr.msk.f32.vlgmr.msra.gmra.mxu0 %vm665_vm1, %v4490_v22 }
 0x102   : > { %3858 = vmatprep.mubr.msk.f32.mxu0 %vm4489_vm0, %v4488_v1  ;;  %3827 = vmatpush3.msra.mxu0 %v835_v25 }
 0x103   : > { %3828 = vmatprep.subr.mxu0 %v4488_v1 }
 0x104   : > { %3829 = vmatpush3.msra.mxu0 %v832_v28 }
 0x105   : > { %3830 = vmatprep.subr.mxu0 %v4488_v1 }
 0x106   : > { %3831 = vmatpush3.msra.mxu0 %v829_v36  ;;  %v4819_v36 = vsel %vm757_vm3, 0.0, %v4492_v35 }
 0x107   : > { %3832 = vmatprep.subr.mxu0 %v4488_v1 }
 0x108   : > { %3833 = vmatpush3.msra.mxu0 %v826_v39 }
 0x109   : > { %3834 = vmatprep.subr.mxu0 %v4488_v1 }
 0x10a   : > { %3835 = vmatpush3.msra.mxu0 %v823_v42 }
 0x10b   : > { %3836 = vmatprep.subr.mxu0 %v4488_v1 }
 0x10c   : > { %3837 = vmatpush3.msra.mxu0 %v820_v45 }
 0x10d   : > { %3838 = vmatprep.subr.mxu0 %v4488_v1 }
 0x10e   : > { %3839 = vmatpush3.msra.mxu0 %v817_v48 }
 0x10f   : > { %3840 = vmatprep.subr.mxu0 %v4488_v1 }
 0x110   : > { %3841 = vmatpush3.msra.mxu0 %v814_v51 }
 0x111   : > { %3842 = vmatprep.subr.mxu0 %v4488_v1 }
 0x112   : > { %3843 = vmatpush3.msra.mxu0 %v811_v54 }
 0x113   : > { %3844 = vmatprep.subr.mxu0 %v4488_v1 }
 0x114   : > { %3845 = vmatpush3.msra.mxu0 %v808_v57 }
 0x115   : > { %3846 = vmatprep.subr.mxu0 %v4488_v1 }
 0x116   : > { %3847 = vmatpush3.msra.mxu0 %v805_v60 }
 0x117   : > { %3848 = vmatprep.subr.mxu0 %v4488_v1 }
 0x118   : > { %3849 = vmatpush3.msra.mxu0 %v802_v63 }
 0x119   : > { %3850 = vmatprep.subr.mxu0 %v4488_v1 }
 0x11a   : > { %3851 = vmatpush3.msra.mxu0 %v799_v3 }
 0x11b   : > { %3852 = vmatprep.subr.mxu0 %v4488_v1 }
 0x11c   : > { %3853 = vmatpush3.msra.mxu0 %v796_v6 }
 0x11d   : > { %3854 = vmatprep.subr.mxu0 %v4488_v1 }
 0x11e   : > { %3855 = vmatpush3.msra.mxu0 %v793_v9 }
 0x11f   : > { %3856 = vmatprep.subr.mxu0 %v4488_v1 }
 0x120   : > { %3857 = vmatpush3.msra.mxu0 %v790_v12 }
 0x121   : > { %3901 = vmatprep.subr.mxu0 %v4488_v1 }
 0x1c1   : > { %v751_v30 = vpop.f32.mrf.mxu0 }
 0x1c2   : > { %v4769_v31 = vadd.f32 %v751_v30, %v684_v29 }
 0x1c3   : > { %v3825_v32 = vpop.f32.mrf.mxu0 }
 0x1c4   : > { %761 = vadd.xlane.f32.xlu0 %v4769_v31  ;;  %v764_v33 = vmul.f32 %v4769_v31, %v4769_v31 }
 0x1c6   : > { %765 = vadd.xlane.f32.xlu1 %v764_v33 }
 0x24d   : > { %v762_v13 = vpop.xlane.xlu0 %761 }
 0x24e   : > { %v763_v14 = vmul.f32 0.015625, %v762_v13 }
 0x24f   : > { %v766_v15 = vpop.xlane.xlu1 %765 }
 0x250   : > { %v768_v16 = vmul.f32 %v763_v14, %v763_v14  ;;  %v767_v17 = vmul.f32 0.015625, %v766_v15  ;;  %v770_v22 = vsub.f32 %v4769_v31, %v763_v14 }
 0x252   : > { %v769_v18 = vsub.f32 %v767_v17, %v768_v16 }
 0x254   : > { %v771_v21 = vadd.f32 1e-05, %v769_v18 }
 0x256   : > { %4199 = vrsqrt.f32 %v771_v21 }
 0x263   : > { %v4200_v23 = vpop.eup %4199 }
 0x264   : > { %v773_v25 = vmul.f32 %v4200_v23, %v770_v22 }
 0x266   : > { %v780_v27 = vmul.f32 %v3535_v24, %v773_v25 }
 0x268   : > { %v787_v28 = vadd.f32 %v3536_v26, %v780_v27 }
 0x26a   : > { %901 = vmatmul.mubr.f32.vlgmr.msra.gmra.mxu1 %v787_v28  ;;  %3859 = vmatmul.mubr.f32.vlgmr.msra.gmra.mxu0 %v787_v28 }
 0x26b   : > { %3863 = vmatprep.mubr.msk.f32.mxu1 %vm4489_vm0, %v4488_v1  ;;  %3933 = vmatprep.mubr.msk.f32.mxu0 %vm4489_vm0, %v4488_v1 }
 0x32a   : > { %v4800_v29 = vpop.f32.mrf.mxu1  ;;  %v4802_v30 = vpop.f32.mrf.mxu0 }
 0x32b   : > { %1229 = vrot.lane.b32.xlu0 %v4802_v30, %s4491_s1 }
 0x32c   : > { %v904_v32 = vpop.f32.mrf.mxu1  ;;  %v3860_v33 = vpop.f32.mrf.mxu0 }
 0x32d   : > { %3862 = vmatpush3.xpose.msk.msra.mxu1 %vm977_vm2, %v904_v32 }
 0x32e   : > { %3866 = vmatprep.subr.mxu1 %v4488_v1 }
 0x330   : > { %3864 = vmatmul.mubr.msk.f32.vlgmr.msra.gmra.mxu1 %vm977_vm2, %v4800_v29 }
 0x331   : > { %3867 = vmatpush3.msra.mxu1 %v4802_v30  ;;  %3868 = vmatprep.mubr.msk.f32.mxu1 %vm4489_vm0, %v4488_v1 }
 0x332   : > { %3871 = vmatprep.subr.mxu1 %v4488_v1 }
 0x39d   : > { %v1230_v49 = vpop.permute.xlu0 %1229 }
 0x3f0   : > { %v1050_v37 = vpop.f32.mrf.mxu1 }
 0x3f1   : > { %v1051_v38 = vadd.f32 %v1050_v37, %v4819_v36 }
 0x3f2   : > { %v3865_v39 = vpop.f32.mrf.mxu1 }
 0x3f3   : > { %v1055_v40 = vsel %vm1054_vm4, %v1051_v38, -inf }
 0x3f4   : > { %1056 = vmax.xlane.f32.xlu1 %v1055_v40 }
 0x405   : > { %1141 = vrot.lane.b32.xlu1 %v904_v32, %s4491_s1 }
 0x47d   : > { %v1057_v41 = vpop.xlane.xlu1 %1056 }
 0x47e   : > { %v1058_v42 = vsub.f32 %v1051_v38, %v1057_v41  ;;  %v1669_v41 = vld [vmem:[#allocation7 + $0x78] sm:$0xff] }
 0x47f   : > { %3902 = vmatpush3.msra.mxu0 %v1669_v41  ;;  %v1778_v41 = vld [vmem:[#allocation8] sm:$0xff] }
 0x480   : > { %v1059_v19 = vmul.f32 1.442695, %v1058_v42  ;;  %v1668_v42 = vld [vmem:[#allocation7 + $0x70] sm:$0xff]  ;;  %3903 = vmatprep.subr.mxu0 %v4488_v1 }
 0x481   : > { %v1142_v44 = vpop.permute.xlu1 %1141  ;;  %3904 = vmatpush3.msra.mxu0 %v1668_v42  ;;  %v1926_v42 = vld [vmem:[#allocation10 + $0xf8] sm:$0xff] }
 0x482   : > { %4201 = vpow2.f32 %v1059_v19  ;;  %3905 = vmatprep.subr.mxu0 %v4488_v1  ;;  %v1666_v19 = vld [vmem:[#allocation7 + $0x60] sm:$0xff] }
 0x48f   : > { %v4202_v43 = vpop.eup %4201 }
 0x490   : > { %v1061_v20 = vsel %vm1054_vm4, %v4202_v43, 0.0 }
 0x491   : > { %1062 = vadd.xlane.f32.xlu1 %v1061_v20  ;;  %v1664_v20 = vld [vmem:[#allocation7 + $0x50] sm:$0xff] }
 0x4a2   : > { %1139 = vrot.lane.b32.xlu1 %v4800_v29, %s4491_s1 }
 0x51a   : > { %v1063_v45 = vpop.xlane.xlu1 %1062 }
 0x51b   : > { %4203 = vrcp.f32 %v1063_v45  ;;  %v1662_v45 = vld [vmem:[#allocation7 + $0x40] sm:$0xff] }
 0x51e   : > { %v1140_v48 = vpop.permute.xlu1 %1139 }
 0x528   : > { %v4204_v46 = vpop.eup %4203 }
 0x529   : > { %v1065_v47 = vmul.f32 %v4204_v46, %v4202_v43  ;;  %v1665_v43 = vld [vmem:[#allocation7 + $0x58] sm:$0xff] }
 0x52a   : > { %v1661_v46 = vld [vmem:[#allocation7 + $0x38] sm:$0xff] }
 0x52b   : > { %3869 = vmatmul.mubr.msk.f32.vlgmr.msra.gmra.mxu1 %vm1054_vm4, %v1065_v47  ;;  %v1660_v47 = vld [vmem:[#allocation7 + $0x30] sm:$0xff] }
 0x52c   : > { %3872 = vmatpush3.xpose.msk.msra.mxu1 %vm977_vm2, %v1142_v44  ;;  %3873 = vmatprep.mubr.msk.f32.mxu1 %vm4489_vm0, %v4488_v1  ;;  %v1663_v44 = vld [vmem:[#allocation7 + $0x48] sm:$0xff] }
 0x52d   : > { %3876 = vmatprep.subr.mxu1 %v4488_v1 }
 0x52f   : > { %3874 = vmatmul.mubr.msk.f32.vlgmr.msra.gmra.mxu1 %vm977_vm2, %v1140_v48  ;;  %v1659_v48 = vld [vmem:[#allocation7 + $0x28] sm:$0xff] }
 0x530   : > { %3877 = vmatpush3.msra.mxu1 %v1230_v49  ;;  %3878 = vmatprep.mubr.msk.f32.mxu1 %vm4489_vm0, %v4488_v1  ;;  %v1658_v49 = vld [vmem:[#allocation7 + $0x20] sm:$0xff] }
 0x531   : > { %3881 = vmatprep.subr.mxu1 %v4488_v1 }
 0x5eb   : > { %v4836_v50 = vpop.f32.mrf.mxu1 }
 0x5ed   : > { %v3870_v51 = vpop.f32.mrf.mxu1 }
 0x5ee   : > { %v1657_v51 = vld [vmem:[#allocation7 + $0x18] sm:$0xff] }
 0x5ef   : > { %v1213_v52 = vpop.f32.mrf.mxu1 }
 0x5f0   : > { %v1214_v53 = vadd.f32 %v1213_v52, %v4819_v36  ;;  %v1656_v52 = vld [vmem:[#allocation7 + $0x10] sm:$0xff] }
 0x5f1   : > { %v3875_v54 = vpop.f32.mrf.mxu1 }
 0x5f2   : > { %v1217_v55 = vsel %vm1054_vm4, %v1214_v53, -inf  ;;  %v1654_v54 = vld [vmem:[#allocation7] sm:$0xff] }
 0x5f3   : > { %1218 = vmax.xlane.f32.xlu1 %v1217_v55 }
 0x604   : > { %1394 = vrot.lane.b32.xlu1 %v4802_v30, %s4493_s22 }
 0x608   : > { %1472 = vrot.lane.b32.xlu1 %v904_v32, %s4494_s24 }
 0x67c   : > { %v1219_v56 = vpop.xlane.xlu1 %1218 }
 0x67d   : > { %v1220_v57 = vsub.f32 %v1214_v53, %v1219_v56  ;;  %v1655_v53 = vld [vmem:[#allocation7 + $0x8] sm:$0xff] }
 0x67f   : > { %v1221_v58 = vmul.f32 1.442695, %v1220_v57 }
 0x680   : > { %v1395_v3 = vpop.permute.xlu1 %1394 }
 0x681   : > { %4205 = vpow2.f32 %v1221_v58 }
 0x684   : > { %v1473_v15 = vpop.permute.xlu1 %1472 }
 0x68e   : > { %v4206_v59 = vpop.eup %4205 }
 0x68f   : > { %v1223_v60 = vsel %vm1054_vm4, %v4206_v59, 0.0 }
 0x690   : > { %1224 = vadd.xlane.f32.xlu0 %v1223_v60 }
 0x6a6   : > { %1307 = vrot.lane.b32.xlu0 %v904_v32, %s4493_s22 }
 0x6aa   : > { %1305 = vrot.lane.b32.xlu0 %v4800_v29, %s4493_s22 }
 0x719   : > { %v1225_v61 = vpop.xlane.xlu0 %1224 }
 0x71a   : > { %4207 = vrcp.f32 %v1225_v61 }
 0x71d   : > { %v1308_v63 = vpop.permute.xlu0 %1307 }
 0x721   : > { %v1306_v2 = vpop.permute.xlu0 %1305 }
 0x727   : > { %v4208_v62 = vpop.eup %4207 }
 0x728   : > { %v1227_v0 = vmul.f32 %v4208_v62, %v4206_v59 }
 0x72a   : > { %3879 = vmatmul.mubr.msk.f32.vlgmr.msra.gmra.mxu1 %vm1054_vm4, %v1227_v0  ;;  %v1808_v0 = vld [vmem:[#allocation8 + $0xf0] sm:$0xff] }
 0x72b   : > { %3882 = vmatpush3.xpose.msk.msra.mxu1 %vm977_vm2, %v1308_v63  ;;  %3883 = vmatprep.mubr.msk.f32.mxu1 %vm4489_vm0, %v4488_v1  ;;  %v1809_v63 = vld [vmem:[#allocation8 + $0xf8] sm:$0xff] }
 0x72c   : > { %3886 = vmatprep.subr.mxu1 %v4488_v1 }
 0x72e   : > { %3884 = vmatmul.mubr.msk.f32.vlgmr.msra.gmra.mxu1 %vm977_vm2, %v1306_v2  ;;  %v1807_v2 = vld [vmem:[#allocation8 + $0xe8] sm:$0xff] }
 0x72f   : > { %3887 = vmatpush3.msra.mxu1 %v1395_v3  ;;  %3888 = vmatprep.mubr.msk.f32.mxu1 %vm4489_vm0, %v4488_v1  ;;  %v1806_v3 = vld [vmem:[#allocation8 + $0xe0] sm:$0xff] }
 0x730   : > { %3891 = vmatprep.subr.mxu1 %v4488_v1 }
 0x7ea   : > { %v1301_v4 = vpop.f32.mrf.mxu1 }
 0x7ec   : > { %v3880_v5 = vpop.f32.mrf.mxu1 }
 0x7ee   : > { %v1379_v6 = vpop.f32.mrf.mxu1 }
 0x7ef   : > { %v1380_v7 = vadd.f32 %v1379_v6, %v4819_v36 }
 0x7f0   : > { %v3885_v8 = vpop.f32.mrf.mxu1 }
 0x7f1   : > { %v1383_v9 = vsel %vm1054_vm4, %v1380_v7, -inf }
 0x7f2   : > { %1384 = vmax.xlane.f32.xlu0 %v1383_v9  ;;  %v1805_v9 = vld [vmem:[#allocation8 + $0xd8] sm:$0xff] }
 0x87b   : > { %v1385_v10 = vpop.xlane.xlu0 %1384 }
 0x87c   : > { %v1386_v11 = vsub.f32 %v1380_v7, %v1385_v10  ;;  %v1804_v10 = vld [vmem:[#allocation8 + $0xd0] sm:$0xff] }
 0x87e   : > { %v1387_v12 = vmul.f32 1.442695, %v1386_v11  ;;  %v1803_v11 = vld [vmem:[#allocation8 + $0xc8] sm:$0xff] }
 0x880   : > { %4209 = vpow2.f32 %v1387_v12  ;;  %v1802_v12 = vld [vmem:[#allocation8 + $0xc0] sm:$0xff] }
 0x88d   : > { %v4210_v13 = vpop.eup %4209 }
 0x88e   : > { %v1389_v14 = vsel %vm1054_vm4, %v4210_v13, 0.0 }
 0x88f   : > { %1390 = vadd.xlane.f32.xlu1 %v1389_v14  ;;  %v1799_v14 = vld [vmem:[#allocation8 + $0xa8] sm:$0xff] }
 0x8a0   : > { %1470 = vrot.lane.b32.xlu1 %v4800_v29, %s4494_s24 }
 0x918   : > { %v1391_v16 = vpop.xlane.xlu1 %1390 }
 0x919   : > { %4211 = vrcp.f32 %v1391_v16  ;;  %v1797_v16 = vld [vmem:[#allocation8 + $0x98] sm:$0xff] }
 0x91c   : > { %v1471_v21 = vpop.permute.xlu1 %1470 }
 0x926   : > { %v4212_v17 = vpop.eup %4211 }
 0x927   : > { %v1393_v18 = vmul.f32 %v4212_v17, %v4210_v13  ;;  %v1801_v13 = vld [vmem:[#allocation8 + $0xb8] sm:$0xff]  ;;  %v1796_v17 = vld [vmem:[#allocation8 + $0x90] sm:$0xff] }
 0x929   : > { %3889 = vmatmul.mubr.msk.f32.vlgmr.msra.gmra.mxu1 %vm1054_vm4, %v1393_v18  ;;  %v1795_v18 = vld [vmem:[#allocation8 + $0x88] sm:$0xff] }
 0x92a   : > { %3892 = vmatpush3.xpose.msk.msra.mxu1 %vm977_vm2, %v1473_v15  ;;  %3893 = vmatprep.mubr.msk.f32.mxu1 %vm4489_vm0, %v4488_v1  ;;  %v1798_v15 = vld [vmem:[#allocation8 + $0xa0] sm:$0xff] }
 0x92b   : > { %3896 = vmatprep.subr.mxu1 %v4488_v1 }
 0x92d   : > { %3894 = vmatmul.mubr.msk.f32.vlgmr.msra.gmra.mxu1 %vm977_vm2, %v1471_v21  ;;  %v1794_v21 = vld [vmem:[#allocation8 + $0x80] sm:$0xff] }
 0x92e   : > { %3898 = vmatprep.mubr.msk.f32.mxu1 %vm4489_vm0, %v4488_v1 }
 0x9e9   : > { %v1466_v22 = vpop.f32.mrf.mxu1 }
 0x9eb   : > { %v3890_v23 = vpop.f32.mrf.mxu1 }
 0x9ec   : > { %v1792_v23 = vld [vmem:[#allocation8 + $0x70] sm:$0xff] }
 0x9ed   : > { %v1544_v24 = vpop.f32.mrf.mxu1 }
 0x9ee   : > { %v1545_v25 = vadd.f32 %v1544_v24, %v4819_v36  ;;  %v1791_v24 = vld [vmem:[#allocation8 + $0x68] sm:$0xff] }
 0x9ef   : > { %v3895_v26 = vpop.f32.mrf.mxu1 }
 0x9f0   : > { %v1548_v27 = vsel %vm1054_vm4, %v1545_v25, -inf  ;;  %v1789_v26 = vld [vmem:[#allocation8 + $0x58] sm:$0xff] }
 0x9f1   : > { %1549 = vmax.xlane.f32.xlu1 %v1548_v27  ;;  %v1788_v27 = vld [vmem:[#allocation8 + $0x50] sm:$0xff] }
 0xa7a   : > { %v1550_v28 = vpop.xlane.xlu1 %1549 }
 0xa7b   : > { %v1551_v29 = vsub.f32 %v1545_v25, %v1550_v28  ;;  %v1790_v25 = vld [vmem:[#allocation8 + $0x60] sm:$0xff]  ;;  %v1787_v28 = vld [vmem:[#allocation8 + $0x48] sm:$0xff] }
 0xa7d   : > { %v1552_v32 = vmul.f32 1.442695, %v1551_v29  ;;  %v1786_v29 = vld [vmem:[#allocation8 + $0x40] sm:$0xff] }
 0xa7f   : > { %4213 = vpow2.f32 %v1552_v32  ;;  %v1785_v32 = vld [vmem:[#allocation8 + $0x38] sm:$0xff] }
 0xa8c   : > { %v4214_v33 = vpop.eup %4213 }
 0xa8d   : > { %v1554_v35 = vsel %vm1054_vm4, %v4214_v33, 0.0 }
 0xa8e   : > { %1555 = vadd.xlane.f32.xlu0 %v1554_v35  ;;  %v1783_v35 = vld [vmem:[#allocation8 + $0x28] sm:$0xff] }
 0xaa4   : > { %1559 = vrot.lane.b32.xlu0 %v4802_v30, %s4494_s24  ;;  %v1667_v30 = vld [vmem:[#allocation7 + $0x68] sm:$0xff] }
 0xaa5   : > { %3906 = vmatpush3.msra.mxu0 %v1667_v30  ;;  %v1910_v30 = vld [vmem:[#allocation10 + $0x78] sm:$0xff] }
 0xaa6   : > { %3907 = vmatprep.subr.mxu0 %v4488_v1 }
 0xaa7   : > { %3908 = vmatpush3.msra.mxu0 %v1666_v19  ;;  %v1925_v19 = vld [vmem:[#allocation10 + $0xf0] sm:$0xff] }
 0xaa8   : > { %1636 = vrot.lane.b32.xlu0 %v1301_v4, %s4495_s19  ;;  %3909 = vmatprep.subr.mxu0 %v4488_v1 }
 0xaa9   : > { %3910 = vmatpush3.msra.mxu0 %v1665_v43  ;;  %v1909_v43 = vld [vmem:[#allocation10 + $0x70] sm:$0xff] }
 0xaaa   : > { %3911 = vmatprep.subr.mxu0 %v4488_v1 }
 0xaab   : > { %3912 = vmatpush3.msra.mxu0 %v1664_v20  ;;  %v1924_v20 = vld [vmem:[#allocation10 + $0xe8] sm:$0xff] }
 0xaac   : > { %1640 = vrot.lane.b32.xlu0 %v1466_v22, %s4496_s27  ;;  %3913 = vmatprep.subr.mxu0 %v4488_v1  ;;  %v1793_v22 = vld [vmem:[#allocation8 + $0x78] sm:$0xff] }
 0xaad   : > { %3914 = vmatpush3.msra.mxu0 %v1663_v44  ;;  %v1908_v44 = vld [vmem:[#allocation10 + $0x68] sm:$0xff] }
 0xaae   : > { %3915 = vmatprep.subr.mxu0 %v4488_v1 }
 0xaaf   : > { %3916 = vmatpush3.msra.mxu0 %v1662_v45  ;;  %v1923_v45 = vld [vmem:[#allocation10 + $0xe0] sm:$0xff] }
 0xab0   : > { %3917 = vmatprep.subr.mxu0 %v4488_v1 }
 0xab1   : > { %3918 = vmatpush3.msra.mxu0 %v1661_v46  ;;  %v1907_v46 = vld [vmem:[#allocation10 + $0x60] sm:$0xff] }
 0xab2   : > { %3919 = vmatprep.subr.mxu0 %v4488_v1 }
 0xab3   : > { %3920 = vmatpush3.msra.mxu0 %v1660_v47  ;;  %v1922_v47 = vld [vmem:[#allocation10 + $0xd8] sm:$0xff] }
 0xab4   : > { %3921 = vmatprep.subr.mxu0 %v4488_v1 }
 0xab5   : > { %3922 = vmatpush3.msra.mxu0 %v1659_v48  ;;  %v1906_v48 = vld [vmem:[#allocation10 + $0x58] sm:$0xff] }
 0xab6   : > { %3923 = vmatprep.subr.mxu0 %v4488_v1 }
 0xab7   : > { %3924 = vmatpush3.msra.mxu0 %v1658_v49  ;;  %v1921_v49 = vld [vmem:[#allocation10 + $0xd0] sm:$0xff] }
 0xab8   : > { %3925 = vmatprep.subr.mxu0 %v4488_v1 }
 0xab9   : > { %3926 = vmatpush3.msra.mxu0 %v1657_v51  ;;  %v1905_v51 = vld [vmem:[#allocation10 + $0x50] sm:$0xff] }
 0xaba   : > { %3927 = vmatprep.subr.mxu0 %v4488_v1 }
 0xabb   : > { %3928 = vmatpush3.msra.mxu0 %v1656_v52  ;;  %v1920_v52 = vld [vmem:[#allocation10 + $0xc8] sm:$0xff] }
 0xabc   : > { %3929 = vmatprep.subr.mxu0 %v4488_v1 }
 0xabd   : > { %3930 = vmatpush3.msra.mxu0 %v1655_v53  ;;  %v1904_v53 = vld [vmem:[#allocation10 + $0x48] sm:$0xff] }
 0xabe   : > { %3931 = vmatprep.subr.mxu0 %v4488_v1 }
 0xabf   : > { %3932 = vmatpush3.msra.mxu0 %v1654_v54  ;;  %v1919_v54 = vld [vmem:[#allocation10 + $0xc0] sm:$0xff] }
 0xac0   : > { %3654 = vmatprep.subr.mxu0 %v1926_v42 }
 0xb17   : > { %v1556_v37 = vpop.xlane.xlu0 %1555 }
 0xb18   : > { %4215 = vrcp.f32 %v1556_v37  ;;  %v1782_v37 = vld [vmem:[#allocation8 + $0x20] sm:$0xff] }
 0xb1b   : > { %v1560_v38 = vpop.permute.xlu0 %1559 }
 0xb1c   : > { %3897 = vmatpush3.msra.mxu1 %v1560_v38  ;;  %v1781_v38 = vld [vmem:[#allocation8 + $0x18] sm:$0xff] }
 0xb1d   : > { %1822 = vmatprep.subr.mxu1 %v1809_v63  ;;  %v1899_v63 = vld [vmem:[#allocation10 + $0x20] sm:$0xff] }
 0xb1f   : > { %v1637_v57 = vpop.permute.xlu0 %1636 }
 0xb20   : > { %v1647_v59 = vsel %vm977_vm2, %v4836_v50, %v1637_v57  ;;  %v3550_v50 = vld [vmem:[%s5164_s7] ss:$0 sm:$0xff]  ;;  %v1902_v57 = vld [vmem:[#allocation10 + $0x38] sm:$0xff] }
 0xb23   : > { %v1641_v58 = vpop.permute.xlu0 %1640 }
 0xb24   : > { %v1649_v60 = vsel %vm1648_vm5, %v1647_v59, %v1641_v58  ;;  %v1917_v58 = vld [vmem:[#allocation10 + $0xb0] sm:$0xff] }
 0xb25   : > { %v4216_v39 = vpop.eup %4215  ;;  %v1901_v59 = vld [vmem:[#allocation10 + $0x30] sm:$0xff] }
 0xb26   : > { %v1558_v40 = vmul.f32 %v4216_v39, %v4214_v33  ;;  %v1784_v33 = vld [vmem:[#allocation8 + $0x30] sm:$0xff] }
 0xb27   : > { %v1780_v39 = vld [vmem:[#allocation8 + $0x10] sm:$0xff] }
 0xb28   : > { %3899 = vmatmul.mubr.msk.f32.vlgmr.msra.gmra.mxu1 %vm1054_vm4, %v1558_v40  ;;  %v1779_v40 = vld [vmem:[#allocation8 + $0x8] sm:$0xff] }
 0xb29   : > { %1886 = vmatprep.mubr.f32.mxu1 %v4488_v1  ;;  %1823 = vmatpush1.msra.mxu1 %v1808_v0 }
 0xb2a   : > { %1824 = vmatprep.subr.mxu1 %v1807_v2 }
 0xb2b   : > { %1825 = vmatpush1.msra.mxu1 %v1806_v3 }
 0xb2c   : > { %1826 = vmatprep.subr.mxu1 %v1805_v9 }
 0xb2d   : > { %1827 = vmatpush1.msra.mxu1 %v1804_v10  ;;  %v3551_v10 = vld [vmem:[%s5165_s8] ss:$0 sm:$0xff] }
 0xb2e   : > { %1828 = vmatprep.subr.mxu1 %v1803_v11 }
 0xb2f   : > { %1829 = vmatpush1.msra.mxu1 %v1802_v12  ;;  %v3552_v12 = vld [vmem:[%s5166_s9] ss:$0 sm:$0xff] }
 0xb30   : > { %1830 = vmatprep.subr.mxu1 %v1801_v13 }
 0xbe8   : > { %v1631_v55 = vpop.f32.mrf.mxu1 }
 0xbe9   : > { %1644 = vrot.lane.b32.xlu0 %v1631_v55, %s4497_s25  ;;  %v1903_v55 = vld [vmem:[#allocation10 + $0x40] sm:$0xff] }
 0xbea   : > { %v3900_v56 = vpop.f32.mrf.mxu1 }
 0xbeb   : > { %v1918_v56 = vld [vmem:[#allocation10 + $0xb8] sm:$0xff] }
 0xc5b   : > { %v1645_v61 = vpop.permute.xlu0 %1644 }
 0xc5c   : > { %v1651_v62 = vsel %vm1650_vm6, %v1649_v60, %v1645_v61  ;;  %v1916_v60 = vld [vmem:[#allocation10 + $0xa8] sm:$0xff] }
 0xc5d   : > { %3934 = vmatmul.mubr.msk.f32.vlgmr.msra.gmra.mxu0 %vm1652_vm7, %v1651_v62  ;;  %v1900_v61 = vld [vmem:[#allocation10 + $0x28] sm:$0xff]  ;;  %v1915_v62 = vld [vmem:[#allocation10 + $0xa0] sm:$0xff] }
 0xc5e   : > { %3655 = vmatpush3.msra.mxu0 %v1910_v30 }
 0xc5f   : > { %3656 = vmatprep.subr.mxu0 %v1925_v19 }
 0xc60   : > { %3657 = vmatpush3.msra.mxu0 %v1909_v43  ;;  %v3553_v43 = vld [vmem:[%s5170_s13] ss:$0 sm:$0xff] }
 0xc61   : > { %3658 = vmatprep.subr.mxu0 %v1924_v20 }
 0xc62   : > { %3659 = vmatpush3.msra.mxu0 %v1908_v44 }
 0xc63   : > { %3660 = vmatprep.subr.mxu0 %v1923_v45 }
 0xc64   : > { %3661 = vmatpush3.msra.mxu0 %v1907_v46  ;;  %v2081_v46 = vld [vmem:[#allocation5 + $0x2d8] sm:$0xff] }
 0xc65   : > { %3662 = vmatprep.subr.mxu0 %v1922_v47  ;;  %v2080_v47 = vld [vmem:[#allocation5 + $0x2d0] sm:$0xff] }
 0xc66   : > { %3663 = vmatpush3.msra.mxu0 %v1906_v48  ;;  %v2082_v48 = vld [vmem:[#allocation5 + $0x2e0] sm:$0xff] }
 0xc67   : > { %3664 = vmatprep.subr.mxu0 %v1921_v49  ;;  %v2078_v49 = vld [vmem:[#allocation5 + $0x2c0] sm:$0xff] }
 0xc68   : > { %3665 = vmatpush3.msra.mxu0 %v1905_v51  ;;  %v2077_v51 = vld [vmem:[#allocation5 + $0x2b8] sm:$0xff] }
 0xc69   : > { %3666 = vmatprep.subr.mxu0 %v1920_v52  ;;  %v2079_v52 = vld [vmem:[#allocation5 + $0x2c8] sm:$0xff] }
 0xc6a   : > { %3667 = vmatpush3.msra.mxu0 %v1904_v53  ;;  %v2074_v53 = vld [vmem:[#allocation5 + $0x2a0] sm:$0xff] }
 0xc6b   : > { %3668 = vmatprep.subr.mxu0 %v1919_v54  ;;  %v2076_v54 = vld [vmem:[#allocation5 + $0x2b0] sm:$0xff] }
 0xc6c   : > { %3669 = vmatpush3.msra.mxu0 %v1903_v55  ;;  %v2072_v55 = vld [vmem:[#allocation5 + $0x290] sm:$0xff] }
 0xc6d   : > { %3670 = vmatprep.subr.mxu0 %v1918_v56  ;;  %v2071_v56 = vld [vmem:[#allocation5 + $0x288] sm:$0xff] }
 0xc6e   : > { %3671 = vmatpush3.msra.mxu0 %v1902_v57  ;;  %v2073_v57 = vld [vmem:[#allocation5 + $0x298] sm:$0xff] }
 0xc6f   : > { %3672 = vmatprep.subr.mxu0 %v1917_v58  ;;  %v2069_v58 = vld [vmem:[#allocation5 + $0x278] sm:$0xff] }
 0xc70   : > { %3673 = vmatpush3.msra.mxu0 %v1901_v59  ;;  %v2068_v59 = vld [vmem:[#allocation5 + $0x270] sm:$0xff] }
 0xc71   : > { %3674 = vmatprep.subr.mxu0 %v1916_v60  ;;  %v2070_v60 = vld [vmem:[#allocation5 + $0x280] sm:$0xff] }
 0xc72   : > { %3675 = vmatpush3.msra.mxu0 %v1900_v61  ;;  %v2066_v61 = vld [vmem:[#allocation5 + $0x260] sm:$0xff] }
 0xc73   : > { %3676 = vmatprep.subr.mxu0 %v1915_v62  ;;  %v2065_v62 = vld [vmem:[#allocation5 + $0x258] sm:$0xff] }
 0xc74   : > { %3677 = vmatpush3.msra.mxu0 %v1899_v63  ;;  %v2067_v63 = vld [vmem:[#allocation5 + $0x268] sm:$0xff] }
 0xd1d   : > { %v1736_v4 = vpop.f32.mrf.mxu0 }
 0xd1e   : > { %v1740_v5 = vadd.f32 %v1736_v4, %v4769_v31  ;;  %v1800_v31 = vld [vmem:[#allocation8 + $0xb0] sm:$0xff] }
 0xd1f   : > { %v3935_v6 = vpop.f32.mrf.mxu0  ;;  %1831 = vmatpush1.msra.mxu1 %v1800_v31 }
 0xd20   : > { %v4903_v7 = vadd.f32 %v3550_v50, %v1740_v5  ;;  %1832 = vmatprep.subr.mxu1 %v1799_v14  ;;  %v1914_v14 = vld [vmem:[#allocation10 + $0x98] sm:$0xff] }
 0xd21   : > { %1833 = vmatpush1.msra.mxu1 %v1798_v15  ;;  %3678 = vmatprep.subr.mxu0 %v1914_v14  ;;  %v1898_v15 = vld [vmem:[#allocation10 + $0x18] sm:$0xff]  ;;  %v2052_v14 = vld [vmem:[#allocation5 + $0x1f0] sm:$0xff] }
 0xd22   : > { %1751 = vadd.xlane.f32.xlu1 %v4903_v7  ;;  %v1754_v8 = vmul.f32 %v4903_v7, %v4903_v7  ;;  %1834 = vmatprep.subr.mxu1 %v1797_v16  ;;  %v1913_v16 = vld [vmem:[#allocation10 + $0x90] sm:$0xff] }
 0xd23   : > { %1835 = vmatpush1.msra.mxu1 %v1796_v17  ;;  %3679 = vmatpush3.msra.mxu0 %v1898_v15  ;;  %v1897_v17 = vld [vmem:[#allocation10 + $0x10] sm:$0xff] }
 0xd24   : > { %1755 = vadd.xlane.f32.xlu0 %v1754_v8  ;;  %1836 = vmatprep.subr.mxu1 %v1795_v18  ;;  %v1912_v18 = vld [vmem:[#allocation10 + $0x88] sm:$0xff]  ;;  %v2048_v15 = vld [vmem:[#allocation5 + $0x1d0] sm:$0xff] }
 0xd25   : > { %1837 = vmatpush1.msra.mxu1 %v1794_v21  ;;  %3680 = vmatprep.subr.mxu0 %v1913_v16  ;;  %v1896_v21 = vld [vmem:[#allocation10 + $0x8] sm:$0xff] }
 0xd26   : > { %1838 = vmatprep.subr.mxu1 %v1793_v22  ;;  %3681 = vmatpush3.msra.mxu0 %v1897_v17  ;;  %v1911_v22 = vld [vmem:[#allocation10 + $0x80] sm:$0xff]  ;;  %v2047_v16 = vld [vmem:[#allocation5 + $0x1c8] sm:$0xff]  ;;  %v2049_v17 = vld [vmem:[#allocation5 + $0x1d8] sm:$0xff] }
 0xd27   : > { %1839 = vmatpush1.msra.mxu1 %v1792_v23  ;;  %3682 = vmatprep.subr.mxu0 %v1912_v18  ;;  %v1895_v23 = vld [vmem:[#allocation10] sm:$0xff]  ;;  %v2045_v18 = vld [vmem:[#allocation5 + $0x1b8] sm:$0xff] }
 0xd28   : > { %1840 = vmatprep.subr.mxu1 %v1791_v24  ;;  %3683 = vmatpush3.msra.mxu0 %v1896_v21  ;;  %v1814_v24 = vsub.s32 0, %v4815_v34  ;;  %v2044_v21 = vld [vmem:[#allocation5 + $0x1b0] sm:$0xff] }
 0xd29   : > { %1841 = vmatpush1.msra.mxu1 %v1790_v25  ;;  %3684 = vmatprep.subr.mxu0 %v1911_v22  ;;  %v1810_v25 = vld [vmem:[%s5168_s11] sm:$0x3] }
 0xd2a   : > { %1842 = vmatprep.subr.mxu1 %v1789_v26  ;;  %3685 = vmatpush3.msra.mxu0 %v1895_v23  ;;  %v1818_v26 = vsub.s32 1, %v4815_v34  ;;  %v2046_v22 = vld [vmem:[#allocation5 + $0x1c0] sm:$0xff] }
 0xd2b   : > { %1843 = vmatpush1.msra.mxu1 %v1788_v27  ;;  %3936 = vmatprep.subr.mxu0 %v4488_v1  ;;  %v1815_v27 = vrot.slane %v1810_v25, %v1814_v24  ;;  %v2042_v23 = vld [vmem:[#allocation5 + $0x1a0] sm:$0xff] }
 0xd2c   : > { %1844 = vmatprep.subr.mxu1 %v1787_v28  ;;  %v1819_v28 = vrot.slane %v1810_v25, %v1818_v26  ;;  %v2041_v25 = vld [vmem:[#allocation5 + $0x198] sm:$0xff] }
 0xd2d   : > { %1845 = vmatpush1.msra.mxu1 %v1786_v29 }
 0xd2e   : > { %1846 = vmatprep.subr.mxu1 %v1785_v32 }
 0xd2f   : > { %1847 = vmatpush1.msra.mxu1 %v1784_v33 }
 0xd30   : > { %1848 = vmatprep.subr.mxu1 %v1783_v35 }
 0xd31   : > { %1849 = vmatpush1.msra.mxu1 %v1782_v37 }
 0xd32   : > { %1850 = vmatprep.subr.mxu1 %v1781_v38 }
 0xd33   : > { %1851 = vmatpush1.msra.mxu1 %v1780_v39  ;;  %v2084_v39 = vld [vmem:[#allocation5 + $0x2f0] sm:$0xff] }
 0xd34   : > { %1852 = vmatprep.subr.mxu1 %v1779_v40  ;;  %v2083_v40 = vld [vmem:[#allocation5 + $0x2e8] sm:$0xff] }
 0xd35   : > { %1853 = vmatpush1.msra.mxu1 %v1778_v41  ;;  %v2085_v41 = vld [vmem:[#allocation5 + $0x2f8] sm:$0xff] }
 0xd36   : > { %2086 = vmatprep.subr.mxu1 %v2084_v39 }
 0xdab   : > { %v1752_v0 = vpop.xlane.xlu1 %1751 }
 0xdac   : > { %v1753_v2 = vmul.f32 0.015625, %v1752_v0  ;;  %v2063_v0 = vld [vmem:[#allocation5 + $0x248] sm:$0xff] }
 0xdad   : > { %v1756_v3 = vpop.xlane.xlu0 %1755 }
 0xdae   : > { %v1758_v4 = vmul.f32 %v1753_v2, %v1753_v2  ;;  %v1757_v50 = vmul.f32 0.015625, %v1756_v3  ;;  %v1760_v8 = vsub.f32 %v4903_v7, %v1753_v2  ;;  %v2062_v2 = vld [vmem:[#allocation5 + $0x240] sm:$0xff]  ;;  %v2064_v3 = vld [vmem:[#allocation5 + $0x250] sm:$0xff] }
 0xdb0   : > { %v1759_v5 = vsub.f32 %v1757_v50, %v1758_v4  ;;  %v2060_v4 = vld [vmem:[#allocation5 + $0x230] sm:$0xff]  ;;  %v2059_v50 = vld [vmem:[#allocation5 + $0x228] sm:$0xff] }
 0xdb2   : > { %v1761_v6 = vadd.f32 1e-05, %v1759_v5  ;;  %v2061_v5 = vld [vmem:[#allocation5 + $0x238] sm:$0xff] }
 0xdb4   : > { %4217 = vrsqrt.f32 %v1761_v6  ;;  %v2057_v6 = vld [vmem:[#allocation5 + $0x218] sm:$0xff] }
 0xdc1   : > { %v4218_v9 = vpop.eup %4217 }
 0xdc2   : > { %v1763_v11 = vmul.f32 %v4218_v9, %v1760_v8  ;;  %v2056_v8 = vld [vmem:[#allocation5 + $0x210] sm:$0xff]  ;;  %v2058_v9 = vld [vmem:[#allocation5 + $0x220] sm:$0xff] }
 0xdc4   : > { %v1770_v13 = vmul.f32 %v3551_v10, %v1763_v11  ;;  %v2054_v10 = vld [vmem:[#allocation5 + $0x200] sm:$0xff]  ;;  %v2053_v11 = vld [vmem:[#allocation5 + $0x1f8] sm:$0xff] }
 0xdc6   : > { %v1777_v31 = vadd.f32 %v3552_v12, %v1770_v13  ;;  %v2055_v12 = vld [vmem:[#allocation5 + $0x208] sm:$0xff] }
 0xdc7   : > { %v2051_v13 = vld [vmem:[#allocation5 + $0x1e8] sm:$0xff] }
 0xdc8   : > { %1887 = vmatmul.mubr.f32.vlgmr.msra.gmra.mxu1 %v1777_v31  ;;  %v2050_v31 = vld [vmem:[#allocation5 + $0x1e0] sm:$0xff] }
 0xdc9   : > { %2150 = vmatprep.mubr.f32.mxu1 %v4488_v1  ;;  %2087 = vmatpush1.msra.mxu1 %v2083_v40 }
 0xdca   : > { %2088 = vmatprep.subr.mxu1 %v2081_v46 }
 0xdcb   : > { %2089 = vmatpush1.msra.mxu1 %v2080_v47 }
 0xdcc   : > { %2090 = vmatprep.subr.mxu1 %v2078_v49 }
 0xdcd   : > { %2091 = vmatpush1.msra.mxu1 %v2077_v51 }
 0xe88   : > { %v1888_v29 = vpop.f32.mrf.mxu1 }
 0xe89   : > { %v1889_v32 = vadd.f32 %v1888_v29, %v1815_v27  ;;  %v2043_v27 = vld [vmem:[#allocation5 + $0x1a8] sm:$0xff]  ;;  %v2038_v29 = vld [vmem:[#allocation5 + $0x180] sm:$0xff] }
 0xe8a   : > { %v1890_v33 = vpop.f32.mrf.mxu1 }
 0xe8b   : > { %v1891_v35 = vadd.f32 %v1890_v33, %v1819_v28  ;;  %v1893_v38 = vmax.f32 %v1889_v32, 0.0  ;;  %v2039_v28 = vld [vmem:[#allocation5 + $0x188] sm:$0xff]  ;;  %v2040_v32 = vld [vmem:[#allocation5 + $0x190] sm:$0xff] }
 0xe8d   : > { %v1894_v37 = vmax.f32 %v1891_v35, 0.0 }
 0xe8f   : > { %1991 = vmatprep.mubr.f32.mxu0 %v1894_v37 }
 0xe90   : > { %1992 = vmatmul.mubr.f32.vlgmr.msra.gmra.mxu0 %v1893_v38 }
 0xe91   : > { %3968 = vmatprep.mubr.msk.f32.mxu0 %vm4489_vm0, %v4488_v1  ;;  %3937 = vmatpush3.msra.mxu0 %v2085_v41 }
 0xe92   : > { %3938 = vmatprep.subr.mxu0 %v4488_v1 }
 0xe93   : > { %3939 = vmatpush3.msra.mxu0 %v2082_v48 }
 0xe94   : > { %3940 = vmatprep.subr.mxu0 %v4488_v1 }
 0xe95   : > { %3941 = vmatpush3.msra.mxu0 %v2079_v52 }
 0xe96   : > { %3942 = vmatprep.subr.mxu0 %v4488_v1 }
 0xe97   : > { %3943 = vmatpush3.msra.mxu0 %v2076_v54 }
 0xe98   : > { %3944 = vmatprep.subr.mxu0 %v4488_v1 }
 0xe99   : > { %3945 = vmatpush3.msra.mxu0 %v2073_v57 }
 0xe9a   : > { %3946 = vmatprep.subr.mxu0 %v4488_v1 }
 0xe9b   : > { %3947 = vmatpush3.msra.mxu0 %v2070_v60 }
 0xe9c   : > { %3948 = vmatprep.subr.mxu0 %v4488_v1 }
 0xe9d   : > { %3949 = vmatpush3.msra.mxu0 %v2067_v63 }
 0xe9e   : > { %3950 = vmatprep.subr.mxu0 %v4488_v1 }
 0xe9f   : > { %3951 = vmatpush3.msra.mxu0 %v2064_v3 }
 0xea0   : > { %3952 = vmatprep.subr.mxu0 %v4488_v1 }
 0xea1   : > { %3953 = vmatpush3.msra.mxu0 %v2061_v5 }
 0xea2   : > { %3954 = vmatprep.subr.mxu0 %v4488_v1 }
 0xea3   : > { %3955 = vmatpush3.msra.mxu0 %v2058_v9 }
 0xea4   : > { %3956 = vmatprep.subr.mxu0 %v4488_v1 }
 0xea5   : > { %3957 = vmatpush3.msra.mxu0 %v2055_v12 }
 0xea6   : > { %3958 = vmatprep.subr.mxu0 %v4488_v1 }
 0xea7   : > { %3959 = vmatpush3.msra.mxu0 %v2052_v14 }
 0xea8   : > { %3960 = vmatprep.subr.mxu0 %v4488_v1 }
 0xea9   : > { %3961 = vmatpush3.msra.mxu0 %v2049_v17 }
 0xeaa   : > { %3962 = vmatprep.subr.mxu0 %v4488_v1 }
 0xeab   : > { %3963 = vmatpush3.msra.mxu0 %v2046_v22 }
 0xeac   : > { %3964 = vmatprep.subr.mxu0 %v4488_v1 }
 0xead   : > { %3965 = vmatpush3.msra.mxu0 %v2043_v27 }
 0xeae   : > { %3966 = vmatprep.subr.mxu0 %v4488_v1 }
 0xeaf   : > { %3967 = vmatpush3.msra.mxu0 %v2040_v32 }
 0xeb0   : > { %4011 = vmatprep.subr.mxu0 %v4488_v1 }
 0xf50   : > { %v3686_v42 = vpop.f32.mrf.mxu0 }
 0xf52   : > { %v3687_v30 = vpop.f32.mrf.mxu0 }
 0xf53   : > { %v3688_v19 = vadd.f32 %v3687_v30, %v3686_v42 }
 0xf55   : > { %v1997_v20 = vadd.f32 %v3688_v19, %v4903_v7  ;;  %v2075_v7 = vld [vmem:[#allocation5 + $0x2a8] sm:$0xff]  ;;  %v3556_v19 = vld [vmem:[%s5213_s3 + $0x1] ss:$0 sm:$0xff] }
 0xf56   : > { %2092 = vmatprep.subr.mxu1 %v2075_v7 }
 0xf57   : > { %v4933_v44 = vadd.f32 %v3553_v43, %v1997_v20  ;;  %2093 = vmatpush1.msra.mxu1 %v2074_v53  ;;  %v3557_v20 = vld [vmem:[%s5161_s4 + $0x1] ss:$0 sm:$0xff] }
 0xf58   : > { %2094 = vmatprep.subr.mxu1 %v2072_v55 }
 0xf59   : > { %2010 = vadd.xlane.f32.xlu1 %v4933_v44  ;;  %v2013_v45 = vmul.f32 %v4933_v44, %v4933_v44  ;;  %2095 = vmatpush1.msra.mxu1 %v2071_v56 }
 0xf5a   : > { %2096 = vmatprep.subr.mxu1 %v2069_v58 }
 0xf5b   : > { %2097 = vmatpush1.msra.mxu1 %v2068_v59 }
 0xf5c   : > { %2098 = vmatprep.subr.mxu1 %v2066_v61 }
 0xf5d   : > { %2014 = vadd.xlane.f32.xlu1 %v2013_v45  ;;  %2099 = vmatpush1.msra.mxu1 %v2065_v62 }
 0xf5e   : > { %2100 = vmatprep.subr.mxu1 %v2063_v0 }
 0xf5f   : > { %2101 = vmatpush1.msra.mxu1 %v2062_v2 }
 0xf60   : > { %2102 = vmatprep.subr.mxu1 %v2060_v4 }
 0xf61   : > { %2103 = vmatpush1.msra.mxu1 %v2059_v50 }
 0xf62   : > { %2104 = vmatprep.subr.mxu1 %v2057_v6 }
 0xf63   : > { %2105 = vmatpush1.msra.mxu1 %v2056_v8 }
 0xf64   : > { %2106 = vmatprep.subr.mxu1 %v2054_v10 }
 0xf65   : > { %2107 = vmatpush1.msra.mxu1 %v2053_v11 }
 0xf66   : > { %2108 = vmatprep.subr.mxu1 %v2051_v13 }
 0xf67   : > { %2109 = vmatpush1.msra.mxu1 %v2050_v31 }
 0xf68   : > { %2110 = vmatprep.subr.mxu1 %v2048_v15 }
 0xf69   : > { %2111 = vmatpush1.msra.mxu1 %v2047_v16 }
 0xf6a   : > { %2112 = vmatprep.subr.mxu1 %v2045_v18 }
 0xf6b   : > { %2113 = vmatpush1.msra.mxu1 %v2044_v21 }
 0xf6c   : > { %2114 = vmatprep.subr.mxu1 %v2042_v23 }
 0xf6d   : > { %2115 = vmatpush1.msra.mxu1 %v2041_v25 }
 0xf6e   : > { %2116 = vmatprep.subr.mxu1 %v2039_v28 }
 0xf6f   : > { %2117 = vmatpush1.msra.mxu1 %v2038_v29 }
 0xf70   : > { %3971 = vmatprep.subr.mxu1 %v4488_v1 }
 0xfe2   : > { %v2011_v33 = vpop.xlane.xlu1 %2010 }
 0xfe3   : > { %v2012_v35 = vmul.f32 0.015625, %v2011_v33 }
 0xfe5   : > { %v2017_v38 = vmul.f32 %v2012_v35, %v2012_v35  ;;  %v2019_v42 = vsub.f32 %v4933_v44, %v2012_v35 }
 0xfe6   : > { %v2015_v37 = vpop.xlane.xlu1 %2014 }
 0xfe7   : > { %v2016_v39 = vmul.f32 0.015625, %v2015_v37 }
 0xfe9   : > { %v2018_v40 = vsub.f32 %v2016_v39, %v2017_v38 }
 0xfeb   : > { %v2020_v41 = vadd.f32 1e-05, %v2018_v40 }
 0xfed   : > { %4219 = vrsqrt.f32 %v2020_v41 }
 0xffa   : > { %v4220_v30 = vpop.eup %4219 }
 0xffb   : > { %v2022_v43 = vmul.f32 %v4220_v30, %v2019_v42 }
 0xffd   : > { %v2029_v45 = vmul.f32 %v3556_v19, %v2022_v43 }
 0xfff   : > { %v2036_v46 = vadd.f32 %v3557_v20, %v2029_v45 }
0x1001   : > { %2151 = vmatmul.mubr.f32.vlgmr.msra.gmra.mxu1 %v2036_v46  ;;  %3969 = vmatmul.mubr.f32.vlgmr.msra.gmra.mxu0 %v2036_v46 }
0x1002   : > { %3973 = vmatprep.mubr.msk.f32.mxu1 %vm4489_vm0, %v4488_v1  ;;  %4043 = vmatprep.mubr.msk.f32.mxu0 %vm4489_vm0, %v4488_v1 }
0x10c1   : > { %v4965_v47 = vpop.f32.mrf.mxu1  ;;  %v4967_v48 = vpop.f32.mrf.mxu0 }
0x10c2   : > { %2387 = vrot.lane.b32.xlu0 %v4965_v47, %s4491_s1 }
0x10c3   : > { %v4971_v49 = vpop.f32.mrf.mxu1  ;;  %v3970_v51 = vpop.f32.mrf.mxu0 }
0x10c4   : > { %3972 = vmatpush3.xpose.msk.msra.mxu1 %vm977_vm2, %v4971_v49 }
0x10c5   : > { %3976 = vmatprep.subr.mxu1 %v4488_v1 }
0x10c7   : > { %3974 = vmatmul.mubr.msk.f32.vlgmr.msra.gmra.mxu1 %vm977_vm2, %v4965_v47 }
0x10c8   : > { %3977 = vmatpush3.msra.mxu1 %v4967_v48  ;;  %3978 = vmatprep.mubr.msk.f32.mxu1 %vm4489_vm0, %v4488_v1 }
0x10c9   : > { %3981 = vmatprep.subr.mxu1 %v4488_v1 }
0x1134   : > { %v2388_v0 = vpop.permute.xlu0 %2387 }
0x1187   : > { %v2299_v52 = vpop.f32.mrf.mxu1 }
0x1188   : > { %v2300_v7 = vadd.f32 %v2299_v52, %v4819_v36 }
0x1189   : > { %v3975_v53 = vpop.f32.mrf.mxu1 }
0x118a   : > { %v2303_v54 = vsel %vm1054_vm4, %v2300_v7, -inf }
0x118b   : > { %2304 = vmax.xlane.f32.xlu1 %v2303_v54 }
0x1214   : > { %v2305_v55 = vpop.xlane.xlu1 %2304 }
0x1215   : > { %v2306_v56 = vsub.f32 %v2300_v7, %v2305_v55 }
0x1217   : > { %v2307_v57 = vmul.f32 1.442695, %v2306_v56  ;;  %v2914_v56 = vld [vmem:[#allocation7 + $0xf0] sm:$0xff] }
0x1219   : > { %4221 = vpow2.f32 %v2307_v57  ;;  %v2913_v57 = vld [vmem:[#allocation7 + $0xe8] sm:$0xff] }
0x1226   : > { %v4222_v58 = vpop.eup %4221 }
0x1227   : > { %v2309_v59 = vsel %vm1054_vm4, %v4222_v58, 0.0 }
0x1228   : > { %2310 = vadd.xlane.f32.xlu1 %v2309_v59  ;;  %v2911_v59 = vld [vmem:[#allocation7 + $0xd8] sm:$0xff] }
0x1239   : > { %2389 = vrot.lane.b32.xlu1 %v4971_v49, %s4491_s1 }
0x12b1   : > { %v2311_v60 = vpop.xlane.xlu1 %2310 }
0x12b2   : > { %4223 = vrcp.f32 %v2311_v60  ;;  %v2910_v60 = vld [vmem:[#allocation7 + $0xd0] sm:$0xff] }
0x12b5   : > { %v2390_v63 = vpop.permute.xlu1 %2389 }
0x12bf   : > { %v4224_v61 = vpop.eup %4223 }
0x12c0   : > { %v2313_v62 = vmul.f32 %v4224_v61, %v4222_v58  ;;  %v2912_v58 = vld [vmem:[#allocation7 + $0xe0] sm:$0xff]  ;;  %v2909_v61 = vld [vmem:[#allocation7 + $0xc8] sm:$0xff] }
0x12c2   : > { %3979 = vmatmul.mubr.msk.f32.vlgmr.msra.gmra.mxu1 %vm1054_vm4, %v2313_v62  ;;  %v2908_v62 = vld [vmem:[#allocation7 + $0xc0] sm:$0xff] }
0x12c3   : > { %3982 = vmatpush3.xpose.msk.msra.mxu1 %vm977_vm2, %v2390_v63  ;;  %3983 = vmatprep.mubr.msk.f32.mxu1 %vm4489_vm0, %v4488_v1  ;;  %v2907_v63 = vld [vmem:[#allocation7 + $0xb8] sm:$0xff] }
0x12c4   : > { %3986 = vmatprep.subr.mxu1 %v4488_v1 }
0x12c6   : > { %3984 = vmatmul.mubr.msk.f32.vlgmr.msra.gmra.mxu1 %vm977_vm2, %v2388_v0  ;;  %v2906_v0 = vld [vmem:[#allocation7 + $0xb0] sm:$0xff] }
0x12c7   : > { %3988 = vmatprep.mubr.msk.f32.mxu1 %vm4489_vm0, %v4488_v1 }
0x1382   : > { %v4995_v2 = vpop.f32.mrf.mxu1 }
0x1384   : > { %v3980_v3 = vpop.f32.mrf.mxu1 }
0x1385   : > { %v2905_v3 = vld [vmem:[#allocation7 + $0xa8] sm:$0xff] }
0x1386   : > { %v2461_v4 = vpop.f32.mrf.mxu1 }
0x1387   : > { %v2462_v50 = vadd.f32 %v2461_v4, %v4819_v36  ;;  %v2904_v4 = vld [vmem:[#allocation7 + $0xa0] sm:$0xff] }
0x1388   : > { %v3985_v5 = vpop.f32.mrf.mxu1 }
0x1389   : > { %v2465_v6 = vsel %vm1054_vm4, %v2462_v50, -inf  ;;  %v2902_v5 = vld [vmem:[#allocation7 + $0x90] sm:$0xff] }
0x138a   : > { %2466 = vmax.xlane.f32.xlu1 %v2465_v6  ;;  %v2901_v6 = vld [vmem:[#allocation7 + $0x88] sm:$0xff] }
0x139b   : > { %2477 = vrot.lane.b32.xlu1 %v4967_v48, %s4491_s1  ;;  %s652_s1 = sand.u32 1, %s4465_s28  }
0x139c   : > { %s3383_s29 = scalar_lea.sflag [#allocation4], %s652_s1 }
0x139f   : > { %2553 = vrot.lane.b32.xlu1 %v4965_v47, %s4493_s22 }
0x1413   : > { %v2467_v8 = vpop.xlane.xlu1 %2466 }
0x1414   : > { %v2468_v9 = vsub.f32 %v2462_v50, %v2467_v8  ;;  %v2903_v50 = vld [vmem:[#allocation7 + $0x98] sm:$0xff]  ;;  %v2900_v8 = vld [vmem:[#allocation7 + $0x80] sm:$0xff] }
0x1416   : > { %v2469_v10 = vmul.f32 1.442695, %v2468_v9 }
0x1417   : > { %v2478_v11 = vpop.permute.xlu1 %2477 }
0x1418   : > { %4225 = vpow2.f32 %v2469_v10  ;;  %3987 = vmatpush3.msra.mxu1 %v2478_v11 }
0x1419   : > { %3991 = vmatprep.subr.mxu1 %v4488_v1 }
0x141b   : > { %v2554_v17 = vpop.permute.xlu1 %2553 }
0x1425   : > { %v4226_v12 = vpop.eup %4225 }
0x1426   : > { %v2471_v13 = vsel %vm1054_vm4, %v4226_v12, 0.0 }
0x1427   : > { %2472 = vadd.xlane.f32.xlu0 %v2471_v13 }
0x143d   : > { %2555 = vrot.lane.b32.xlu0 %v4971_v49, %s4493_s22 }
0x14b0   : > { %v2473_v31 = vpop.xlane.xlu0 %2472 }
0x14b1   : > { %4227 = vrcp.f32 %v2473_v31 }
0x14b4   : > { %v2556_v16 = vpop.permute.xlu0 %2555 }
0x14be   : > { %v4228_v14 = vpop.eup %4227 }
0x14bf   : > { %v2475_v15 = vmul.f32 %v4228_v14, %v4226_v12 }
0x14c1   : > { %3989 = vmatmul.mubr.msk.f32.vlgmr.msra.gmra.mxu1 %vm1054_vm4, %v2475_v15 }
0x14c2   : > { %3992 = vmatpush3.xpose.msk.msra.mxu1 %vm977_vm2, %v2556_v16  ;;  %3993 = vmatprep.mubr.msk.f32.mxu1 %vm4489_vm0, %v4488_v1  ;;  %v3059_v16 = vld [vmem:[#allocation8 + $0x1f8] sm:$0xff] }
0x14c3   : > { %3996 = vmatprep.subr.mxu1 %v4488_v1 }
0x14c5   : > { %3994 = vmatmul.mubr.msk.f32.vlgmr.msra.gmra.mxu1 %vm977_vm2, %v2554_v17  ;;  %v3058_v17 = vld [vmem:[#allocation8 + $0x1f0] sm:$0xff] }
0x14c6   : > { %3998 = vmatprep.mubr.msk.f32.mxu1 %vm4489_vm0, %v4488_v1 }
0x1581   : > { %v2549_v18 = vpop.f32.mrf.mxu1 }
0x1583   : > { %v3990_v21 = vpop.f32.mrf.mxu1 }
0x1584   : > { %v3056_v21 = vld [vmem:[#allocation8 + $0x1e0] sm:$0xff] }
0x1585   : > { %v2627_v22 = vpop.f32.mrf.mxu1 }
0x1586   : > { %v2628_v23 = vadd.f32 %v2627_v22, %v4819_v36 }
0x1587   : > { %v3995_v25 = vpop.f32.mrf.mxu1 }
0x1588   : > { %v2631_v27 = vsel %vm1054_vm4, %v2628_v23, -inf }
0x1589   : > { %2632 = vmax.xlane.f32.xlu1 %v2631_v27 }
0x159a   : > { %2642 = vrot.lane.b32.xlu1 %v4967_v48, %s4493_s22  ;;  %s3531_s22 = sshll.u32 %s652_s1, 3 }
0x159b   : > { %s654_s26 = scalar_lea.vmem [#allocation13], %s3531_s22 }
0x159c   : > { %s3396_s23 = sshll.u32 %s654_s26, 4  ;;  %s3397_s23 = int_to_ptr.vmem [resolvable:$true] %s3396_s23 }
0x159d   : > { %s4397_s3 = scalar_lea.vmem %s3397_s23, 128 }
0x159e   : > { %2718 = vrot.lane.b32.xlu1 %v4965_v47, %s4494_s24  ;;  %p4398_p9 = scmp.ne.s32.totalorder %s3397_s23, %s4397_s3 }
0x15a0   : > { %p4399_p6 = pnand %p4398_p9, %p5217_p4 }
0x15a2   : > { %p4400_p5 = pneg %p4399_p6 }
0x1612   : > { %v2633_v28 = vpop.xlane.xlu1 %2632 }
0x1613   : > { %v2634_v29 = vsub.f32 %v2628_v23, %v2633_v28 }
0x1615   : > { %v2635_v32 = vmul.f32 1.442695, %v2634_v29  ;;  %v3055_v29 = vld [vmem:[#allocation8 + $0x1d8] sm:$0xff] }
0x1616   : > { %v2643_v33 = vpop.permute.xlu1 %2642 }
0x1617   : > { %4229 = vpow2.f32 %v2635_v32  ;;  %3997 = vmatpush3.msra.mxu1 %v2643_v33  ;;  %v3054_v32 = vld [vmem:[#allocation8 + $0x1d0] sm:$0xff]  ;;  %v3053_v33 = vld [vmem:[#allocation8 + $0x1c8] sm:$0xff] }
0x1618   : > { %4001 = vmatprep.subr.mxu1 %v4488_v1 }
0x161a   : > { %v2719_v42 = vpop.permute.xlu1 %2718 }
0x1624   : > { %v4230_v35 = vpop.eup %4229 }
0x1625   : > { %v2637_v37 = vsel %vm1054_vm4, %v4230_v35, 0.0 }
0x1626   : > { %2638 = vadd.xlane.f32.xlu0 %v2637_v37  ;;  %v3051_v37 = vld [vmem:[#allocation8 + $0x1b8] sm:$0xff] }
0x163c   : > { %2720 = vrot.lane.b32.xlu0 %v4971_v49, %s4494_s24 }
0x16af   : > { %v2639_v38 = vpop.xlane.xlu0 %2638 }
0x16b0   : > { %4231 = vrcp.f32 %v2639_v38  ;;  %v3049_v38 = vld [vmem:[#allocation8 + $0x1a8] sm:$0xff] }
0x16b3   : > { %v2721_v41 = vpop.permute.xlu0 %2720 }
0x16bd   : > { %v4232_v39 = vpop.eup %4231 }
0x16be   : > { %v2641_v40 = vmul.f32 %v4232_v39, %v4230_v35  ;;  %v3052_v35 = vld [vmem:[#allocation8 + $0x1c0] sm:$0xff] }
0x16bf   : > { %v3048_v39 = vld [vmem:[#allocation8 + $0x1a0] sm:$0xff] }
0x16c0   : > { %3999 = vmatmul.mubr.msk.f32.vlgmr.msra.gmra.mxu1 %vm1054_vm4, %v2641_v40  ;;  %v3047_v40 = vld [vmem:[#allocation8 + $0x198] sm:$0xff] }
0x16c1   : > { %4002 = vmatpush3.xpose.msk.msra.mxu1 %vm977_vm2, %v2721_v41  ;;  %4003 = vmatprep.mubr.msk.f32.mxu1 %vm4489_vm0, %v4488_v1  ;;  %v3046_v41 = vld [vmem:[#allocation8 + $0x190] sm:$0xff] }
0x16c2   : > { %4006 = vmatprep.subr.mxu1 %v4488_v1 }
0x16c4   : > { %4004 = vmatmul.mubr.msk.f32.vlgmr.msra.gmra.mxu1 %vm977_vm2, %v2719_v42  ;;  %v3045_v42 = vld [vmem:[#allocation8 + $0x188] sm:$0xff] }
0x16c5   : > { %4008 = vmatprep.mubr.msk.f32.mxu1 %vm4489_vm0, %v4488_v1 }
0x1780   : > { %v2714_v30 = vpop.f32.mrf.mxu1 }
0x1782   : > { %v4000_v19 = vpop.f32.mrf.mxu1 }
0x1783   : > { %v3043_v19 = vld [vmem:[#allocation8 + $0x178] sm:$0xff] }
0x1784   : > { %v2792_v43 = vpop.f32.mrf.mxu1 }
0x1785   : > { %v2793_v20 = vadd.f32 %v2792_v43, %v4819_v36  ;;  %v3042_v43 = vld [vmem:[#allocation8 + $0x170] sm:$0xff] }
0x1786   : > { %v4005_v45 = vpop.f32.mrf.mxu1 }
0x1787   : > { %v2796_v46 = vsel %vm1054_vm4, %v2793_v20, -inf  ;;  %v3040_v45 = vld [vmem:[#allocation8 + $0x160] sm:$0xff] }
0x1788   : > { %2797 = vmax.xlane.f32.xlu1 %v2796_v46  ;;  %v3039_v46 = vld [vmem:[#allocation8 + $0x158] sm:$0xff] }
0x1799   : > { %2807 = vrot.lane.b32.xlu1 %v4967_v48, %s4494_s24  ;;  %v2915_v48 = vld [vmem:[#allocation7 + $0xf8] sm:$0xff]  ;;  %s4498_s24 = smov [#allocation13]  }
0x179a   : > { %4012 = vmatpush3.msra.mxu0 %v2915_v48  ;;  %v3029_v48 = vld [vmem:[#allocation8 + $0x108] sm:$0xff] }
0x179b   : > { %4013 = vmatprep.subr.mxu0 %v4488_v1 }
0x179c   : > { %4014 = vmatpush3.msra.mxu0 %v2914_v56  ;;  %v3028_v56 = vld [vmem:[#allocation8 + $0x100] sm:$0xff] }
0x179d   : > { %2888 = vrot.lane.b32.xlu1 %v2714_v30, %s4496_s27  ;;  %4015 = vmatprep.subr.mxu0 %v4488_v1  ;;  %v3044_v30 = vld [vmem:[#allocation8 + $0x180] sm:$0xff]  ;;  %s5214_s27 = sld [smem:[#allocation29_spill]] }
0x179e   : > { %4016 = vmatpush3.msra.mxu0 %v2913_v57  ;;  %v3178_v57 = vld [vmem:[#allocation10 + $0x1f8] sm:$0xff] }
0x179f   : > { %4017 = vmatprep.subr.mxu0 %v4488_v1 }
0x17a0   : > { %4018 = vmatpush3.msra.mxu0 %v2912_v58  ;;  %v3162_v58 = vld [vmem:[#allocation10 + $0x178] sm:$0xff] }
0x17a1   : > { %4019 = vmatprep.subr.mxu0 %v4488_v1 }
0x17a2   : > { %4020 = vmatpush3.msra.mxu0 %v2911_v59  ;;  %v3177_v59 = vld [vmem:[#allocation10 + $0x1f0] sm:$0xff] }
0x17a3   : > { %4021 = vmatprep.subr.mxu0 %v4488_v1 }
0x17a4   : > { %4022 = vmatpush3.msra.mxu0 %v2910_v60  ;;  %v3161_v60 = vld [vmem:[#allocation10 + $0x170] sm:$0xff] }
0x17a5   : > { %4023 = vmatprep.subr.mxu0 %v4488_v1 }
0x17a6   : > { %4024 = vmatpush3.msra.mxu0 %v2909_v61  ;;  %v3176_v61 = vld [vmem:[#allocation10 + $0x1e8] sm:$0xff] }
0x17a7   : > { %4025 = vmatprep.subr.mxu0 %v4488_v1 }
0x17a8   : > { %4026 = vmatpush3.msra.mxu0 %v2908_v62  ;;  %v3160_v62 = vld [vmem:[#allocation10 + $0x168] sm:$0xff] }
0x17a9   : > { %4027 = vmatprep.subr.mxu0 %v4488_v1 }
0x17aa   : > { %4028 = vmatpush3.msra.mxu0 %v2907_v63  ;;  %v3175_v63 = vld [vmem:[#allocation10 + $0x1e0] sm:$0xff] }
0x17ab   : > { %4029 = vmatprep.subr.mxu0 %v4488_v1 }
0x17ac   : > { %4030 = vmatpush3.msra.mxu0 %v2906_v0  ;;  %v3159_v0 = vld [vmem:[#allocation10 + $0x160] sm:$0xff] }
0x17ad   : > { %4031 = vmatprep.subr.mxu0 %v4488_v1 }
0x17ae   : > { %4032 = vmatpush3.msra.mxu0 %v2905_v3  ;;  %v3174_v3 = vld [vmem:[#allocation10 + $0x1d8] sm:$0xff] }
0x17af   : > { %4033 = vmatprep.subr.mxu0 %v4488_v1 }
0x17b0   : > { %4034 = vmatpush3.msra.mxu0 %v2904_v4  ;;  %v3158_v4 = vld [vmem:[#allocation10 + $0x158] sm:$0xff] }
0x17b1   : > { %4035 = vmatprep.subr.mxu0 %v4488_v1 }
0x17b2   : > { %4036 = vmatpush3.msra.mxu0 %v2903_v50  ;;  %v3173_v50 = vld [vmem:[#allocation10 + $0x1d0] sm:$0xff] }
0x17b3   : > { %4037 = vmatprep.subr.mxu0 %v4488_v1 }
0x17b4   : > { %4038 = vmatpush3.msra.mxu0 %v2902_v5  ;;  %v3157_v5 = vld [vmem:[#allocation10 + $0x150] sm:$0xff] }
0x17b5   : > { %4039 = vmatprep.subr.mxu0 %v4488_v1 }
0x17b6   : > { %4040 = vmatpush3.msra.mxu0 %v2901_v6  ;;  %v3172_v6 = vld [vmem:[#allocation10 + $0x1c8] sm:$0xff] }
0x17b7   : > { %4041 = vmatprep.subr.mxu0 %v4488_v1 }
0x17b8   : > { %4042 = vmatpush3.msra.mxu0 %v2900_v8  ;;  %v3156_v8 = vld [vmem:[#allocation10 + $0x148] sm:$0xff] }
0x17b9   : > { %3739 = vmatprep.subr.mxu0 %v3178_v57 }
0x1811   : > { %v2798_v47 = vpop.xlane.xlu1 %2797 }
0x1812   : > { %v2799_v49 = vsub.f32 %v2793_v20, %v2798_v47  ;;  %v3041_v20 = vld [vmem:[#allocation8 + $0x168] sm:$0xff]  ;;  %v3038_v47 = vld [vmem:[#allocation8 + $0x150] sm:$0xff] }
0x1814   : > { %v2800_v51 = vmul.f32 1.442695, %v2799_v49  ;;  %v3037_v49 = vld [vmem:[#allocation8 + $0x148] sm:$0xff] }
0x1815   : > { %v2808_v52 = vpop.permute.xlu1 %2807 }
0x1816   : > { %4233 = vpow2.f32 %v2800_v51  ;;  %4007 = vmatpush3.msra.mxu1 %v2808_v52  ;;  %v3036_v51 = vld [vmem:[#allocation8 + $0x140] sm:$0xff]  ;;  %v3035_v52 = vld [vmem:[#allocation8 + $0x138] sm:$0xff] }
0x1817   : > { %3073 = vmatprep.subr.mxu1 %v3059_v16  ;;  %v3167_v16 = vld [vmem:[#allocation10 + $0x1a0] sm:$0xff] }
0x1819   : > { %v2889_v12 = vpop.permute.xlu1 %2888 }
0x1823   : > { %v4234_v7 = vpop.eup %4233 }
0x1824   : > { %v2802_v53 = vsel %vm1054_vm4, %v4234_v7, 0.0 }
0x1825   : > { %2803 = vadd.xlane.f32.xlu0 %v2802_v53  ;;  %v3033_v53 = vld [vmem:[#allocation8 + $0x128] sm:$0xff] }
0x183b   : > { %2884 = vrot.lane.b32.xlu0 %v2549_v18, %s4495_s19  ;;  %v3057_v18 = vld [vmem:[#allocation8 + $0x1e8] sm:$0xff] }
0x18ae   : > { %v2804_v36 = vpop.xlane.xlu0 %2803 }
0x18af   : > { %4235 = vrcp.f32 %v2804_v36  ;;  %v3032_v36 = vld [vmem:[#allocation8 + $0x120] sm:$0xff] }
0x18b2   : > { %v2885_v11 = vpop.permute.xlu0 %2884 }
0x18b3   : > { %v2895_v13 = vsel %vm977_vm2, %v4995_v2, %v2885_v11  ;;  %v3572_v2 = vld [vmem:[%s5164_s7 + $0x1] ss:$0 sm:$0xff]  ;;  %v3170_v11 = vld [vmem:[#allocation10 + $0x1b8] sm:$0xff] }
0x18b4   : > { %v2896_v31 = vsel %vm1648_vm5, %v2895_v13, %v2889_v12  ;;  %v3154_v12 = vld [vmem:[#allocation10 + $0x138] sm:$0xff]  ;;  %v3169_v13 = vld [vmem:[#allocation10 + $0x1b0] sm:$0xff] }
0x18bc   : > { %v4236_v54 = vpop.eup %4235 }
0x18bd   : > { %v2806_v55 = vmul.f32 %v4236_v54, %v4234_v7  ;;  %v3034_v7 = vld [vmem:[#allocation8 + $0x130] sm:$0xff]  ;;  %v3031_v54 = vld [vmem:[#allocation8 + $0x118] sm:$0xff] }
0x18bf   : > { %4009 = vmatmul.mubr.msk.f32.vlgmr.msra.gmra.mxu1 %vm1054_vm4, %v2806_v55  ;;  %v3030_v55 = vld [vmem:[#allocation8 + $0x110] sm:$0xff] }
0x18c0   : > { %3137 = vmatprep.mubr.f32.mxu1 %v4488_v1  ;;  %3074 = vmatpush1.msra.mxu1 %v3058_v17  ;;  %v3151_v17 = vld [vmem:[#allocation10 + $0x120] sm:$0xff] }
0x18c1   : > { %3075 = vmatprep.subr.mxu1 %v3057_v18 }
0x18c2   : > { %3076 = vmatpush1.msra.mxu1 %v3056_v21 }
0x18c3   : > { %3077 = vmatprep.subr.mxu1 %v3055_v29 }
0x18c4   : > { %3078 = vmatpush1.msra.mxu1 %v3054_v32 }
0x18c5   : > { %3079 = vmatprep.subr.mxu1 %v3053_v33  ;;  %v3575_v33 = vld [vmem:[%s5165_s8 + $0x1] ss:$0 sm:$0xff] }
0x18c6   : > { %3080 = vmatpush1.msra.mxu1 %v3052_v35 }
0x18c7   : > { %3081 = vmatprep.subr.mxu1 %v3051_v37  ;;  %v3576_v37 = vld [vmem:[%s5166_s9 + $0x1] ss:$0 sm:$0xff] }
0x197f   : > { %v2879_v9 = vpop.f32.mrf.mxu1 }
0x1980   : > { %2892 = vrot.lane.b32.xlu1 %v2879_v9, %s4497_s25  ;;  %v3171_v9 = vld [vmem:[#allocation10 + $0x1c0] sm:$0xff]  ;;  %s3584_s25 = sshll.u32 %s4615_s0, 7  ;;  %s4401_s0 = sshll.u32 %s4498_s24, 4  ;;  %s4402_s0 = int_to_ptr.vmem [resolvable:$false] %s4401_s0 }
0x1981   : > { %v4010_v10 = vpop.f32.mrf.mxu1  ;;  %s5122_s20 = scalar_lea.hbm %s5215_s30, %s3584_s25  ;;  %s4403_s22 = scalar_lea.vmem %s4402_s0, 256 }
0x1982   : > { %v3155_v10 = vld [vmem:[#allocation10 + $0x140] sm:$0xff]  ;;  %p4404_p7 = scmp.lt.s32.totalorder %s3397_s23, %s4402_s0  ;;  %p4405_p13 = scmp.lt.s32.totalorder %s4403_s22, %s4397_s3 }
0x1984   : > { %p4406_p8 = por %p4405_p13, %p4404_p7 }
0x1986   : > { %p4407_p11 = pnand %p4406_p8, %p4400_p5 }
0x19f2   : > { %v2893_v14 = vpop.permute.xlu1 %2892 }
0x19f3   : > { %v2897_v15 = vsel %vm1650_vm6, %v2896_v31, %v2893_v14  ;;  %v3153_v31 = vld [vmem:[#allocation10 + $0x130] sm:$0xff]  ;;  %v3168_v14 = vld [vmem:[#allocation10 + $0x1a8] sm:$0xff] }
0x19f4   : > { %4044 = vmatmul.mubr.msk.f32.vlgmr.msra.gmra.mxu0 %vm1652_vm7, %v2897_v15  ;;  %v3152_v15 = vld [vmem:[#allocation10 + $0x128] sm:$0xff] }
0x19f5   : > { %3740 = vmatpush3.msra.mxu0 %v3162_v58 }
0x19f6   : > { %3741 = vmatprep.subr.mxu0 %v3177_v59  ;;  %v3301_v59 = vld [vmem:[#allocation11 + $0x68] sm:$0xff] }
0x19f7   : > { %3742 = vmatpush3.msra.mxu0 %v3161_v60  ;;  %v3300_v60 = vld [vmem:[#allocation11 + $0x60] sm:$0xff] }
0x19f8   : > { %3743 = vmatprep.subr.mxu0 %v3176_v61  ;;  %v3299_v61 = vld [vmem:[#allocation11 + $0x58] sm:$0xff] }
0x19f9   : > { %3744 = vmatpush3.msra.mxu0 %v3160_v62  ;;  %v3298_v62 = vld [vmem:[#allocation11 + $0x50] sm:$0xff] }
0x19fa   : > { %3745 = vmatprep.subr.mxu0 %v3175_v63  ;;  %v3297_v63 = vld [vmem:[#allocation11 + $0x48] sm:$0xff] }
0x19fb   : > { %3746 = vmatpush3.msra.mxu0 %v3159_v0  ;;  %v3295_v0 = vld [vmem:[#allocation11 + $0x38] sm:$0xff] }
0x19fc   : > { %3747 = vmatprep.subr.mxu0 %v3174_v3  ;;  %v3294_v3 = vld [vmem:[#allocation11 + $0x30] sm:$0xff] }
0x19fd   : > { %3748 = vmatpush3.msra.mxu0 %v3158_v4  ;;  %v3293_v4 = vld [vmem:[#allocation11 + $0x28] sm:$0xff] }
0x19fe   : > { %3749 = vmatprep.subr.mxu0 %v3173_v50  ;;  %v3292_v50 = vld [vmem:[#allocation11 + $0x20] sm:$0xff] }
0x19ff   : > { %3750 = vmatpush3.msra.mxu0 %v3157_v5  ;;  %v3291_v5 = vld [vmem:[#allocation11 + $0x18] sm:$0xff] }
0x1a00   : > { %3751 = vmatprep.subr.mxu0 %v3172_v6  ;;  %v3290_v6 = vld [vmem:[#allocation11 + $0x10] sm:$0xff] }
0x1a01   : > { %3752 = vmatpush3.msra.mxu0 %v3156_v8  ;;  %v3289_v8 = vld [vmem:[#allocation11 + $0x8] sm:$0xff] }
0x1a02   : > { %3753 = vmatprep.subr.mxu0 %v3171_v9  ;;  %v3288_v9 = vld [vmem:[#allocation11] sm:$0xff] }
0x1a03   : > { %3754 = vmatpush3.msra.mxu0 %v3155_v10 }
0x1a04   : > { %3755 = vmatprep.subr.mxu0 %v3170_v11 }
0x1a05   : > { %3756 = vmatpush3.msra.mxu0 %v3154_v12 }
0x1a06   : > { %3757 = vmatprep.subr.mxu0 %v3169_v13 }
0x1a07   : > { %3758 = vmatpush3.msra.mxu0 %v3153_v31 }
0x1a08   : > { %3759 = vmatprep.subr.mxu0 %v3168_v14 }
0x1a09   : > { %3760 = vmatpush3.msra.mxu0 %v3152_v15 }
0x1a0a   : > { %3761 = vmatprep.subr.mxu0 %v3167_v16 }
0x1a0b   : > { %3762 = vmatpush3.msra.mxu0 %v3151_v17 }
0x1ab4   : > { %v2982_v22 = vpop.f32.mrf.mxu0 }
0x1ab5   : > { %v2986_v23 = vadd.f32 %v2982_v22, %v4933_v44  ;;  %v3050_v44 = vld [vmem:[#allocation8 + $0x1b0] sm:$0xff] }
0x1ab6   : > { %v4045_v25 = vpop.f32.mrf.mxu0  ;;  %3082 = vmatpush1.msra.mxu1 %v3050_v44 }
0x1ab7   : > { %v5067_v27 = vadd.f32 %v3572_v2, %v2986_v23  ;;  %3083 = vmatprep.subr.mxu1 %v3049_v38 }
0x1ab8   : > { %3084 = vmatpush1.msra.mxu1 %v3048_v39  ;;  %v3166_v39 = vld [vmem:[#allocation10 + $0x198] sm:$0xff] }
0x1ab9   : > { %3000 = vadd.xlane.f32.xlu1 %v5067_v27  ;;  %v3003_v28 = vmul.f32 %v5067_v27, %v5067_v27  ;;  %3085 = vmatprep.subr.mxu1 %v3047_v40  ;;  %v3150_v40 = vld [vmem:[#allocation10 + $0x118] sm:$0xff] }
0x1aba   : > { %3086 = vmatpush1.msra.mxu1 %v3046_v41  ;;  %3763 = vmatprep.subr.mxu0 %v3166_v39  ;;  %v3165_v41 = vld [vmem:[#allocation10 + $0x190] sm:$0xff] }
0x1abb   : > { %3004 = vadd.xlane.f32.xlu0 %v3003_v28  ;;  %3087 = vmatprep.subr.mxu1 %v3045_v42  ;;  %v3149_v42 = vld [vmem:[#allocation10 + $0x110] sm:$0xff] }
0x1abc   : > { %3088 = vmatpush1.msra.mxu1 %v3044_v30  ;;  %3764 = vmatpush3.msra.mxu0 %v3150_v40  ;;  %v3164_v30 = vld [vmem:[#allocation10 + $0x188] sm:$0xff] }
0x1abd   : > { %3089 = vmatprep.subr.mxu1 %v3043_v19  ;;  %3765 = vmatprep.subr.mxu0 %v3165_v41  ;;  %v3148_v19 = vld [vmem:[#allocation10 + $0x108] sm:$0xff] }
0x1abe   : > { %3090 = vmatpush1.msra.mxu1 %v3042_v43  ;;  %3766 = vmatpush3.msra.mxu0 %v3149_v42  ;;  %v3163_v43 = vld [vmem:[#allocation10 + $0x180] sm:$0xff] }
0x1abf   : > { %3091 = vmatprep.subr.mxu1 %v3041_v20  ;;  %3767 = vmatprep.subr.mxu0 %v3164_v30  ;;  %v3147_v20 = vld [vmem:[#allocation10 + $0x100] sm:$0xff] }
0x1ac0   : > { %3092 = vmatpush1.msra.mxu1 %v3040_v45  ;;  %3768 = vmatpush3.msra.mxu0 %v3148_v19  ;;  %v3577_v45 = vld [vmem:[%s5168_s11 + $0x2] sm:$0x3] }
0x1ac1   : > { %3093 = vmatprep.subr.mxu1 %v3039_v46  ;;  %3769 = vmatprep.subr.mxu0 %v3163_v43  ;;  %v3066_v46 = vrot.slane %v3577_v45, %v1814_v24 }
0x1ac2   : > { %3094 = vmatpush1.msra.mxu1 %v3038_v47  ;;  %3770 = vmatpush3.msra.mxu0 %v3147_v20  ;;  %v3070_v47 = vrot.slane %v3577_v45, %v1818_v26  ;;  %v3579_v26 = vld [vmem:[%s5170_s13 + $0x1] ss:$0 sm:$0xff] }
0x1ac3   : > { %3095 = vmatprep.subr.mxu1 %v3037_v49 }
0x1ac4   : > { %3096 = vmatpush1.msra.mxu1 %v3036_v51 }
0x1ac5   : > { %3097 = vmatprep.subr.mxu1 %v3035_v52 }
0x1ac6   : > { %3098 = vmatpush1.msra.mxu1 %v3034_v7 }
0x1ac7   : > { %3099 = vmatprep.subr.mxu1 %v3033_v53 }
0x1ac8   : > { %3100 = vmatpush1.msra.mxu1 %v3032_v36 }
0x1ac9   : > { %3101 = vmatprep.subr.mxu1 %v3031_v54  ;;  %v3303_v54 = vld [vmem:[#allocation11 + $0x78] sm:$0xff] }
0x1aca   : > { %3102 = vmatpush1.msra.mxu1 %v3030_v55  ;;  %v3302_v55 = vld [vmem:[#allocation11 + $0x70] sm:$0xff] }
0x1acb   : > { %3103 = vmatprep.subr.mxu1 %v3029_v48 }
0x1acc   : > { %3104 = vmatpush1.msra.mxu1 %v3028_v56 }
0x1acd   : > { %4046 = vmatprep.subr.mxu1 %v4488_v1 }
0x1b42   : > { %v3001_v18 = vpop.xlane.xlu1 %3000 }
0x1b43   : > { %v3002_v21 = vmul.f32 0.015625, %v3001_v18  ;;  %v3580_v18 = vld [vmem:[%s5171_s14] ss:$0 sm:$0xff] }
0x1b44   : > { %v3005_v22 = vpop.xlane.xlu0 %3004 }
0x1b45   : > { %v3007_v2 = vmul.f32 %v3002_v21, %v3002_v21  ;;  %v3006_v23 = vmul.f32 0.015625, %v3005_v22  ;;  %v3009_v29 = vsub.f32 %v5067_v27, %v3002_v21 }
0x1b47   : > { %v3008_v25 = vsub.f32 %v3006_v23, %v3007_v2  ;;  %v3582_v23 = vld [vmem:[%s5214_s27] ss:$0 sm:$0xff] }
0x1b49   : > { %v3010_v28 = vadd.f32 1e-05, %v3008_v25 }
0x1b4b   : > { %4237 = vrsqrt.f32 %v3010_v28 }
0x1b58   : > { %v4238_v32 = vpop.eup %4237 }
0x1b59   : > { %v3012_v35 = vmul.f32 %v4238_v32, %v3009_v29 }
0x1b5b   : > { %v3019_v44 = vmul.f32 %v3575_v33, %v3012_v35 }
0x1b5d   : > { %v3026_v38 = vadd.f32 %v3576_v37, %v3019_v44 }
0x1b5f   : > { %3138 = vmatmul.mubr.f32.vlgmr.msra.gmra.mxu1 %v3026_v38 }
0x1b60   : > { %4078 = vmatprep.mubr.msk.f32.mxu1 %vm4489_vm0, %v4488_v1  ;;  %4047 = vmatpush3.msra.mxu1 %v3303_v54 }
0x1b61   : > { %4048 = vmatprep.subr.mxu1 %v4488_v1 }
0x1b62   : > { %4049 = vmatpush3.msra.mxu1 %v3302_v55 }
0x1b63   : > { %4050 = vmatprep.subr.mxu1 %v4488_v1 }
0x1b64   : > { %4051 = vmatpush3.msra.mxu1 %v3301_v59 }
0x1b65   : > { %4052 = vmatprep.subr.mxu1 %v4488_v1 }
0x1b66   : > { %4053 = vmatpush3.msra.mxu1 %v3300_v60 }
0x1b67   : > { %4054 = vmatprep.subr.mxu1 %v4488_v1 }
0x1b68   : > { %4055 = vmatpush3.msra.mxu1 %v3299_v61 }
0x1b69   : > { %4056 = vmatprep.subr.mxu1 %v4488_v1 }
0x1b6a   : > { %4057 = vmatpush3.msra.mxu1 %v3298_v62 }
0x1b6b   : > { %4058 = vmatprep.subr.mxu1 %v4488_v1 }
0x1b6c   : > { %4059 = vmatpush3.msra.mxu1 %v3297_v63 }
0x1b6d   : > { %4060 = vmatprep.subr.mxu1 %v4488_v1 }
0x1c1f   : > { %v3139_v49 = vpop.f32.mrf.mxu1 }
0x1c20   : > { %v3140_v51 = vadd.f32 %v3139_v49, %v3066_v46 }
0x1c21   : > { %v3141_v52 = vpop.f32.mrf.mxu1 }
0x1c22   : > { %v3142_v7 = vadd.f32 %v3141_v52, %v3070_v47  ;;  %v3144_v36 = vmax.f32 %v3140_v51, 0.0 }
0x1c24   : > { %v3145_v53 = vmax.f32 %v3142_v7, 0.0 }
0x1c26   : > { %3243 = vmatprep.mubr.f32.mxu0 %v3145_v53 }
0x1c27   : > { %3244 = vmatmul.mubr.f32.vlgmr.msra.gmra.mxu0 %v3144_v36 }
0x1ce7   : > { %v3771_v24 = vpop.f32.mrf.mxu0 }
0x1ce9   : > { %v3772_v48 = vpop.f32.mrf.mxu0 }
0x1cea   : > { %v3773_v34 = vadd.f32 %v3772_v48, %v3771_v24 }
0x1cec   : > { %v3249_v56 = vadd.f32 %v3773_v34, %v5067_v27  ;;  %v3296_v27 = vld [vmem:[#allocation11 + $0x40] sm:$0xff] }
0x1ced   : > { %4061 = vmatpush3.msra.mxu1 %v3296_v27 }
0x1cee   : > { %v3258_v57 = vadd.f32 %v3579_v26, %v3249_v56  ;;  %4062 = vmatprep.subr.mxu1 %v4488_v1 }
0x1cef   : > { %4063 = vmatpush3.msra.mxu1 %v3295_v0 }
0x1cf0   : > { %3261 = vadd.xlane.f32.xlu0 %v3258_v57  ;;  %v3264_v58 = vmul.f32 %v3258_v57, %v3258_v57  ;;  %4064 = vmatprep.subr.mxu1 %v4488_v1 }
0x1cf1   : > { %4065 = vmatpush3.msra.mxu1 %v3294_v3 }
0x1cf2   : > { %3265 = vadd.xlane.f32.xlu1 %v3264_v58  ;;  %4066 = vmatprep.subr.mxu1 %v4488_v1 }
0x1cf3   : > { %4067 = vmatpush3.msra.mxu1 %v3293_v4 }
0x1cf4   : > { %4068 = vmatprep.subr.mxu1 %v4488_v1 }
0x1cf5   : > { %4069 = vmatpush3.msra.mxu1 %v3292_v50 }
0x1cf6   : > { %4070 = vmatprep.subr.mxu1 %v4488_v1 }
0x1cf7   : > { %4071 = vmatpush3.msra.mxu1 %v3291_v5 }
0x1cf8   : > { %4072 = vmatprep.subr.mxu1 %v4488_v1 }
0x1cf9   : > { %4073 = vmatpush3.msra.mxu1 %v3290_v6 }
0x1cfa   : > { %4074 = vmatprep.subr.mxu1 %v4488_v1 }
0x1cfb   : > { %4075 = vmatpush3.msra.mxu1 %v3289_v8 }
0x1cfc   : > { %4076 = vmatprep.subr.mxu1 %v4488_v1  ;;  %v3581_v1 = vld [vmem:[%s5172_s15] ss:$0 sm:$0xff] }
0x1cfd   : > { %4077 = vmatpush3.msra.mxu1 %v3288_v9 }
0x1d79   : > { %v3262_v10 = vpop.xlane.xlu0 %3261 }
0x1d7a   : > { %v3263_v11 = vmul.f32 0.015625, %v3262_v10 }
0x1d7b   : > { %v3266_v12 = vpop.xlane.xlu1 %3265 }
0x1d7c   : > { %v3268_v13 = vmul.f32 %v3263_v11, %v3263_v11  ;;  %v3267_v31 = vmul.f32 0.015625, %v3266_v12  ;;  %v3270_v16 = vsub.f32 %v3258_v57, %v3263_v11 }
0x1d7e   : > { %v3269_v14 = vsub.f32 %v3267_v31, %v3268_v13 }
0x1d80   : > { %v3271_v15 = vadd.f32 1e-05, %v3269_v14 }
0x1d82   : > { %4239 = vrsqrt.f32 %v3271_v15 }
0x1d8f   : > { %v4240_v17 = vpop.eup %4239 }
0x1d90   : > { %v3273_v21 = vmul.f32 %v4240_v17, %v3270_v16 }
0x1d92   : > { %v3280_v22 = vmul.f32 %v3580_v18, %v3273_v21 }
0x1d94   : > { %v3287_v2 = vadd.f32 %v3581_v1, %v3280_v22 }
0x1d96   : > { %4079 = vmatmul.mubr.f32.vlgmr.msra.gmra.mxu1 %v3287_v2 }
0x1e56   : > { %v3377_v25 = vpop.f32.mrf.mxu1 }
0x1e57   : > { %v3378_v28 = vadd.f32 %v3582_v23, %v3377_v25 }
0x1e58   : > { %v4080_v29 = vpop.f32.mrf.mxu1 }
0x1e59   : > { %3381 = vst [vmem:[%s654_s26] sm:$0xff] %v3378_v28 }
0x1e5a   : > { %4410 = shalt.err (!%p4407_p11)
}
0x1e5b   : > { %s4411_s19 = scalar_lea.hbm %s5122_s20, 128  ;;  %s4415_s25 = scalar_lea.hbm %s5216_s21, 256 }
0x1e5c   : > { %p4412_p0 = scmp.ne.s32.totalorder %s5122_s20, %s4411_s19  ;;  %p4416_p10 = scmp.lt.s32.totalorder %s5122_s20, %s5216_s21 }
0x1e5d   : > { %p4417_p3 = scmp.lt.s32.totalorder %s4415_s25, %s4411_s19 }
0x1e5e   : > { %p4413_p1 = pnand %p4412_p0, %p5217_p4 }
0x1e5f   : > { %p4418_p2 = por %p4417_p3, %p4416_p10 }
0x1e60   : > { %p4414_p12 = pneg %p4413_p1 }
0x1e62   : > { %p4419_p9 = pnand %p4418_p2, %p4414_p12 }
0x1e64   : > { %4422 = shalt.err (!%p4419_p9)
}
0x1e65   : > { %4105 = dma.vmem_to_hbm [thread:$0]  (%p5217_p4), %s3397_s23, 128, %s5122_s20, %s3383_s29  }
0x1e66 PF: > { %s5218_s3 = sld [smem:[#allocation21_spill]] }
0x1e67   : > { %s5219_s18 = sld [smem:[#allocation19_spill]] }
0x1e68   : > { %s5220_s30 = sld [smem:[#allocation24_spill]] }
0x1e6c   : > { %p4142_p6 = scmp.ge.s32.totalorder %s5218_s3, 2 }
0x1e6d   : > { %s3408_s24 = sand.u32 1, %s5219_s18  }
0x1e6e   : > { %p5221_p5 = scmp.ne.s32.totalorder %s5220_s30, 0  ;;  %s3409_s0 = scalar_lea.sflag [#allocation4], %s3408_s24 }
0x1e70   : > { %p4127_p7 = pnand %p4142_p6, %p5221_p5 }
0x1e72   : > { %p4128_p13 = pneg %p4127_p7 }
0x1e74   : > { %4456 = dma.done.wait (%p4128_p13), %s3409_s0, 128  }
0x1e75   : > { %4458 = vsyncadd (%p4128_p13), %s3409_s0, 4294967168  ;;  %s5222_s30 = sld [smem:[#allocation22_spill]]  ;;  %s5225_s27 = smov %s4465_s28 }
0x1e76   : > { %s5223_s22 = sld [smem:[#allocation20_spill]] }
0x1e77   : > { %s5224_s29 = sld [smem:[#allocation23_spill]] }
0x1e7b   : > { %p32_p8 = scmp.ge.s32.totalorder %s5222_s30, 4  }
0x1e7c   : > { %s5226_s28 = smov %s5223_s22 }
0x1e7d   :  { %34 = sbr.rel (!%p32_p8) target bundleno = 14 (0xe), region = 163 }
0x1e82   :  { %3414 = vsyncpa [#allocation3], 1 }
0x1e83   :  { %3416 = vsyncpa [#allocation3 + $0x1], 1 }
0x1e84   :  { %3417 = vsyncpa [#allocation6], 1 }
0x1e85   :  { %3418 = vsyncpa [#allocation9], 1 }
0x1e86   :  { %3419 = vsyncpa [#allocation12], 1 }
0x1e87   :  { %3420 = vsyncpa [#allocation4], 1 }
0x1e88   :  { %3422 = vsyncpa [#allocation4 + $0x1], 1 }

</bundles_post_ra>
